<compile_context>
chip_gen: v5e
topology: v5e:2x2
jax: 0.10.0
libtpu: 0.0.40
codegen_flags: <defaults>
</compile_context>

<pallas_src>
import math
import jax
import jax.numpy as jnp
from jax.experimental import pallas as pl
from jax.experimental.pallas import tpu as pltpu

VMEM_LIMIT = 48 * 1024 * 1024   # sized against v7x's 64 MiB ceiling, headroom left


def _round_up(a, m):
    return ((a + m - 1) // m) * m


def _time_tile(T, target=64):
    t = min(T, target)
    while T % t:
        t -= 1
    return t


def _gates(g, H):
    """PyTorch LSTM gate order: i, f, g, o (slices are 128-lane aligned)."""
    i = jax.nn.sigmoid(g[:, 0 * H:1 * H])
    f = jax.nn.sigmoid(g[:, 1 * H:2 * H])
    gg = jnp.tanh(g[:, 2 * H:3 * H])
    o = jax.nn.sigmoid(g[:, 3 * H:4 * H])
    return i, f, gg, o


# ----------------------------------------------------------------------------
# linear: M-tiled matmul + bias
# ----------------------------------------------------------------------------

def _matmul_bias_kernel(x_ref, w_ref, b_ref, o_ref):
    o_ref[...] = (jnp.dot(x_ref[...].astype(jnp.bfloat16), w_ref[...],
                          preferred_element_type=jnp.float32) + b_ref[...])


def linear(x, w, b, *, block_m=256):
    """y = x @ w + b.  x: (M, K) f32, w: (K, N) bf16, b: (N,) f32 -> (M, N) f32."""
    M, K = x.shape
    N = w.shape[1]
    Mt = min(block_m, _round_up(M, 8))
    Mpad = _round_up(M, Mt)
    if Mpad != M:
        x = jnp.pad(x, ((0, Mpad - M), (0, 0)))
    out = pl.pallas_call(
        _matmul_bias_kernel,
        grid=(Mpad // Mt,),
        in_specs=[pl.BlockSpec((Mt, K), lambda i: (i, 0)),
                  pl.BlockSpec((K, N), lambda i: (0, 0)),
                  pl.BlockSpec((1, N), lambda i: (0, 0))],
        out_specs=pl.BlockSpec((Mt, N), lambda i: (i, 0)),
        out_shape=jax.ShapeDtypeStruct((Mpad, N), jnp.float32),
        compiler_params=pltpu.CompilerParams(
            dimension_semantics=("parallel",),
            vmem_limit_bytes=VMEM_LIMIT),
    )(x, w, b.reshape(1, N))
    return out[:M]


# ----------------------------------------------------------------------------
# bilstm: both directions + fused input projection, time-chunked
# ----------------------------------------------------------------------------

def _bilstm_kernel(x_ref, wih_ref, whh_ref, b_ref, o_ref, xg_scr, h_scr, c_scr):
    d = pl.program_id(0)            # direction: 0 = forward, 1 = backward
    tb = pl.program_id(1)           # time chunk (already reversed for d=1 via index_map)
    Tt, N, D = x_ref.shape
    H = whh_ref.shape[0]

    @pl.when(tb == 0)
    def _():
        h_scr[...] = jnp.zeros_like(h_scr)
        c_scr[...] = jnp.zeros_like(c_scr)

    # Fused input-gate projection for the whole chunk: one big-M MXU matmul
    # (no (T, N, 4H) tensor ever round-trips through HBM).
    xg = jnp.dot(x_ref[...].reshape(Tt * N, D).astype(jnp.bfloat16),
                 wih_ref[...], preferred_element_type=jnp.float32) + b_ref[...]
    xg_scr[...] = xg.reshape(Tt, N, 4 * H)

    whh = whh_ref[...]              # hoisted, resident bf16 recurrent weights

    @pl.loop(0, Tt)
    def _(s):
        # In-kernel time reversal for the backward direction (index math only).
        tt = jnp.where(d == 0, s, Tt - 1 - s)
        h = h_scr[...]
        c = c_scr[...]
        g = xg_scr[tt] + jnp.dot(h.astype(jnp.bfloat16), whh,
                                 preferred_element_type=jnp.float32)
        i, f, gg, o = _gates(g, H)
        c_new = f * c + i * gg
        h_new = o * jnp.tanh(c_new)
        h_scr[...] = h_new
        c_scr[...] = c_new
        o_ref[tt] = h_new


def bilstm(x, p):
    """Bidirectional LSTM over time-major x: (T, N, D) -> (T, N, 2H)."""
    T, N, D = x.shape
    H = p['whh'].shape[1]
    Tt = _time_tile(T)
    NB = T // Tt

    def x_map(d, tb):
        return (tb + d * (NB - 1 - 2 * tb), 0, 0)

    def o_map(d, tb):
        return (tb + d * (NB - 1 - 2 * tb), 0, d)

    return pl.pallas_call(
        _bilstm_kernel,
        grid=(2, NB),
        in_specs=[pl.BlockSpec((Tt, N, D), x_map),
                  pl.BlockSpec((None, D, 4 * H), lambda d, tb: (d, 0, 0)),
                  pl.BlockSpec((None, H, 4 * H), lambda d, tb: (d, 0, 0)),
                  pl.BlockSpec((None, 1, 4 * H), lambda d, tb: (d, 0, 0))],
        out_specs=pl.BlockSpec((Tt, N, H), o_map),
        out_shape=jax.ShapeDtypeStruct((T, N, 2 * H), jnp.float32),
        scratch_shapes=[pltpu.VMEM((Tt, N, 4 * H), jnp.float32),
                        pltpu.VMEM((N, H), jnp.float32),
                        pltpu.VMEM((N, H), jnp.float32)],
        compiler_params=pltpu.CompilerParams(
            dimension_semantics=("parallel", "arbitrary"),
            vmem_limit_bytes=VMEM_LIMIT),
    )(x, p['wih'], p['whh'], p['b'])


# ----------------------------------------------------------------------------
# decoder: full attend-and-spell loop in one kernel
# ----------------------------------------------------------------------------

def _decoder_kernel(emb_ref, keys_ref, vals_ref, lens_ref,
                    wq_ref, bq_ref,
                    w1e_ref, w1c_ref, w1hh_ref, b1_ref,
                    w2ih_ref, w2hh_ref, b2_ref,
                    woh_ref, woc_ref, bout_ref,
                    o_ref,
                    xg1_scr, h1, c1, h2, c2):
    L, N, E = emb_ref.shape
    Tk = keys_ref.shape[1]
    H = w1hh_ref.shape[0]

    h1[...] = jnp.zeros_like(h1)
    c1[...] = jnp.zeros_like(c1)
    h2[...] = jnp.zeros_like(h2)
    c2[...] = jnp.zeros_like(c2)

    # ---- hoisted loop-invariants (read once, kept resident) ----
    keys_b = keys_ref[...].astype(jnp.bfloat16)        # (N, Tk, K)
    vals_b = vals_ref[...].astype(jnp.bfloat16)        # (N, Tk, V)
    wq = wq_ref[...]
    bq = bq_ref[...]
    K = wq.shape[1]
    w1c = w1c_ref[...]
    w1hh = w1hh_ref[...]
    w2ih = w2ih_ref[...]
    w2hh = w2hh_ref[...]
    b2 = b2_ref[...]
    woh = woh_ref[...]
    woc = woc_ref[...]
    bout = bout_ref[...]

    # Length-mask bias is loop-invariant: (N, 1, Tk)
    t_idx = jax.lax.broadcasted_iota(jnp.int32, (N, 1, Tk), 2)
    mask_bias = jnp.where(t_idx >= lens_ref[...].reshape(N, 1, 1),
                          jnp.float32(-1e9), jnp.float32(0.0))

    # Precompute embedding part of LSTMCell-1 gates for all L steps at once
    # (single big-M MXU matmul), fold bias in.
    xg1 = jnp.dot(emb_ref[...].reshape(L * N, E).astype(jnp.bfloat16),
                  w1e_ref[...], preferred_element_type=jnp.float32) + b1_ref[...]
    xg1_scr[...] = xg1.reshape(L, N, 4 * H)

    @pl.loop(0, L)
    def _(i):
        out_state = h2[...]                                        # (N, H)
        query = (jnp.dot(out_state.astype(jnp.bfloat16), wq,
                         preferred_element_type=jnp.float32) + bq)  # (N, K)

        # Attention: MXU contractions, softmax math in f32, recip on EUP.
        q3 = query.reshape(N, 1, K).astype(jnp.bfloat16)
        energy = jnp.einsum('nqk,ntk->nqt', q3, keys_b,
                            preferred_element_type=jnp.float32) + mask_bias
        m = jnp.max(energy, axis=-1, keepdims=True)
        e = jnp.exp(energy - m)
        attn = e * pl.reciprocal(jnp.sum(e, axis=-1, keepdims=True), approx=True)
        ctx = jnp.einsum('nqt,ntv->nqv', attn.astype(jnp.bfloat16), vals_b,
                         preferred_element_type=jnp.float32).reshape(N, -1)
        ctx_b = ctx.astype(jnp.bfloat16)

        # LSTMCell 1 -- split matmuls (no lane concat of [emb, context]).
        g1 = (xg1_scr[i]
              + jnp.dot(ctx_b, w1c, preferred_element_type=jnp.float32)
              + jnp.dot(h1[...].astype(jnp.bfloat16), w1hh,
                        preferred_element_type=jnp.float32))
        i1, f1, gg1, o1 = _gates(g1, H)
        c1_new = f1 * c1[...] + i1 * gg1
        h1_new = o1 * jnp.tanh(c1_new)
        h1[...] = h1_new
        c1[...] = c1_new

        # LSTMCell 2
        g2 = (jnp.dot(h1_new.astype(jnp.bfloat16), w2ih,
                      preferred_element_type=jnp.float32)
              + jnp.dot(h2[...].astype(jnp.bfloat16), w2hh,
                        preferred_element_type=jnp.float32) + b2)
        i2, f2, gg2, o2 = _gates(g2, H)
        c2_new = f2 * c2[...] + i2 * gg2
        h2_new = o2 * jnp.tanh(c2_new)
        h2[...] = h2_new
        c2[...] = c2_new

        # Output projection -- split matmuls, lane-dense (128) padded vocab.
        pred = (jnp.dot(h2_new.astype(jnp.bfloat16), woh,
                        preferred_element_type=jnp.float32)
                + jnp.dot(ctx_b, woc, preferred_element_type=jnp.float32)
                + bout)
        o_ref[i] = pred


def decoder_fwd(keys, vals, lens, text, dp):
    # keys, vals: (T', N, KV); lens: (N,) int; text: (N, L) int
    emb = jnp.transpose(dp['embedding'][text], (1, 0, 2))    # (L, N, E)
    keys_n = jnp.transpose(keys, (1, 0, 2))                   # (N, T', K)
    vals_n = jnp.transpose(vals, (1, 0, 2))                   # (N, T', V)
    L, N, _ = emb.shape
    H = dp['w1hh'].shape[0]
    VP = dp['wout_h'].shape[1]
    lens2d = lens.astype(jnp.int32).reshape(N, 1)
    preds = pl.pallas_call(
        _decoder_kernel,
        out_shape=jax.ShapeDtypeStruct((L, N, VP), jnp.float32),
        scratch_shapes=[pltpu.VMEM((L, N, 4 * H), jnp.float32)]
                       + [pltpu.VMEM((N, H), jnp.float32)] * 4,
        compiler_params=pltpu.CompilerParams(vmem_limit_bytes=VMEM_LIMIT),
    )(emb, keys_n, vals_n, lens2d,
      dp['wq'], dp['bq'].reshape(1, -1),
      dp['w1ih_e'], dp['w1ih_c'], dp['w1hh'], dp['b1'].reshape(1, -1),
      dp['w2ih'], dp['w2hh'], dp['b2'].reshape(1, -1),
      dp['wout_h'], dp['wout_c'], dp['bout'].reshape(1, -1))
    return preds                                              # (L, N, VP)


# ----------------------------------------------------------------------------
# Model glue (plain JAX): pyramid reshape, encoder, batch/vocab padding
# ----------------------------------------------------------------------------

def pyramid(x):
    """(T, N, F) -> (T//2, N, 2F): concat consecutive frames (pBLSTM reshape)."""
    T, N, F = x.shape
    T2 = (T // 2) * 2
    x = x[:T2]
    return x.reshape(T2 // 2, 2, N, F).transpose(0, 2, 1, 3).reshape(T2 // 2, N, 2 * F)


def encoder_fwd(x, lens, ep):
    h0 = bilstm(x, ep['lstm0'])                       # (T,   N, 512)
    l1 = pyramid(bilstm(h0, ep['pblstm']))            # (T/2, N, 1024)
    lens = lens // 2
    l2 = pyramid(bilstm(l1, ep['pblstm2']))           # (T/4, N, 1024)
    lens = lens // 2
    l3 = pyramid(bilstm(l2, ep['pblstm2']))           # (T/8, N, 1024)
    lens = lens // 2
    T3, N, F = l3.shape
    flat = l3.reshape(T3 * N, F)
    keys = linear(flat, ep['wk'], ep['bk']).reshape(T3, N, -1)
    vals = linear(flat, ep['wv'], ep['bv']).reshape(T3, N, -1)
    return keys, vals, lens


def seq2seq_forward(speech_input, speech_len, p, text_input, params):
    del p  # p=0.0 => always teacher forcing (the `num > p` branch)
    T, N, _ = speech_input.shape
    NP = _round_up(N, 8)                              # f32 sublane minimum
    if NP != N:
        speech_input = jnp.pad(speech_input, ((0, 0), (0, NP - N), (0, 0)))
        speech_len = jnp.concatenate(
            [speech_len, jnp.full((NP - N,), T, speech_len.dtype)])
        text_input = jnp.pad(text_input, ((0, NP - N), (0, 0)))
    keys, vals, shorten_len = encoder_fwd(speech_input, speech_len, params['enc'])
    preds = decoder_fwd(keys, vals, shorten_len, text_input, params['dec'])
    vocab = params['dec']['vocab']
    return jnp.transpose(preds, (1, 0, 2))[:N, :, :vocab]     # (N, L, vocab)


# ----------------------------------------------------------------------------
# Deterministic parameter init (PyTorch-style uniform(-1/sqrt(fan), 1/sqrt(fan)))
# ----------------------------------------------------------------------------

def _u(key, shape, fan):
    k = 1.0 / math.sqrt(fan)
    return jax.random.uniform(key, shape, jnp.float32, minval=-k, maxval=k)


def init_params(key, *, in_dim, h_enc, kv, vocab, emb_dim, h_dec):
    bf16 = jnp.bfloat16
    ks = jax.random.split(key, 20)

    def bl(k, d_in):
        kk = jax.random.split(k, 6)
        wih = jnp.stack([_u(kk[0], (d_in, 4 * h_enc), h_enc),
                         _u(kk[1], (d_in, 4 * h_enc), h_enc)]).astype(bf16)
        whh = jnp.stack([_u(kk[2], (h_enc, 4 * h_enc), h_enc),
                         _u(kk[3], (h_enc, 4 * h_enc), h_enc)]).astype(bf16)
        b = jnp.stack([_u(kk[4], (1, 4 * h_enc), h_enc),
                       _u(kk[5], (1, 4 * h_enc), h_enc)])   # combined b_ih + b_hh
        return dict(wih=wih, whh=whh, b=b)

    enc = dict(
        lstm0=bl(ks[0], in_dim),
        pblstm=bl(ks[1], 2 * h_enc),
        pblstm2=bl(ks[2], 4 * h_enc),
        wk=_u(ks[3], (4 * h_enc, kv), 4 * h_enc).astype(bf16),
        bk=_u(ks[4], (kv,), 4 * h_enc),
        wv=_u(ks[5], (4 * h_enc, kv), 4 * h_enc).astype(bf16),
        bv=_u(ks[6], (kv,), 4 * h_enc),
    )
    vpad = _round_up(vocab, 128)
    w1ih = _u(ks[10], (emb_dim + kv, 4 * h_dec), h_dec)
    wout = _u(ks[16], (h_dec + kv, vocab), h_dec + kv)
    dec = dict(
        embedding=jax.random.normal(ks[7], (vocab, emb_dim), jnp.float32),
        wq=_u(ks[8], (h_dec, kv), h_dec).astype(bf16),
        bq=_u(ks[9], (kv,), h_dec),
        w1ih_e=w1ih[:emb_dim].astype(bf16),
        w1ih_c=w1ih[emb_dim:].astype(bf16),
        w1hh=_u(ks[11], (h_dec, 4 * h_dec), h_dec).astype(bf16),
        b1=_u(ks[12], (4 * h_dec,), h_dec),
        w2ih=_u(ks[13], (h_dec, 4 * h_dec), h_dec).astype(bf16),
        w2hh=_u(ks[14], (h_dec, 4 * h_dec), h_dec).astype(bf16),
        b2=_u(ks[15], (4 * h_dec,), h_dec),
        wout_h=jnp.pad(wout[:h_dec], ((0, 0), (0, vpad - vocab))).astype(bf16),
        wout_c=jnp.pad(wout[h_dec:], ((0, 0), (0, vpad - vocab))).astype(bf16),
        bout=jnp.pad(_u(ks[17], (vocab,), h_dec + kv), (0, vpad - vocab)),
        vocab=vocab,
    )
    return dict(enc=enc, dec=dec)


# ----------------------------------------------------------------------------
# Main
# ----------------------------------------------------------------------------

if __name__ == "__main__":
    # Encoder dims are hard-coded in the reference (input 40, hidden 256,
    # key/value size 128); decoder dims chosen small.
    T, N, IN_DIM = 16, 2, 40          # T divisible by 8 (3 pyramid halvings)
    H_ENC, KV = 256, 128
    VOCAB, EMB, H_DEC = 33, 32, 128
    L = 5                             # decode (teacher-forced) steps

    root = jax.random.PRNGKey(0)
    k_param, k_speech, k_text = jax.random.split(root, 3)

    params = init_params(k_param, in_dim=IN_DIM, h_enc=H_ENC, kv=KV,
                         vocab=VOCAB, emb_dim=EMB, h_dec=H_DEC)

    speech_input = jax.random.normal(k_speech, (T, N, IN_DIM), jnp.float32)
    speech_len = jnp.array([T, T], dtype=jnp.int32)
    text_input = jax.random.randint(k_text, (N, L), 0, VOCAB, dtype=jnp.int32)

    preds = seq2seq_forward(speech_input, speech_len, 0.0, text_input, params)
    preds = jax.block_until_ready(preds)

    assert preds.shape == (N, L, VOCAB), preds.shape
    assert bool(jnp.all(jnp.isfinite(preds)))
    print("KERNEL_OK")
</pallas_src>

<mosaic_0001>
module attributes {stable_mosaic.version = 11 : i64} {
  func.func @_bilstm_kernel(%arg0: i32, %arg1: i32, %arg2: memref<16x8x40xf32, #tpu.memory_space<vmem>>, %arg3: memref<1x40x1024xbf16, #tpu.memory_space<vmem>>, %arg4: memref<1x256x1024xbf16, #tpu.memory_space<vmem>>, %arg5: memref<1x1x1024xf32, #tpu.memory_space<vmem>>, %arg6: memref<16x8x256xf32, #tpu.memory_space<vmem>>, %arg7: memref<16x8x1024xf32, #tpu.memory_space<vmem>>, %arg8: memref<8x256xf32, #tpu.memory_space<vmem>>, %arg9: memref<8x256xf32, #tpu.memory_space<vmem>>) attributes {dimension_semantics = [#tpu.dimension_semantics<parallel>, #tpu.dimension_semantics<arbitrary>], iteration_bounds = array<i64: 2, 1>, scalar_prefetch = 0 : i64, scratch_operands = 3 : i64, tpu.core_type = #tpu.core_type<tc>, window_params = [{transform_indices = @transform_0, window_bounds = array<i64: 16, 8, 40>}, {transform_indices = @transform_1, window_bounds = array<i64: 1, 40, 1024>}, {transform_indices = @transform_2, window_bounds = array<i64: 1, 256, 1024>}, {transform_indices = @transform_3, window_bounds = array<i64: 1, 1, 1024>}, {transform_indices = @transform_4, window_bounds = array<i64: 16, 8, 256>}]} {
    %c0_i32 = arith.constant 0 : i32
    %0 = arith.cmpi eq, %arg1, %c0_i32 : i32
    %1 = arith.extui %0 : i1 to i32
    %c0_i32_0 = arith.constant 0 : i32
    %2 = arith.cmpi ne, %1, %c0_i32_0 : i32
    scf.if %2 {
      %cst_17 = arith.constant 0.000000e+00 : f32
      %18 = vector.broadcast %cst_17 : f32 to vector<8x256xf32>
      %c0_18 = arith.constant 0 : index
      %c0_19 = arith.constant 0 : index
      %19 = vector.load %arg8[%c0_18, %c0_19] : memref<8x256xf32, #tpu.memory_space<vmem>>, vector<8x256xf32>
      tpu.vector_store %arg8[%c0_18, %c0_19], %18 {strides = array<i32>} : memref<8x256xf32, #tpu.memory_space<vmem>>, vector<8x256xf32>,
      %cst_20 = arith.constant 0.000000e+00 : f32
      %20 = vector.broadcast %cst_20 : f32 to vector<8x256xf32>
      %c0_21 = arith.constant 0 : index
      %c0_22 = arith.constant 0 : index
      %21 = vector.load %arg9[%c0_21, %c0_22] : memref<8x256xf32, #tpu.memory_space<vmem>>, vector<8x256xf32>
      tpu.vector_store %arg9[%c0_21, %c0_22], %20 {strides = array<i32>} : memref<8x256xf32, #tpu.memory_space<vmem>>, vector<8x256xf32>,
    } else {
    }
    %c0 = arith.constant 0 : index
    %c0_1 = arith.constant 0 : index
    %c0_2 = arith.constant 0 : index
    %3 = vector.load %arg2[%c0, %c0_1, %c0_2] : memref<16x8x40xf32, #tpu.memory_space<vmem>>, vector<16x8x40xf32>
    %4 = vector.shape_cast %3 : vector<16x8x40xf32> to vector<128x40xf32>
    %5 = arith.truncf %4 : vector<128x40xf32> to vector<128x40xbf16>
    %c0_3 = arith.constant 0 : index
    %c0_4 = arith.constant 0 : index
    %c0_5 = arith.constant 0 : index
    %6 = vector.load %arg3[%c0_3, %c0_4, %c0_5] : memref<1x40x1024xbf16, #tpu.memory_space<vmem>>, vector<1x40x1024xbf16>
    %7 = vector.shape_cast %6 : vector<1x40x1024xbf16> to vector<40x1024xbf16>
    %cst = arith.constant dense<0.000000e+00> : vector<128x1024xf32>
    %8 = tpu.matmul %5, %7, %cst {dimension_numbers = #tpu.dot_dimension_numbers<[1], [0], [0], [1], [0, 0, 1, 1], [], []>} : vector<128x40xbf16>, vector<40x1024xbf16>, vector<128x1024xf32> -> vector<128x1024xf32>
    %c0_6 = arith.constant 0 : index
    %c0_7 = arith.constant 0 : index
    %c0_8 = arith.constant 0 : index
    %9 = vector.load %arg5[%c0_6, %c0_7, %c0_8] : memref<1x1x1024xf32, #tpu.memory_space<vmem>>, vector<1x1x1024xf32>
    %10 = vector.shape_cast %9 : vector<1x1x1024xf32> to vector<1x1024xf32>
    %11 = vector.broadcast %10 : vector<1x1024xf32> to vector<128x1024xf32>
    %12 = arith.addf %8, %11 : vector<128x1024xf32>
    %13 = vector.shape_cast %12 : vector<128x1024xf32> to vector<16x8x1024xf32>
    %c0_9 = arith.constant 0 : index
    %c0_10 = arith.constant 0 : index
    %c0_11 = arith.constant 0 : index
    %14 = vector.load %arg7[%c0_9, %c0_10, %c0_11] : memref<16x8x1024xf32, #tpu.memory_space<vmem>>, vector<16x8x1024xf32>
    tpu.vector_store %arg7[%c0_9, %c0_10, %c0_11], %13 {strides = array<i32>} : memref<16x8x1024xf32, #tpu.memory_space<vmem>>, vector<16x8x1024xf32>,
    %c0_12 = arith.constant 0 : index
    %c0_13 = arith.constant 0 : index
    %c0_14 = arith.constant 0 : index
    %15 = vector.load %arg4[%c0_12, %c0_13, %c0_14] : memref<1x256x1024xbf16, #tpu.memory_space<vmem>>, vector<1x256x1024xbf16>
    %16 = vector.shape_cast %15 : vector<1x256x1024xbf16> to vector<256x1024xbf16>
    %c0_i32_15 = arith.constant 0 : i32
    %c16_i32 = arith.constant 16 : i32
    %17 = arith.addi %c0_i32_15, %c16_i32 : i32
    %c1_i32 = arith.constant 1 : i32
    scf.for %arg10 = %c0_i32_15 to %17 step %c1_i32  : i32 {
      %c1_i32_17 = arith.constant 1 : i32
      %18 = arith.muli %arg10, %c1_i32_17 : i32
      %c0_i32_18 = arith.constant 0 : i32
      %19 = arith.addi %c0_i32_18, %18 : i32
      %c0_i32_19 = arith.constant 0 : i32
      %20 = arith.cmpi eq, %arg0, %c0_i32_19 : i32
      %c15_i32 = arith.constant 15 : i32
      %21 = arith.subi %c15_i32, %19 : i32
      %22 = arith.select %20, %19, %21 : i32
      %c0_20 = arith.constant 0 : index
      %c0_21 = arith.constant 0 : index
      %23 = vector.load %arg8[%c0_20, %c0_21] : memref<8x256xf32, #tpu.memory_space<vmem>>, vector<8x256xf32>
      %c0_22 = arith.constant 0 : index
      %c0_23 = arith.constant 0 : index
      %24 = vector.load %arg9[%c0_22, %c0_23] : memref<8x256xf32, #tpu.memory_space<vmem>>, vector<8x256xf32>
      %25 = arith.index_cast %22 : i32 to index
      %c0_24 = arith.constant 0 : index
      %c0_25 = arith.constant 0 : index
      %26 = vector.load %arg7[%25, %c0_24, %c0_25] : memref<16x8x1024xf32, #tpu.memory_space<vmem>>, vector<1x8x1024xf32>
      %27 = vector.shape_cast %26 : vector<1x8x1024xf32> to vector<8x1024xf32>
      %28 = arith.truncf %23 : vector<8x256xf32> to vector<8x256xbf16>
      %cst_26 = arith.constant dense<0.000000e+00> : vector<8x1024xf32>
      %29 = tpu.matmul %28, %16, %cst_26 {dimension_numbers = #tpu.dot_dimension_numbers<[1], [0], [0], [1], [0, 0, 1, 1], [], []>} : vector<8x256xbf16>, vector<256x1024xbf16>, vector<8x1024xf32> -> vector<8x1024xf32>
      %30 = arith.addf %27, %29 : vector<8x1024xf32>
      %31 = vector.extract_strided_slice %30 {offsets = [0, 0], sizes = [8, 256], strides = [1, 1]} : vector<8x1024xf32> to vector<8x256xf32>
      %32 = arith.negf %31 : vector<8x256xf32>
      %33 = math.exp %32 : vector<8x256xf32>
      %cst_27 = arith.constant 1.000000e+00 : f32
      %34 = vector.broadcast %cst_27 : f32 to vector<8x256xf32>
      %35 = arith.addf %34, %33 : vector<8x256xf32>
      %36 = arith.divf %34, %35 : vector<8x256xf32>
      %37 = vector.extract_strided_slice %30 {offsets = [0, 256], sizes = [8, 256], strides = [1, 1]} : vector<8x1024xf32> to vector<8x256xf32>
      %38 = arith.negf %37 : vector<8x256xf32>
      %39 = math.exp %38 : vector<8x256xf32>
      %cst_28 = arith.constant 1.000000e+00 : f32
      %40 = vector.broadcast %cst_28 : f32 to vector<8x256xf32>
      %41 = arith.addf %40, %39 : vector<8x256xf32>
      %42 = arith.divf %40, %41 : vector<8x256xf32>
      %43 = vector.extract_strided_slice %30 {offsets = [0, 512], sizes = [8, 256], strides = [1, 1]} : vector<8x1024xf32> to vector<8x256xf32>
      %44 = math.tanh %43 : vector<8x256xf32>
      %45 = vector.extract_strided_slice %30 {offsets = [0, 768], sizes = [8, 256], strides = [1, 1]} : vector<8x1024xf32> to vector<8x256xf32>
      %46 = arith.negf %45 : vector<8x256xf32>
      %47 = math.exp %46 : vector<8x256xf32>
      %cst_29 = arith.constant 1.000000e+00 : f32
      %48 = vector.broadcast %cst_29 : f32 to vector<8x256xf32>
      %49 = arith.addf %48, %47 : vector<8x256xf32>
      %50 = arith.divf %48, %49 : vector<8x256xf32>
      %51 = arith.mulf %42, %24 : vector<8x256xf32>
      %52 = arith.mulf %36, %44 : vector<8x256xf32>
      %53 = arith.addf %51, %52 : vector<8x256xf32>
      %54 = math.tanh %53 : vector<8x256xf32>
      %55 = arith.mulf %50, %54 : vector<8x256xf32>
      %c0_30 = arith.constant 0 : index
      %c0_31 = arith.constant 0 : index
      %56 = vector.load %arg8[%c0_30, %c0_31] : memref<8x256xf32, #tpu.memory_space<vmem>>, vector<8x256xf32>
      tpu.vector_store %arg8[%c0_30, %c0_31], %55 {strides = array<i32>} : memref<8x256xf32, #tpu.memory_space<vmem>>, vector<8x256xf32>,
      %c0_32 = arith.constant 0 : index
      %c0_33 = arith.constant 0 : index
      %57 = vector.load %arg9[%c0_32, %c0_33] : memref<8x256xf32, #tpu.memory_space<vmem>>, vector<8x256xf32>
      tpu.vector_store %arg9[%c0_32, %c0_33], %53 {strides = array<i32>} : memref<8x256xf32, #tpu.memory_space<vmem>>, vector<8x256xf32>,
      %58 = arith.index_cast %22 : i32 to index
      %c0_34 = arith.constant 0 : index
      %c0_35 = arith.constant 0 : index
      %59 = vector.load %arg6[%58, %c0_34, %c0_35] : memref<16x8x256xf32, #tpu.memory_space<vmem>>, vector<1x8x256xf32>
      %60 = vector.shape_cast %59 : vector<1x8x256xf32> to vector<8x256xf32>
      %61 = vector.shape_cast %55 : vector<8x256xf32> to vector<1x8x256xf32>
      tpu.vector_store %arg6[%58, %c0_34, %c0_35], %61 {strides = array<i32>} : memref<16x8x256xf32, #tpu.memory_space<vmem>>, vector<1x8x256xf32>,
    }
    %c16_i32_16 = arith.constant 16 : i32
    return
  }
  func.func @transform_0(%arg0: i32, %arg1: i32) -> (i32, i32, i32) {
    %c2_i32 = arith.constant 2 : i32
    %0 = arith.muli %c2_i32, %arg1 : i32
    %c0_i32 = arith.constant 0 : i32
    %1 = arith.subi %c0_i32, %0 : i32
    %2 = arith.muli %arg0, %1 : i32
    %3 = arith.addi %arg1, %2 : i32
    %c0_i32_0 = arith.constant 0 : i32
    %c0_i32_1 = arith.constant 0 : i32
    %c0_i32_2 = arith.constant 0 : i32
    return %3, %c0_i32_0, %c0_i32_1 : i32, i32, i32
  }
  func.func @transform_1(%arg0: i32, %arg1: i32) -> (i32, i32, i32) {
    %c0_i32 = arith.constant 0 : i32
    %c0_i32_0 = arith.constant 0 : i32
    %c0_i32_1 = arith.constant 0 : i32
    return %arg0, %c0_i32, %c0_i32_0 : i32, i32, i32
  }
  func.func @transform_2(%arg0: i32, %arg1: i32) -> (i32, i32, i32) {
    %c0_i32 = arith.constant 0 : i32
    %c0_i32_0 = arith.constant 0 : i32
    %c0_i32_1 = arith.constant 0 : i32
    return %arg0, %c0_i32, %c0_i32_0 : i32, i32, i32
  }
  func.func @transform_3(%arg0: i32, %arg1: i32) -> (i32, i32, i32) {
    %c0_i32 = arith.constant 0 : i32
    %c0_i32_0 = arith.constant 0 : i32
    %c0_i32_1 = arith.constant 0 : i32
    return %arg0, %c0_i32, %c0_i32_0 : i32, i32, i32
  }
  func.func @transform_4(%arg0: i32, %arg1: i32) -> (i32, i32, i32) {
    %c2_i32 = arith.constant 2 : i32
    %0 = arith.muli %c2_i32, %arg1 : i32
    %c0_i32 = arith.constant 0 : i32
    %1 = arith.subi %c0_i32, %0 : i32
    %2 = arith.muli %arg0, %1 : i32
    %3 = arith.addi %arg1, %2 : i32
    %c0_i32_0 = arith.constant 0 : i32
    %c0_i32_1 = arith.constant 0 : i32
    return %3, %c0_i32_0, %arg0 : i32, i32, i32
  }
}

</mosaic_0001>

<bundles_post_ra>
// kernel: tpu_custom_call.1
= control target key start
LH: loop header
LB: loop body
LE: loop exit
PB: predicated region body
PF: predicated region fallthrough
CT: control target
= control target key end

     0   :  { %s5323_s0 = inlined_call_operand.hbm [shape: f32[16,8,40], index: 0, kind: input, shape index: {}]   ;;  %s5324_s1 = inlined_call_operand.hbm [shape: bf16[2,40,1024], index: 1, kind: input, shape index: {}]   ;;  %s5325_s2 = inlined_call_operand.hbm [shape: bf16[2,256,1024], index: 2, kind: input, shape index: {}]   ;;  %s5326_s3 = inlined_call_operand.hbm [shape: f32[2,1,1024], index: 3, kind: input, shape index: {}]   ;;  %s5327_s4 = inlined_call_operand.hbm [shape: f32[16,8,512], index: 4, kind: output, shape index: {}]  }
   0x1   :  { %5334 = sst [smem:[#allocation245_spill]] %s5323_s0 }
   0x2   :  { %5335 = sst [smem:[#allocation246_spill]] %s5324_s1 }
   0x3   :  { %9 = vsyncpa [#allocation6], 0 }
   0x4   :  { %11 = vsyncpa [#allocation6 + $0x1], 0 }
   0x5   :  { %12 = vsyncpa [#allocation9], 0 }
   0x6   :  { %14 = vsyncpa [#allocation9 + $0x1], 0 }
   0x7   :  { %15 = vsyncpa [#allocation12], 0 }
   0x8   :  { %17 = vsyncpa [#allocation12 + $0x1], 0 }
   0x9   :  { %18 = vsyncpa [#allocation7], 0 }
   0xa   :  { %20 = vsyncpa [#allocation7 + $0x1], 0  ;;  %s3659_s15 = smov 0   ;;  %s3661_s16 = smov 0  }
   0xb   :  { %s3663_s17 = smov 0   ;;  %s3665_s18 = smov 0  }
   0xc   :  { %s3667_s19 = smov 0   ;;  %s3669_s20 = smov 0  }
   0xd LB: > { %5336 = sst [smem:[#allocation18_spill]] %s3599_s15  ;;  %s3690_s21 = sadd.s32 4294967295, %s3619_s20   ;;  %s3619_s20 = sphi %s3669_s20, %s26_s20   ;;  %s3615_s19 = sphi %s3667_s19, %s5807_s19   ;;  %s3611_s18 = sphi %s3665_s18, %s5806_s18   ;;  %s3607_s17 = sphi %s3663_s17, %s5802_s17   ;;  %s3603_s16 = sphi %s3661_s16, %s5805_s16   ;;  %s3599_s15 = sphi %s3659_s15, %s5804_s15  }
   0xe   : > { %5337 = sst [smem:[#allocation19_spill]] %s3607_s17  ;;  %s2454_s22 = sadd.s32 4294967294, %s3619_s20  }
   0xf   : > { %5338 = sst [smem:[#allocation20_spill]] %s3619_s20  ;;  %s38_s23 = sadd.s32 1, %s3615_s19 }
  0x10   : > { %s79_s24 = sadd.s32 1, %s3607_s17  ;;  %p40_p0 = scmp.ge.s32.totalorder %s38_s23, 2 }
  0x11   : > { %p86_p1 = scmp.ne.s32.totalorder %s3607_s17, %s3603_s16  ;;  %p87_p2 = scmp.eq.s32.totalorder %s3619_s20, 0 }
  0x12   : > { %p92_p3 = scmp.ne.s32.totalorder %s3603_s16, %s3599_s15  ;;  %s5809_s23 = smov (%p40_p0, %s38_s23), 0 }
  0x13   : > { %5339 = sst [smem:[#allocation21_spill]] %s5809_s23  ;;  %p3704_p4 = por %p87_p2, %p86_p1 }
  0x14   : > { %p93_p5 = scmp.eq.s32.totalorder %s3690_s21, 0  ;;  %s76_s26 = ssub.s32 %s3615_s19, %s5809_s23 }
  0x15   : > { %p178_p6 = scmp.eq.s32.totalorder %s3690_s21, 1  ;;  %p77_p7 = scmp.eq.s32.totalorder %s76_s26, 0 }
  0x16   : > { %p3714_p8 = por %p93_p5, %p92_p3  ;;  %p184_p10 = scmp.eq.s32.totalorder %s2454_s22, 1 }
  0x17   : > { %p3718_p9 = por %p178_p6, %p86_p1  ;;  %p2456_p12 = scmp.ge.s32.totalorder %s3619_s20, 2 }
  0x18   : > { %s3723_s29 = scalar_select %p77_p7, %s3607_s17, %s79_s24  }
  0x19   : > { %p3725_p11 = por %p184_p10, %p92_p3  ;;  %p3304_p13 = scmp.lt.s32.totalorder %s3619_s20, 2 }
  0x1a   : > { %5343 = sst [smem:[#allocation22_spill]] %s3723_s29  ;;  %s230_s5 = sand.u32 1, %s3619_s20  }
  0x1b   : > { %s5344_s30 = scalar_select %p3725_p11, 1, 0 }
  0x1c   : > { %s3733_s6 = sand.u32 1, %s3607_s17   ;;  %s3273_s8 = smul.u32 160, %s3615_s19 }
  0x1d   : > { %5345 = sst [smem:[#allocation23_spill]] %s5344_s30  ;;  %s3272_s7 = smul.u32 160, %s3733_s6 }
  0x1e   : > { %p3741_p0 = pnand %p3304_p13, %p3704_p4  ;;  %s5347_s1 = sld [smem:[#allocation246_spill]] }
  0x1f   : > { %s234_s13 = scalar_lea.vmem [#allocation8], %s3272_s7  ;;  %p2464_p1 = scmp.ge.s32.totalorder %s3619_s20, 1 }
  0x20   : > { %s242_s14 = sshll.u32 %s234_s13, 4  ;;  %s231_s24 = scalar_lea.sflag [#allocation9], %s230_s5  ;;  %s243_s14 = int_to_ptr.vmem [resolvable:$true] %s242_s14 }
  0x21   : > { %s3625_s25 = smov 512   ;;  %s3626_s26 = smov 32  }
  0x22   : > { %p291_p3 = scmp.lt.s32.totalorder %s3619_s20, 3  ;;  %s5348_s0 = sld [smem:[#allocation245_spill]] }
  0x23   : > { %p3288_p6 = pnand %p3304_p13, %p87_p2  ;;  %s3627_s5 = smov [#allocation5]  }
  0x24   : > { %s239_s12 = scalar_lea.hbm %s5347_s1, %s3273_s8  ;;  %p3755_p4 = pnand %p2464_p1, %p291_p3 }
  0x25   : > { %s240_s22 = sshll.u32 %s239_s12, 4  ;;  %s220_s7 = sshll.u32 %s3627_s5, 4  ;;  %s241_s22 = int_to_ptr.hbm [resolvable:$true] %s240_s22  ;;  %s221_s7 = int_to_ptr.vmem [resolvable:$true] %s220_s7 }
  0x26   : > { %3293 = dma.hbm_to_vmem [thread:$0]  (!%p3741_p0), %s241_s22, 2560, %s243_s14, %s231_s24, %s3625_s25, %s3625_s25, %s3626_s26  }
  0x27   : > { %s2459_s12 = sshll.u32 %s3733_s6, 10  ;;  %s3628_s13 = smov 128  }
  0x28   : > { %s218_s11 = sshll.u32 %s5348_s0, 4  ;;  %s3629_s14 = smov 8   ;;  %s219_s11 = int_to_ptr.hbm [resolvable:$true] %s218_s11 }
  0x29   : > { %3290 = dma.hbm_to_vmem [thread:$0]  (!%p3288_p6), %s219_s11, 2048, %s221_s7, [#allocation6], %s3628_s13, %s3628_s13, %s3629_s14  }
  0x2a   : > { %s3124_s23 = sshll.u32 %s3615_s19, 10  ;;  %s256_s1 = scalar_lea.vmem [#allocation10], %s2459_s12 }
  0x2b   : > { %s261_s0 = scalar_lea.hbm %s5325_s2, %s3124_s23  ;;  %s264_s29 = sshll.u32 %s256_s1, 4  ;;  %s265_s29 = int_to_ptr.vmem [resolvable:$true] %s264_s29 }
  0x2c   : > { %s262_s17 = sshll.u32 %s261_s0, 4  ;;  %s2462_s5 = sshll.u32 %s3733_s6, 3  ;;  %s263_s17 = int_to_ptr.hbm [resolvable:$true] %s262_s17 }
  0x2d   : > { %3296 = dma.hbm_to_vmem [thread:$0]  (!%p3741_p0), %s263_s17, 16384, %s265_s29, %s231_s24, %s3625_s25, %s3625_s25, %s3626_s26  }
  0x2e   : > { %s2463_s20 = sshll.u32 %s3615_s19, 3  ;;  %s278_s13 = scalar_lea.vmem [#allocation11], %s2462_s5 }
  0x2f   : > { %s282_s11 = scalar_lea.hbm %s5326_s3, %s2463_s20  ;;  %s286_s14 = sshll.u32 %s278_s13, 4  ;;  %s287_s14 = int_to_ptr.vmem [resolvable:$true] %s286_s14 }
  0x30   : > { %s284_s7 = sshll.u32 %s282_s11, 4  ;;  %s275_s23 = scalar_lea.sflag [#allocation12], %s3733_s6  ;;  %s285_s7 = int_to_ptr.hbm [resolvable:$true] %s284_s7 }
  0x31   : > { %3299 = dma.hbm_to_vmem [thread:$0]  (!%p3741_p0), %s285_s7, 128, %s287_s14, %s275_s23  }
  0x32   : > { %295 = sbr.rel (%p3755_p4) target bundleno = 988 (0x3dc), region = 36 }
  0x37   : > { %3582 = dma.done.wait (%p93_p5), [#allocation6], 2048  }
  0x38   : > { %3584 = vsyncadd (%p93_p5), [#allocation6], 4294965248  ;;  %s307_s0 = sand.u32 1, %s3690_s21   ;;  %s3786_s1 = sand.u32 1, %s3603_s16  }
  0x39   : > { %s3274_s15 = smul.u32 160, %s3786_s1  ;;  %s308_s17 = scalar_lea.sflag [#allocation9], %s307_s0 }
  0x3b   : > { %s3789_s20 = scalar_lea.vmem [#allocation8], %s3274_s15 }
  0x3c   : > { %3586 = dma.done.wait (%p3714_p8), %s308_s17, 18944  }
  0x3d   : > { %3588 = vsyncadd (%p3714_p8), %s308_s17, 4294948352  ;;  %s2466_s29 = sshll.u32 %s3786_s1, 10  ;;  %s2467_s30 = sshll.u32 %s3786_s1, 3 }
  0x3e   : > { %s3797_s6 = scalar_lea.vmem [#allocation10], %s2466_s29  ;;  %s328_s21 = scalar_lea.sflag [#allocation12], %s3786_s1 }
  0x3f   : > { %s3800_s9 = scalar_lea.vmem [#allocation11], %s2467_s30 }
  0x40   : > { %3590 = dma.done.wait (%p3714_p8), %s328_s21, 128  }
  0x41   : > { %3592 = vsyncadd (%p3714_p8), %s328_s21, 4294967168  ;;  %s2468_s24 = sshll.u32 %s3786_s1, 8  ;;  %v3630_v0 = vmov 0.0   ;;  %v3808_v1 = vld [vmem:[%s3797_s6 + $0x4] sm:$0xf]  ;;  %vm579_vm0 = vcmask 1043456  }
  0x42   : > { %388 = vst [vmem:[#allocation3] sm:$0xff] %v3630_v0  ;;  %v3811_v2 = vld [vmem:[%s3797_s6] sm:$0xf]  ;;  %v3814_v3 = vld [vmem:[%s3797_s6 + $0xc] sm:$0xf]  ;;  %vm554_vm1 = vcmask 326656  }
  0x43   : > { %389 = vst [vmem:[#allocation3 + $0x8] sm:$0xff] %v3630_v0  ;;  %v3817_v4 = vld [vmem:[%s3797_s6 + $0x8] sm:$0xf]  ;;  %v3820_v5 = vld [vmem:[%s3797_s6 + $0x14] sm:$0xf]  ;;  %s4920_s27 = scalar_lea.vmem [#allocation13], %s2468_s24 }
  0x44   : > { %390 = vst [vmem:[#allocation4 + $0x8] sm:$0xff] %v3630_v0  ;;  %v3823_v6 = vld [vmem:[%s3797_s6 + $0x10] sm:$0xf]  ;;  %v3826_v7 = vld [vmem:[%s3797_s6 + $0x1c] sm:$0xf]  ;;  %s4922_s25 = smov 0  }
  0x45   : > { %391 = vst [vmem:[#allocation4] sm:$0xff] %v3630_v0  ;;  %v3829_v8 = vld [vmem:[%s3797_s6 + $0x18] sm:$0xf]  ;;  %v3832_v9 = vld [vmem:[%s3797_s6 + $0x20] sm:$0xf0] }
  0x46   : > { %5350 = vst [vmem:[#allocation24_spill] sm:$0xff] %v3808_v1  ;;  %v3835_v10 = vld [vmem:[%s3797_s6 + $0x1c] sm:$0xf0]  ;;  %v3838_v11 = vld [vmem:[%s3797_s6 + $0x28] sm:$0xf0] }
  0x47   : > { %5351 = vst [vmem:[#allocation25_spill] sm:$0xff] %v3811_v2  ;;  %v3841_v12 = vld [vmem:[%s3797_s6 + $0x24] sm:$0xf0]  ;;  %v3844_v13 = vld [vmem:[%s3797_s6 + $0x30] sm:$0xf0] }
  0x48   : > { %5352 = vst [vmem:[#allocation26_spill] sm:$0xff] %v3814_v3  ;;  %v3847_v14 = vld [vmem:[%s3797_s6 + $0x2c] sm:$0xf0]  ;;  %v3850_v15 = vld [vmem:[%s3797_s6 + $0x38] sm:$0xf0] }
  0x49   : > { %5353 = vst [vmem:[#allocation27_spill] sm:$0xff] %v3817_v4  ;;  %v3853_v16 = vld [vmem:[%s3797_s6 + $0x34] sm:$0xf0]  ;;  %v3856_v17 = vld [vmem:[%s3797_s6 + $0x44] sm:$0xf] }
  0x4a   : > { %5354 = vst [vmem:[#allocation28_spill] sm:$0xff] %v3820_v5  ;;  %v3859_v18 = vld [vmem:[%s3797_s6 + $0x40] sm:$0xf]  ;;  %v3862_v19 = vld [vmem:[%s3797_s6 + $0x4c] sm:$0xf] }
  0x4b   : > { %5355 = vst [vmem:[#allocation29_spill] sm:$0xff] %v3823_v6  ;;  %v3865_v20 = vld [vmem:[%s3797_s6 + $0x48] sm:$0xf]  ;;  %v3868_v21 = vld [vmem:[%s3797_s6 + $0x54] sm:$0xf] }
  0x4c   : > { %5356 = vst [vmem:[#allocation30_spill] sm:$0xff] %v3826_v7  ;;  %v3871_v22 = vld [vmem:[%s3797_s6 + $0x50] sm:$0xf]  ;;  %v3874_v23 = vld [vmem:[%s3797_s6 + $0x5c] sm:$0xf] }
  0x4d   : > { %5357 = vst [vmem:[#allocation31_spill] sm:$0xff] %v3829_v8  ;;  %v3877_v24 = vld [vmem:[%s3797_s6 + $0x58] sm:$0xf]  ;;  %v3880_v25 = vld [vmem:[%s3797_s6 + $0x60] sm:$0xf0] }
  0x4e   : > { %5358 = vst [vmem:[#allocation32_spill] sm:$0xff] %v3832_v9  ;;  %v3883_v26 = vld [vmem:[%s3797_s6 + $0x5c] sm:$0xf0]  ;;  %v3886_v27 = vld [vmem:[%s3797_s6 + $0x68] sm:$0xf0] }
  0x4f   : > { %5359 = vst [vmem:[#allocation33_spill] sm:$0xff] %v3835_v10  ;;  %v3889_v28 = vld [vmem:[%s3797_s6 + $0x64] sm:$0xf0]  ;;  %v3892_v29 = vld [vmem:[%s3797_s6 + $0x70] sm:$0xf0] }
  0x50   : > { %5360 = vst [vmem:[#allocation34_spill] sm:$0xff] %v3838_v11  ;;  %v3895_v30 = vld [vmem:[%s3797_s6 + $0x6c] sm:$0xf0]  ;;  %v3898_v31 = vld [vmem:[%s3797_s6 + $0x78] sm:$0xf0] }
  0x51   : > { %5361 = vst [vmem:[#allocation35_spill] sm:$0xff] %v3841_v12  ;;  %v3901_v32 = vld [vmem:[%s3797_s6 + $0x74] sm:$0xf0]  ;;  %v3904_v33 = vld [vmem:[%s3797_s6 + $0x84] sm:$0xf] }
  0x52   : > { %5362 = vst [vmem:[#allocation36_spill] sm:$0xff] %v3844_v13  ;;  %v3907_v34 = vld [vmem:[%s3797_s6 + $0x80] sm:$0xf]  ;;  %v3910_v35 = vld [vmem:[%s3797_s6 + $0x8c] sm:$0xf] }
  0x53   : > { %5363 = vst [vmem:[#allocation37_spill] sm:$0xff] %v3847_v14  ;;  %v3913_v36 = vld [vmem:[%s3797_s6 + $0x88] sm:$0xf]  ;;  %v3916_v37 = vld [vmem:[%s3797_s6 + $0x94] sm:$0xf] }
  0x54   : > { %5364 = vst [vmem:[#allocation38_spill] sm:$0xff] %v3850_v15  ;;  %v3919_v38 = vld [vmem:[%s3797_s6 + $0x90] sm:$0xf]  ;;  %v3922_v39 = vld [vmem:[%s3797_s6 + $0x9c] sm:$0xf] }
  0x55   : > { %5365 = vst [vmem:[#allocation39_spill] sm:$0xff] %v3853_v16  ;;  %v3925_v40 = vld [vmem:[%s3797_s6 + $0x98] sm:$0xf]  ;;  %v3928_v41 = vld [vmem:[%s3797_s6 + $0xa0] sm:$0xf0] }
  0x56   : > { %5366 = vst [vmem:[#allocation40_spill] sm:$0xff] %v3856_v17  ;;  %v3931_v42 = vld [vmem:[%s3797_s6 + $0x9c] sm:$0xf0]  ;;  %v3934_v43 = vld [vmem:[%s3797_s6 + $0xa8] sm:$0xf0] }
  0x57   : > { %5367 = vst [vmem:[#allocation41_spill] sm:$0xff] %v3859_v18  ;;  %v3937_v44 = vld [vmem:[%s3797_s6 + $0xa4] sm:$0xf0]  ;;  %v3940_v45 = vld [vmem:[%s3797_s6 + $0xb0] sm:$0xf0] }
  0x58   : > { %5368 = vst [vmem:[#allocation42_spill] sm:$0xff] %v3862_v19  ;;  %v3943_v46 = vld [vmem:[%s3797_s6 + $0xac] sm:$0xf0]  ;;  %v3946_v47 = vld [vmem:[%s3797_s6 + $0xb8] sm:$0xf0] }
  0x59   : > { %5369 = vst [vmem:[#allocation43_spill] sm:$0xff] %v3865_v20  ;;  %v3949_v48 = vld [vmem:[%s3797_s6 + $0xb4] sm:$0xf0]  ;;  %v3952_v49 = vld [vmem:[%s3797_s6 + $0xc4] sm:$0xf] }
  0x5a   : > { %5370 = vst [vmem:[#allocation44_spill] sm:$0xff] %v3868_v21  ;;  %v3955_v50 = vld [vmem:[%s3797_s6 + $0xc0] sm:$0xf]  ;;  %v3958_v51 = vld [vmem:[%s3797_s6 + $0xcc] sm:$0xf] }
  0x5b   : > { %5371 = vst [vmem:[#allocation45_spill] sm:$0xff] %v3871_v22  ;;  %v3961_v52 = vld [vmem:[%s3797_s6 + $0xc8] sm:$0xf]  ;;  %v3964_v53 = vld [vmem:[%s3797_s6 + $0xd4] sm:$0xf] }
  0x5c   : > { %5372 = vst [vmem:[#allocation46_spill] sm:$0xff] %v3874_v23  ;;  %v3967_v54 = vld [vmem:[%s3797_s6 + $0xd0] sm:$0xf]  ;;  %v3970_v55 = vld [vmem:[%s3797_s6 + $0xdc] sm:$0xf] }
  0x5d   : > { %5373 = vst [vmem:[#allocation47_spill] sm:$0xff] %v3877_v24  ;;  %v3973_v56 = vld [vmem:[%s3797_s6 + $0xd8] sm:$0xf]  ;;  %v3976_v57 = vld [vmem:[%s3797_s6 + $0xe0] sm:$0xf0] }
  0x5e   : > { %5374 = vst [vmem:[#allocation48_spill] sm:$0xff] %v3880_v25  ;;  %v3979_v58 = vld [vmem:[%s3797_s6 + $0xdc] sm:$0xf0]  ;;  %v3982_v59 = vld [vmem:[%s3797_s6 + $0xe8] sm:$0xf0] }
  0x5f   : > { %5375 = vst [vmem:[#allocation49_spill] sm:$0xff] %v3883_v26  ;;  %v3985_v60 = vld [vmem:[%s3797_s6 + $0xe4] sm:$0xf0]  ;;  %v3988_v61 = vld [vmem:[%s3797_s6 + $0xf0] sm:$0xf0] }
  0x60   : > { %5376 = vst [vmem:[#allocation50_spill] sm:$0xff] %v3886_v27  ;;  %v3991_v62 = vld [vmem:[%s3797_s6 + $0xec] sm:$0xf0]  ;;  %v3994_v63 = vld [vmem:[%s3797_s6 + $0xf8] sm:$0xf0] }
  0x61   : > { %5377 = vst [vmem:[#allocation51_spill] sm:$0xff] %v3889_v28  ;;  %v3997_v0 = vld [vmem:[%s3797_s6 + $0xf4] sm:$0xf0]  ;;  %v4000_v7 = vld [vmem:[%s3797_s6 + $0x104] sm:$0xf] }
  0x62   : > { %5378 = vst [vmem:[#allocation52_spill] sm:$0xff] %v3892_v29  ;;  %v4003_v15 = vld [vmem:[%s3797_s6 + $0x100] sm:$0xf]  ;;  %v4006_v16 = vld [vmem:[%s3797_s6 + $0x10c] sm:$0xf] }
  0x63   : > { %5379 = vst [vmem:[#allocation53_spill] sm:$0xff] %v3895_v30  ;;  %v4009_v8 = vld [vmem:[%s3797_s6 + $0x108] sm:$0xf]  ;;  %v4012_v23 = vld [vmem:[%s3797_s6 + $0x114] sm:$0xf] }
  0x64   : > { %5380 = vst [vmem:[#allocation54_spill] sm:$0xff] %v3898_v31  ;;  %v4015_v31 = vld [vmem:[%s3797_s6 + $0x110] sm:$0xf]  ;;  %v4021_v24 = vld [vmem:[%s3797_s6 + $0x118] sm:$0xf] }
  0x65   : > { %5381 = vst [vmem:[#allocation55_spill] sm:$0xff] %v3901_v32  ;;  %v4018_v32 = vld [vmem:[%s3797_s6 + $0x11c] sm:$0xf]  ;;  %v4054_v5 = vld [vmem:[%s3797_s6 + $0x14c] sm:$0xf] }
  0x66   : > { %5382 = vst [vmem:[#allocation56_spill] sm:$0xff] %v3904_v33  ;;  %v4057_v13 = vld [vmem:[%s3797_s6 + $0x148] sm:$0xf]  ;;  %v4060_v14 = vld [vmem:[%s3797_s6 + $0x154] sm:$0xf] }
  0x67   : > { %5383 = vst [vmem:[#allocation57_spill] sm:$0xff] %v3907_v34  ;;  %v4069_v6 = vld [vmem:[%s3797_s6 + $0x158] sm:$0xf]  ;;  %v4072_v21 = vld [vmem:[%s3797_s6 + $0x160] sm:$0xf0] }
  0x68   : > { %5384 = vst [vmem:[#allocation58_spill] sm:$0xff] %v3910_v35  ;;  %v4075_v29 = vld [vmem:[%s3797_s6 + $0x15c] sm:$0xf0]  ;;  %v4078_v30 = vld [vmem:[%s3797_s6 + $0x168] sm:$0xf0]  ;;  %v435_v34 = vld [vmem:[%s3789_s20 + $0x98] sm:$0xff] }
  0x69   : > { %5385 = vst [vmem:[#allocation59_spill] sm:$0xff] %v3913_v36  ;;  %v4081_v22 = vld [vmem:[%s3797_s6 + $0x164] sm:$0xf0]  ;;  %v4168_v3 = vld [vmem:[%s3797_s6 + $0x1e0] sm:$0xf0] }
  0x6a   : > { %5386 = vst [vmem:[#allocation60_spill] sm:$0xff] %v3916_v37  ;;  %v4084_v37 = vld [vmem:[%s3797_s6 + $0x170] sm:$0xf0]  ;;  %v4171_v11 = vld [vmem:[%s3797_s6 + $0x1dc] sm:$0xf0] }
  0x6b   : > { %5387 = vst [vmem:[#allocation61_spill] sm:$0xff] %v3919_v38  ;;  %v4099_v38 = vld [vmem:[%s3797_s6 + $0x180] sm:$0xf]  ;;  %v4174_v12 = vld [vmem:[%s3797_s6 + $0x1e8] sm:$0xf0] }
  0x6c   : > { %5388 = vst [vmem:[#allocation62_spill] sm:$0xff] %v3922_v39  ;;  %v4024_v39 = vld [vmem:[%s3797_s6 + $0x120] sm:$0xf0]  ;;  %v4189_v4 = vld [vmem:[%s3797_s6 + $0x1f4] sm:$0xf0] }
  0x6d   : > { %5389 = vst [vmem:[#allocation63_spill] sm:$0xff] %v3925_v40  ;;  %v4033_v40 = vld [vmem:[%s3797_s6 + $0x124] sm:$0xf0]  ;;  %v4192_v19 = vld [vmem:[%s3797_s6 + $0x204] sm:$0xf] }
  0x6e   : > { %5390 = vst [vmem:[#allocation64_spill] sm:$0xff] %v3928_v41  ;;  %v4195_v27 = vld [vmem:[%s3797_s6 + $0x200] sm:$0xf]  ;;  %v4198_v28 = vld [vmem:[%s3797_s6 + $0x20c] sm:$0xf] }
  0x6f   : > { %5391 = vst [vmem:[#allocation65_spill] sm:$0xff] %v3931_v42  ;;  %v4213_v20 = vld [vmem:[%s3797_s6 + $0x218] sm:$0xf]  ;;  %v4216_v35 = vld [vmem:[%s3797_s6 + $0x220] sm:$0xf0] }
  0x70   : > { %5392 = vst [vmem:[#allocation66_spill] sm:$0xff] %v3934_v43  ;;  %v4237_v43 = vld [vmem:[%s3797_s6 + $0x234] sm:$0xf0]  ;;  %v4528_v1 = vld [vmem:[%s3797_s6 + $0x3c4] sm:$0xf] }
  0x71   : > { %5393 = vst [vmem:[#allocation67_spill] sm:$0xff] %v3937_v44  ;;  %v4240_v44 = vld [vmem:[%s3797_s6 + $0x244] sm:$0xf]  ;;  %v4261_v36 = vld [vmem:[%s3797_s6 + $0x258] sm:$0xf] }
  0x72   : > { %5394 = vst [vmem:[#allocation68_spill] sm:$0xff] %v3940_v45  ;;  %v4093_v45 = vld [vmem:[%s3797_s6 + $0x174] sm:$0xf0]  ;;  %v4537_v9 = vld [vmem:[%s3797_s6 + $0x3c8] sm:$0xf] }
  0x73   : > { %5395 = vst [vmem:[#allocation69_spill] sm:$0xff] %v3943_v46  ;;  %v4096_v46 = vld [vmem:[%s3797_s6 + $0x184] sm:$0xf]  ;;  %v4558_v10 = vld [vmem:[%s3797_s6 + $0x3e8] sm:$0xf0] }
  0x74   : > { %5396 = vst [vmem:[#allocation70_spill] sm:$0xff] %v3946_v47  ;;  %v4027_v47 = vld [vmem:[%s3797_s6 + $0x11c] sm:$0xf0]  ;;  %v4561_v2 = vld [vmem:[%s3797_s6 + $0x3e4] sm:$0xf0] }
  0x75   : > { %5397 = vst [vmem:[#allocation71_spill] sm:$0xff] %v3949_v48  ;;  %v4030_v48 = vld [vmem:[%s3797_s6 + $0x128] sm:$0xf0]  ;;  %v2511_v26 = vld [vmem:[%s3789_s20 + $0x48] sm:$0xf] }
  0x76   : > { %5398 = vst [vmem:[#allocation72_spill] sm:$0xff] %v3952_v49  ;;  %v3138_v18 = vld [vmem:[%s3789_s20 + $0x64] sm:$0xf0]  ;;  %v3129_v41 = vld [vmem:[%s3789_s20 + $0x1c] sm:$0xf0]  ;;  %v513_v49 = vunpack.c.h.b16 %v435_v34 }
  0x77   : > { %5399 = vst [vmem:[#allocation73_spill] sm:$0xff] %v3958_v51  ;;  %v4264_v51 = vld [vmem:[%s3797_s6 + $0x260] sm:$0xf0]  ;;  %v2479_v42 = vld [vmem:[%s3789_s20 + $0x8] sm:$0xf] }
  0x78   : > { %5400 = vst [vmem:[#allocation74_spill] sm:$0xff] %v3961_v52  ;;  %v4309_v52 = vld [vmem:[%s3797_s6 + $0x298] sm:$0xf] }
  0x79   : > { %5401 = vst [vmem:[#allocation75_spill] sm:$0xff] %v3964_v53  ;;  %v4102_v53 = vld [vmem:[%s3797_s6 + $0x18c] sm:$0xf] }
  0x7a   : > { %5402 = vst [vmem:[#allocation76_spill] sm:$0xff] %v3967_v54  ;;  %v4117_v54 = vld [vmem:[%s3797_s6 + $0x198] sm:$0xf] }
  0x7b   : > { %5403 = vst [vmem:[#allocation77_spill] sm:$0xff] %v3970_v55  ;;  %v4036_v55 = vld [vmem:[%s3797_s6 + $0x130] sm:$0xf0] }
  0x7c   : > { %5404 = vst [vmem:[#allocation78_spill] sm:$0xff] %v3973_v56  ;;  %v4045_v56 = vld [vmem:[%s3797_s6 + $0x134] sm:$0xf0] }
  0x7d   : > { %5405 = vst [vmem:[#allocation79_spill] sm:$0xff] %v3976_v57  ;;  %v434_v57 = vld [vmem:[%s3789_s20 + $0x90] sm:$0xff] }
  0x7e   : > { %5406 = vst [vmem:[#allocation80_spill] sm:$0xff] %v3982_v59  ;;  %v4285_v59 = vld [vmem:[%s3797_s6 + $0x274] sm:$0xf0] }
  0x7f   : > { %5407 = vst [vmem:[#allocation81_spill] sm:$0xff] %v3985_v60  ;;  %v4288_v60 = vld [vmem:[%s3797_s6 + $0x284] sm:$0xf] }
  0x80   : > { %5408 = vst [vmem:[#allocation82_spill] sm:$0xff] %v3988_v61  ;;  %v4105_v61 = vld [vmem:[%s3797_s6 + $0x188] sm:$0xf] }
  0x81   : > { %5409 = vst [vmem:[#allocation83_spill] sm:$0xff] %v3991_v62  ;;  %v4108_v62 = vld [vmem:[%s3797_s6 + $0x194] sm:$0xf] }
  0x82   : > { %5410 = vst [vmem:[#allocation84_spill] sm:$0xff] %v3994_v63  ;;  %v4039_v63 = vld [vmem:[%s3797_s6 + $0x12c] sm:$0xf0] }
  0x83   : > { %5411 = vst [vmem:[#allocation85_spill] sm:$0xff] %v3997_v0  ;;  %v4042_v0 = vld [vmem:[%s3797_s6 + $0x138] sm:$0xf0] }
  0x84   : > { %5412 = vst [vmem:[#allocation86_spill] sm:$0xff] %v4006_v16  ;;  %v4312_v16 = vld [vmem:[%s3797_s6 + $0x2a0] sm:$0xf0] }
  0x85   : > { %5413 = vst [vmem:[#allocation87_spill] sm:$0xff] %v4009_v8  ;;  %v4357_v8 = vld [vmem:[%s3797_s6 + $0x2d8] sm:$0xf] }
  0x86   : > { %5414 = vst [vmem:[#allocation88_spill] sm:$0xff] %v4012_v23  ;;  %v4120_v23 = vld [vmem:[%s3797_s6 + $0x1a0] sm:$0xf0] }
  0x87   : > { %5415 = vst [vmem:[#allocation89_spill] sm:$0xff] %v4015_v31  ;;  %v4129_v31 = vld [vmem:[%s3797_s6 + $0x1a4] sm:$0xf0] }
  0x88   : > { %5416 = vst [vmem:[#allocation90_spill] sm:$0xff] %v4018_v32  ;;  %v4048_v32 = vld [vmem:[%s3797_s6 + $0x144] sm:$0xf] }
  0x89   : > { %5417 = vst [vmem:[#allocation91_spill] sm:$0xff] %v4021_v24  ;;  %v4051_v24 = vld [vmem:[%s3797_s6 + $0x140] sm:$0xf] }
  0x8a   : > { %5418 = vst [vmem:[#allocation92_spill] sm:$0xff] %v4030_v48  ;;  %v4333_v48 = vld [vmem:[%s3797_s6 + $0x2b4] sm:$0xf0] }
  0x8b   : > { %5419 = vst [vmem:[#allocation93_spill] sm:$0xff] %v4033_v40  ;;  %v4336_v40 = vld [vmem:[%s3797_s6 + $0x2c4] sm:$0xf] }
  0x8c   : > { %5420 = vst [vmem:[#allocation94_spill] sm:$0xff] %v4036_v55  ;;  %v4123_v55 = vld [vmem:[%s3797_s6 + $0x19c] sm:$0xf0] }
  0x8d   : > { %5421 = vst [vmem:[#allocation95_spill] sm:$0xff] %v4039_v63  ;;  %v4126_v63 = vld [vmem:[%s3797_s6 + $0x1a8] sm:$0xf0] }
  0x8e   : > { %5422 = vst [vmem:[#allocation96_spill] sm:$0xff] %v4042_v0  ;;  %v4063_v0 = vld [vmem:[%s3797_s6 + $0x150] sm:$0xf] }
  0x8f   : > { %5423 = vst [vmem:[#allocation97_spill] sm:$0xff] %v4045_v56  ;;  %v4066_v56 = vld [vmem:[%s3797_s6 + $0x15c] sm:$0xf] }
  0x90   : > { %5424 = vst [vmem:[#allocation98_spill] sm:$0xff] %v4054_v5  ;;  %v4360_v5 = vld [vmem:[%s3797_s6 + $0x2e0] sm:$0xf0] }
  0x91   : > { %5425 = vst [vmem:[#allocation99_spill] sm:$0xff] %v4057_v13  ;;  %v4405_v13 = vld [vmem:[%s3797_s6 + $0x318] sm:$0xf] }
  0x92   : > { %5426 = vst [vmem:[#allocation100_spill] sm:$0xff] %v4060_v14  ;;  %v4132_v14 = vld [vmem:[%s3797_s6 + $0x1b0] sm:$0xf0] }
  0x93   : > { %5427 = vst [vmem:[#allocation101_spill] sm:$0xff] %v4063_v0  ;;  %v4147_v0 = vld [vmem:[%s3797_s6 + $0x1c0] sm:$0xf] }
  0x94   : > { %5428 = vst [vmem:[#allocation102_spill] sm:$0xff] %v4066_v56  ;;  %v4087_v56 = vld [vmem:[%s3797_s6 + $0x16c] sm:$0xf0] }
  0x95   : > { %5429 = vst [vmem:[#allocation103_spill] sm:$0xff] %v4069_v6  ;;  %v4090_v6 = vld [vmem:[%s3797_s6 + $0x178] sm:$0xf0] }
  0x96   : > { %5430 = vst [vmem:[#allocation104_spill] sm:$0xff] %v4078_v30  ;;  %v4381_v30 = vld [vmem:[%s3797_s6 + $0x2f4] sm:$0xf0] }
  0x97   : > { %5431 = vst [vmem:[#allocation105_spill] sm:$0xff] %v4081_v22  ;;  %v4384_v22 = vld [vmem:[%s3797_s6 + $0x304] sm:$0xf] }
  0x98   : > { %5432 = vst [vmem:[#allocation106_spill] sm:$0xff] %v4084_v37  ;;  %v4141_v37 = vld [vmem:[%s3797_s6 + $0x1b4] sm:$0xf0] }
  0x99   : > { %5433 = vst [vmem:[#allocation107_spill] sm:$0xff] %v4087_v56  ;;  %v4144_v56 = vld [vmem:[%s3797_s6 + $0x1c4] sm:$0xf] }
  0x9a   : > { %5434 = vst [vmem:[#allocation108_spill] sm:$0xff] %v4090_v6  ;;  %v4111_v6 = vld [vmem:[%s3797_s6 + $0x190] sm:$0xf] }
  0x9b   : > { %5435 = vst [vmem:[#allocation109_spill] sm:$0xff] %v4093_v45  ;;  %v4114_v45 = vld [vmem:[%s3797_s6 + $0x19c] sm:$0xf] }
  0x9c   : > { %5436 = vst [vmem:[#allocation110_spill] sm:$0xff] %v4102_v53  ;;  %v4408_v53 = vld [vmem:[%s3797_s6 + $0x320] sm:$0xf0] }
  0x9d   : > { %5437 = vst [vmem:[#allocation111_spill] sm:$0xff] %v4105_v61  ;;  %v4453_v61 = vld [vmem:[%s3797_s6 + $0x358] sm:$0xf] }
  0x9e   : > { %5438 = vst [vmem:[#allocation112_spill] sm:$0xff] %v4108_v62  ;;  %v4150_v62 = vld [vmem:[%s3797_s6 + $0x1cc] sm:$0xf] }
  0x9f   : > { %5439 = vst [vmem:[#allocation113_spill] sm:$0xff] %v4111_v6  ;;  %v4165_v6 = vld [vmem:[%s3797_s6 + $0x1d8] sm:$0xf] }
  0xa0   : > { %5440 = vst [vmem:[#allocation114_spill] sm:$0xff] %v4114_v45  ;;  %v4135_v45 = vld [vmem:[%s3797_s6 + $0x1ac] sm:$0xf0] }
  0xa1   : > { %5441 = vst [vmem:[#allocation115_spill] sm:$0xff] %v4117_v54  ;;  %v4138_v54 = vld [vmem:[%s3797_s6 + $0x1b8] sm:$0xf0] }
  0xa2   : > { %5442 = vst [vmem:[#allocation116_spill] sm:$0xff] %v4126_v63  ;;  %v4429_v63 = vld [vmem:[%s3797_s6 + $0x334] sm:$0xf0] }
  0xa3   : > { %5443 = vst [vmem:[#allocation117_spill] sm:$0xff] %v4129_v31  ;;  %v4432_v31 = vld [vmem:[%s3797_s6 + $0x344] sm:$0xf] }
  0xa4   : > { %5444 = vst [vmem:[#allocation118_spill] sm:$0xff] %v4132_v14  ;;  %v4153_v14 = vld [vmem:[%s3797_s6 + $0x1c8] sm:$0xf] }
  0xa5   : > { %5445 = vst [vmem:[#allocation119_spill] sm:$0xff] %v4135_v45  ;;  %v4156_v45 = vld [vmem:[%s3797_s6 + $0x1d4] sm:$0xf] }
  0xa6   : > { %5446 = vst [vmem:[#allocation120_spill] sm:$0xff] %v4138_v54  ;;  %v4159_v54 = vld [vmem:[%s3797_s6 + $0x1d0] sm:$0xf] }
  0xa7   : > { %5447 = vst [vmem:[#allocation121_spill] sm:$0xff] %v4141_v37  ;;  %v4162_v37 = vld [vmem:[%s3797_s6 + $0x1dc] sm:$0xf] }
  0xa8   : > { %5448 = vst [vmem:[#allocation122_spill] sm:$0xff] %v4150_v62  ;;  %v4456_v62 = vld [vmem:[%s3797_s6 + $0x360] sm:$0xf0] }
  0xa9   : > { %5449 = vst [vmem:[#allocation123_spill] sm:$0xff] %v4153_v14  ;;  %v4501_v14 = vld [vmem:[%s3797_s6 + $0x398] sm:$0xf] }
  0xaa   : > { %5450 = vst [vmem:[#allocation124_spill] sm:$0xff] %v4156_v45  ;;  %v4177_v45 = vld [vmem:[%s3797_s6 + $0x1e4] sm:$0xf0] }
  0xab   : > { %5451 = vst [vmem:[#allocation125_spill] sm:$0xff] %v4159_v54  ;;  %v4180_v54 = vld [vmem:[%s3797_s6 + $0x1f0] sm:$0xf0] }
  0xac   : > { %5452 = vst [vmem:[#allocation126_spill] sm:$0xff] %v4162_v37  ;;  %v4183_v37 = vld [vmem:[%s3797_s6 + $0x1ec] sm:$0xf0] }
  0xad   : > { %5453 = vst [vmem:[#allocation127_spill] sm:$0xff] %v4165_v6  ;;  %v4186_v6 = vld [vmem:[%s3797_s6 + $0x1f8] sm:$0xf0] }
  0xae   : > { %5454 = vst [vmem:[#allocation128_spill] sm:$0xff] %v4174_v12  ;;  %v4477_v12 = vld [vmem:[%s3797_s6 + $0x374] sm:$0xf0] }
  0xaf   : > { %5455 = vst [vmem:[#allocation129_spill] sm:$0xff] %v4177_v45  ;;  %v4480_v45 = vld [vmem:[%s3797_s6 + $0x384] sm:$0xf] }
  0xb0   : > { %5456 = vst [vmem:[#allocation130_spill] sm:$0xff] %v4180_v54  ;;  %v4201_v54 = vld [vmem:[%s3797_s6 + $0x208] sm:$0xf] }
  0xb1   : > { %5457 = vst [vmem:[#allocation131_spill] sm:$0xff] %v4183_v37  ;;  %v4204_v37 = vld [vmem:[%s3797_s6 + $0x214] sm:$0xf] }
  0xb2   : > { %5458 = vst [vmem:[#allocation132_spill] sm:$0xff] %v4186_v6  ;;  %v4207_v6 = vld [vmem:[%s3797_s6 + $0x210] sm:$0xf] }
  0xb3   : > { %5459 = vst [vmem:[#allocation133_spill] sm:$0xff] %v4189_v4  ;;  %v4210_v4 = vld [vmem:[%s3797_s6 + $0x21c] sm:$0xf] }
  0xb4   : > { %5460 = vst [vmem:[#allocation134_spill] sm:$0xff] %v4192_v19  ;;  %v4504_v19 = vld [vmem:[%s3797_s6 + $0x3a0] sm:$0xf0] }
  0xb5   : > { %5461 = vst [vmem:[#allocation135_spill] sm:$0xff] %v4195_v27  ;;  %v4555_v27 = vld [vmem:[%s3797_s6 + $0x3dc] sm:$0xf0] }
  0xb6   : > { %5462 = vst [vmem:[#allocation136_spill] sm:$0xff] %v4198_v28  ;;  %v4219_v28 = vld [vmem:[%s3797_s6 + $0x21c] sm:$0xf0] }
  0xb7   : > { %5463 = vst [vmem:[#allocation137_spill] sm:$0xff] %v4201_v54  ;;  %v4222_v54 = vld [vmem:[%s3797_s6 + $0x228] sm:$0xf0] }
  0xb8   : > { %5464 = vst [vmem:[#allocation138_spill] sm:$0xff] %v4204_v37  ;;  %v4225_v37 = vld [vmem:[%s3797_s6 + $0x224] sm:$0xf0] }
  0xb9   : > { %5465 = vst [vmem:[#allocation139_spill] sm:$0xff] %v4207_v6  ;;  %v4228_v6 = vld [vmem:[%s3797_s6 + $0x230] sm:$0xf0] }
  0xba   : > { %5466 = vst [vmem:[#allocation140_spill] sm:$0xff] %v4210_v4  ;;  %v4231_v4 = vld [vmem:[%s3797_s6 + $0x22c] sm:$0xf0] }
  0xbb   : > { %5467 = vst [vmem:[#allocation141_spill] sm:$0xff] %v4213_v20  ;;  %v4234_v20 = vld [vmem:[%s3797_s6 + $0x238] sm:$0xf0] }
  0xbc   : > { %5468 = vst [vmem:[#allocation142_spill] sm:$0xff] %v4216_v35  ;;  %v4525_v35 = vld [vmem:[%s3797_s6 + $0x3b4] sm:$0xf0] }
  0xbd   : > { %5469 = vst [vmem:[#allocation143_spill] sm:$0xff] %v4219_v28  ;;  %v4546_v28 = vld [vmem:[%s3797_s6 + $0x3dc] sm:$0xf] }
  0xbe   : > { %5470 = vst [vmem:[#allocation144_spill] sm:$0xff] %v4222_v54  ;;  %v4243_v54 = vld [vmem:[%s3797_s6 + $0x240] sm:$0xf] }
  0xbf   : > { %5471 = vst [vmem:[#allocation145_spill] sm:$0xff] %v4225_v37  ;;  %v4246_v37 = vld [vmem:[%s3797_s6 + $0x24c] sm:$0xf] }
  0xc0   : > { %5472 = vst [vmem:[#allocation146_spill] sm:$0xff] %v4228_v6  ;;  %v4249_v6 = vld [vmem:[%s3797_s6 + $0x248] sm:$0xf] }
  0xc1   : > { %5473 = vst [vmem:[#allocation147_spill] sm:$0xff] %v4231_v4  ;;  %v4252_v4 = vld [vmem:[%s3797_s6 + $0x254] sm:$0xf] }
  0xc2   : > { %5474 = vst [vmem:[#allocation148_spill] sm:$0xff] %v4234_v20  ;;  %v4255_v20 = vld [vmem:[%s3797_s6 + $0x250] sm:$0xf] }
  0xc3   : > { %5475 = vst [vmem:[#allocation149_spill] sm:$0xff] %v4237_v43  ;;  %v4258_v43 = vld [vmem:[%s3797_s6 + $0x25c] sm:$0xf] }
  0xc4   : > { %5476 = vst [vmem:[#allocation150_spill] sm:$0xff] %v4240_v44 }
  0xc5   : > { %5477 = vst [vmem:[#allocation151_spill] sm:$0xff] %v4243_v54  ;;  %v2505_v54 = vld [vmem:[%s3789_s20 + $0x60] sm:$0xf0] }
  0xc6   : > { %5478 = vst [vmem:[#allocation152_spill] sm:$0xff] %v4246_v37  ;;  %v4267_v37 = vld [vmem:[%s3797_s6 + $0x25c] sm:$0xf0] }
  0xc7   : > { %5479 = vst [vmem:[#allocation153_spill] sm:$0xff] %v4249_v6  ;;  %v4270_v6 = vld [vmem:[%s3797_s6 + $0x268] sm:$0xf0] }
  0xc8   : > { %5480 = vst [vmem:[#allocation154_spill] sm:$0xff] %v4252_v4  ;;  %v4273_v4 = vld [vmem:[%s3797_s6 + $0x264] sm:$0xf0] }
  0xc9   : > { %5481 = vst [vmem:[#allocation155_spill] sm:$0xff] %v4255_v20  ;;  %v4276_v20 = vld [vmem:[%s3797_s6 + $0x270] sm:$0xf0] }
  0xca   : > { %5482 = vst [vmem:[#allocation156_spill] sm:$0xff] %v4258_v43  ;;  %v4279_v43 = vld [vmem:[%s3797_s6 + $0x26c] sm:$0xf0] }
  0xcb   : > { %5483 = vst [vmem:[#allocation157_spill] sm:$0xff] %v4261_v36  ;;  %v4282_v36 = vld [vmem:[%s3797_s6 + $0x278] sm:$0xf0] }
  0xcc   : > { %5484 = vst [vmem:[#allocation158_spill] sm:$0xff] %v4264_v51 }
  0xcd   : > { %5485 = vst [vmem:[#allocation159_spill] sm:$0xff] %v4267_v37 }
  0xce   : > { %5486 = vst [vmem:[#allocation160_spill] sm:$0xff] %v4270_v6  ;;  %v4291_v6 = vld [vmem:[%s3797_s6 + $0x280] sm:$0xf] }
  0xcf   : > { %5487 = vst [vmem:[#allocation161_spill] sm:$0xff] %v4273_v4  ;;  %v4294_v4 = vld [vmem:[%s3797_s6 + $0x28c] sm:$0xf] }
  0xd0   : > { %5488 = vst [vmem:[#allocation162_spill] sm:$0xff] %v4276_v20  ;;  %v4297_v20 = vld [vmem:[%s3797_s6 + $0x288] sm:$0xf] }
  0xd1   : > { %5489 = vst [vmem:[#allocation163_spill] sm:$0xff] %v4279_v43  ;;  %v4300_v43 = vld [vmem:[%s3797_s6 + $0x294] sm:$0xf] }
  0xd2   : > { %5490 = vst [vmem:[#allocation164_spill] sm:$0xff] %v4282_v36  ;;  %v4303_v36 = vld [vmem:[%s3797_s6 + $0x290] sm:$0xf] }
  0xd3   : > { %5491 = vst [vmem:[#allocation165_spill] sm:$0xff] %v4285_v59  ;;  %v4306_v59 = vld [vmem:[%s3797_s6 + $0x29c] sm:$0xf] }
  0xd4   : > { %5492 = vst [vmem:[#allocation166_spill] sm:$0xff] %v4288_v60  ;;  %v3134_v60 = vld [vmem:[%s3789_s20 + $0x4c] sm:$0xf] }
  0xd5   : > { %5493 = vst [vmem:[#allocation167_spill] sm:$0xff] %v4291_v6 }
  0xd6   : > { %5494 = vst [vmem:[#allocation168_spill] sm:$0xff] %v4294_v4  ;;  %v4315_v4 = vld [vmem:[%s3797_s6 + $0x29c] sm:$0xf0] }
  0xd7   : > { %5495 = vst [vmem:[#allocation169_spill] sm:$0xff] %v4297_v20  ;;  %v4318_v20 = vld [vmem:[%s3797_s6 + $0x2a8] sm:$0xf0] }
  0xd8   : > { %5496 = vst [vmem:[#allocation170_spill] sm:$0xff] %v4300_v43  ;;  %v4321_v43 = vld [vmem:[%s3797_s6 + $0x2a4] sm:$0xf0] }
  0xd9   : > { %5497 = vst [vmem:[#allocation171_spill] sm:$0xff] %v4303_v36  ;;  %v4324_v36 = vld [vmem:[%s3797_s6 + $0x2b0] sm:$0xf0] }
  0xda   : > { %5498 = vst [vmem:[#allocation172_spill] sm:$0xff] %v4306_v59  ;;  %v4327_v59 = vld [vmem:[%s3797_s6 + $0x2ac] sm:$0xf0] }
  0xdb   : > { %5499 = vst [vmem:[#allocation173_spill] sm:$0xff] %v4309_v52  ;;  %v4330_v52 = vld [vmem:[%s3797_s6 + $0x2b8] sm:$0xf0] }
  0xdc   : > { %5500 = vst [vmem:[#allocation174_spill] sm:$0xff] %v4312_v16  ;;  %v2513_v16 = vld [vmem:[%s3789_s20 + $0x68] sm:$0xf0] }
  0xdd   : > { %5501 = vst [vmem:[#allocation175_spill] sm:$0xff] %v4315_v4  ;;  %v3125_v4 = vld [vmem:[%s3789_s20 + $0x4] sm:$0xf]  ;;  %v2516_v6 = vor.u32 %v3134_v60, %v2513_v16 }
  0xde   : > { %5502 = vst [vmem:[#allocation176_spill] sm:$0xff] %v4318_v20  ;;  %v4339_v20 = vld [vmem:[%s3797_s6 + $0x2c0] sm:$0xf] }
  0xdf   : > { %5503 = vst [vmem:[#allocation177_spill] sm:$0xff] %v4321_v43  ;;  %v4342_v43 = vld [vmem:[%s3797_s6 + $0x2cc] sm:$0xf] }
  0xe0   : > { %5504 = vst [vmem:[#allocation178_spill] sm:$0xff] %v4324_v36  ;;  %v4345_v36 = vld [vmem:[%s3797_s6 + $0x2c8] sm:$0xf] }
  0xe1   : > { %5505 = vst [vmem:[#allocation179_spill] sm:$0xff] %v4327_v59  ;;  %v4348_v59 = vld [vmem:[%s3797_s6 + $0x2d4] sm:$0xf] }
  0xe2   : > { %5506 = vst [vmem:[#allocation180_spill] sm:$0xff] %v4330_v52  ;;  %v4351_v52 = vld [vmem:[%s3797_s6 + $0x2d0] sm:$0xf] }
  0xe3   : > { %5507 = vst [vmem:[#allocation181_spill] sm:$0xff] %v4333_v48  ;;  %v4354_v48 = vld [vmem:[%s3797_s6 + $0x2dc] sm:$0xf] }
  0xe4   : > { %5508 = vst [vmem:[#allocation182_spill] sm:$0xff] %v4336_v40  ;;  %v3126_v40 = vld [vmem:[%s3789_s20 + $0xc] sm:$0xf] }
  0xe5   : > { %5509 = vst [vmem:[#allocation183_spill] sm:$0xff] %v4342_v43  ;;  %v4363_v43 = vld [vmem:[%s3797_s6 + $0x2dc] sm:$0xf0] }
  0xe6   : > { %5510 = vst [vmem:[#allocation184_spill] sm:$0xff] %v4345_v36  ;;  %v4366_v36 = vld [vmem:[%s3797_s6 + $0x2e8] sm:$0xf0] }
  0xe7   : > { %5511 = vst [vmem:[#allocation185_spill] sm:$0xff] %v4348_v59  ;;  %v4369_v59 = vld [vmem:[%s3797_s6 + $0x2e4] sm:$0xf0] }
  0xe8   : > { %5512 = vst [vmem:[#allocation186_spill] sm:$0xff] %v4351_v52  ;;  %v4372_v52 = vld [vmem:[%s3797_s6 + $0x2f0] sm:$0xf0] }
  0xe9   : > { %5513 = vst [vmem:[#allocation187_spill] sm:$0xff] %v4354_v48  ;;  %v4375_v48 = vld [vmem:[%s3797_s6 + $0x2ec] sm:$0xf0] }
  0xea   : > { %5514 = vst [vmem:[#allocation188_spill] sm:$0xff] %v4357_v8  ;;  %v4378_v8 = vld [vmem:[%s3797_s6 + $0x2f8] sm:$0xf0] }
  0xeb   : > { %5515 = vst [vmem:[#allocation189_spill] sm:$0xff] %v4360_v5  ;;  %v512_v5 = vunpack.c.l.b16 %v435_v34 }
  0xec   : > { %5516 = vst [vmem:[#allocation190_spill] sm:$0xff] %v4363_v43 }
  0xed   : > { %5517 = vst [vmem:[#allocation191_spill] sm:$0xff] %v4366_v36  ;;  %v4387_v36 = vld [vmem:[%s3797_s6 + $0x300] sm:$0xf] }
  0xee   : > { %5518 = vst [vmem:[#allocation192_spill] sm:$0xff] %v4369_v59  ;;  %v4390_v59 = vld [vmem:[%s3797_s6 + $0x30c] sm:$0xf] }
  0xef   : > { %5519 = vst [vmem:[#allocation193_spill] sm:$0xff] %v4372_v52  ;;  %v4393_v52 = vld [vmem:[%s3797_s6 + $0x308] sm:$0xf] }
  0xf0   : > { %5520 = vst [vmem:[#allocation194_spill] sm:$0xff] %v4375_v48  ;;  %v4396_v48 = vld [vmem:[%s3797_s6 + $0x314] sm:$0xf] }
  0xf1   : > { %5521 = vst [vmem:[#allocation195_spill] sm:$0xff] %v4378_v8  ;;  %v4399_v8 = vld [vmem:[%s3797_s6 + $0x310] sm:$0xf] }
  0xf2   : > { %5522 = vst [vmem:[#allocation196_spill] sm:$0xff] %v4381_v30  ;;  %v4402_v30 = vld [vmem:[%s3797_s6 + $0x31c] sm:$0xf] }
  0xf3   : > { %5523 = vst [vmem:[#allocation197_spill] sm:$0xff] %v4390_v59  ;;  %v4411_v59 = vld [vmem:[%s3797_s6 + $0x31c] sm:$0xf0] }
  0xf4   : > { %5524 = vst [vmem:[#allocation198_spill] sm:$0xff] %v4393_v52  ;;  %v4414_v52 = vld [vmem:[%s3797_s6 + $0x328] sm:$0xf0] }
  0xf5   : > { %5525 = vst [vmem:[#allocation199_spill] sm:$0xff] %v4396_v48  ;;  %v4417_v48 = vld [vmem:[%s3797_s6 + $0x324] sm:$0xf0] }
  0xf6   : > { %5526 = vst [vmem:[#allocation200_spill] sm:$0xff] %v4399_v8  ;;  %v4420_v8 = vld [vmem:[%s3797_s6 + $0x330] sm:$0xf0] }
  0xf7   : > { %5527 = vst [vmem:[#allocation201_spill] sm:$0xff] %v4402_v30  ;;  %v4423_v30 = vld [vmem:[%s3797_s6 + $0x32c] sm:$0xf0] }
  0xf8   : > { %5528 = vst [vmem:[#allocation202_spill] sm:$0xff] %v4405_v13  ;;  %v4426_v13 = vld [vmem:[%s3797_s6 + $0x338] sm:$0xf0] }
  0xf9   : > { %5529 = vst [vmem:[#allocation203_spill] sm:$0xff] %v4414_v52  ;;  %v4435_v52 = vld [vmem:[%s3797_s6 + $0x340] sm:$0xf] }
  0xfa   : > { %5530 = vst [vmem:[#allocation204_spill] sm:$0xff] %v4417_v48  ;;  %v4438_v48 = vld [vmem:[%s3797_s6 + $0x34c] sm:$0xf] }
  0xfb   : > { %5531 = vst [vmem:[#allocation205_spill] sm:$0xff] %v4420_v8  ;;  %v4441_v8 = vld [vmem:[%s3797_s6 + $0x348] sm:$0xf] }
  0xfc   : > { %5532 = vst [vmem:[#allocation206_spill] sm:$0xff] %v4423_v30  ;;  %v4444_v30 = vld [vmem:[%s3797_s6 + $0x354] sm:$0xf] }
  0xfd   : > { %5533 = vst [vmem:[#allocation207_spill] sm:$0xff] %v4426_v13  ;;  %v4447_v13 = vld [vmem:[%s3797_s6 + $0x350] sm:$0xf] }
  0xfe   : > { %5534 = vst [vmem:[#allocation208_spill] sm:$0xff] %v4429_v63  ;;  %v4450_v63 = vld [vmem:[%s3797_s6 + $0x35c] sm:$0xf] }
  0xff   : > { %5535 = vst [vmem:[#allocation209_spill] sm:$0xff] %v4438_v48  ;;  %v4459_v48 = vld [vmem:[%s3797_s6 + $0x35c] sm:$0xf0] }
 0x100   : > { %5536 = vst [vmem:[#allocation210_spill] sm:$0xff] %v4441_v8  ;;  %v4462_v8 = vld [vmem:[%s3797_s6 + $0x368] sm:$0xf0] }
 0x101   : > { %5537 = vst [vmem:[#allocation211_spill] sm:$0xff] %v4444_v30  ;;  %v4465_v30 = vld [vmem:[%s3797_s6 + $0x364] sm:$0xf0] }
 0x102   : > { %5538 = vst [vmem:[#allocation212_spill] sm:$0xff] %v4447_v13  ;;  %v4468_v13 = vld [vmem:[%s3797_s6 + $0x370] sm:$0xf0] }
 0x103   : > { %5539 = vst [vmem:[#allocation213_spill] sm:$0xff] %v4450_v63  ;;  %v4471_v63 = vld [vmem:[%s3797_s6 + $0x36c] sm:$0xf0] }
 0x104   : > { %5540 = vst [vmem:[#allocation214_spill] sm:$0xff] %v4453_v61  ;;  %v4474_v61 = vld [vmem:[%s3797_s6 + $0x378] sm:$0xf0] }
 0x105   : > { %5541 = vst [vmem:[#allocation215_spill] sm:$0xff] %v4462_v8  ;;  %v4483_v8 = vld [vmem:[%s3797_s6 + $0x380] sm:$0xf] }
 0x106   : > { %5542 = vst [vmem:[#allocation216_spill] sm:$0xff] %v4465_v30  ;;  %v4486_v30 = vld [vmem:[%s3797_s6 + $0x38c] sm:$0xf] }
 0x107   : > { %5543 = vst [vmem:[#allocation217_spill] sm:$0xff] %v4468_v13  ;;  %v4489_v13 = vld [vmem:[%s3797_s6 + $0x388] sm:$0xf] }
 0x108   : > { %5544 = vst [vmem:[#allocation218_spill] sm:$0xff] %v4471_v63  ;;  %v4492_v63 = vld [vmem:[%s3797_s6 + $0x394] sm:$0xf] }
 0x109   : > { %5545 = vst [vmem:[#allocation219_spill] sm:$0xff] %v4474_v61  ;;  %v4495_v61 = vld [vmem:[%s3797_s6 + $0x390] sm:$0xf] }
 0x10a   : > { %5546 = vst [vmem:[#allocation220_spill] sm:$0xff] %v4477_v12  ;;  %v4498_v12 = vld [vmem:[%s3797_s6 + $0x39c] sm:$0xf] }
 0x10b   : > { %5547 = vst [vmem:[#allocation221_spill] sm:$0xff] %v4486_v30  ;;  %v4507_v30 = vld [vmem:[%s3797_s6 + $0x39c] sm:$0xf0] }
 0x10c   : > { %5548 = vst [vmem:[#allocation222_spill] sm:$0xff] %v4489_v13  ;;  %v4510_v13 = vld [vmem:[%s3797_s6 + $0x3a8] sm:$0xf0] }
 0x10d   : > { %5549 = vst [vmem:[#allocation223_spill] sm:$0xff] %v4492_v63  ;;  %v4513_v63 = vld [vmem:[%s3797_s6 + $0x3a4] sm:$0xf0] }
 0x10e   : > { %5550 = vst [vmem:[#allocation224_spill] sm:$0xff] %v4495_v61  ;;  %v4516_v61 = vld [vmem:[%s3797_s6 + $0x3b0] sm:$0xf0] }
 0x10f   : > { %5551 = vst [vmem:[#allocation225_spill] sm:$0xff] %v4498_v12  ;;  %v4519_v12 = vld [vmem:[%s3797_s6 + $0x3ac] sm:$0xf0] }
 0x110   : > { %5552 = vst [vmem:[#allocation226_spill] sm:$0xff] %v4501_v14  ;;  %v4522_v14 = vld [vmem:[%s3797_s6 + $0x3b8] sm:$0xf0] }
 0x111   : > { %5553 = vst [vmem:[#allocation227_spill] sm:$0xff] %v4510_v13  ;;  %v4531_v13 = vld [vmem:[%s3797_s6 + $0x3c0] sm:$0xf] }
 0x112   : > { %5554 = vst [vmem:[#allocation228_spill] sm:$0xff] %v4513_v63  ;;  %v4534_v63 = vld [vmem:[%s3797_s6 + $0x3cc] sm:$0xf] }
 0x113   : > { %5555 = vst [vmem:[#allocation229_spill] sm:$0xff] %v4516_v61  ;;  %v4540_v61 = vld [vmem:[%s3797_s6 + $0x3d4] sm:$0xf] }
 0x114   : > { %5556 = vst [vmem:[#allocation230_spill] sm:$0xff] %v4519_v12  ;;  %v4543_v12 = vld [vmem:[%s3797_s6 + $0x3d0] sm:$0xf] }
 0x115   : > { %5557 = vst [vmem:[#allocation231_spill] sm:$0xff] %v4522_v14  ;;  %v4549_v14 = vld [vmem:[%s3797_s6 + $0x3d8] sm:$0xf] }
 0x116   : > { %5558 = vst [vmem:[#allocation232_spill] sm:$0xff] %v4525_v35  ;;  %v4552_v35 = vld [vmem:[%s3797_s6 + $0x3e0] sm:$0xf0] }
 0x117   : > { %5559 = vst [vmem:[#allocation233_spill] sm:$0xff] %v4534_v63  ;;  %v4564_v63 = vld [vmem:[%s3797_s6 + $0x3f0] sm:$0xf0] }
 0x118   : > { %5560 = vst [vmem:[#allocation234_spill] sm:$0xff] %v4537_v9  ;;  %v4567_v9 = vld [vmem:[%s3797_s6 + $0x3ec] sm:$0xf0] }
 0x119   : > { %5561 = vst [vmem:[#allocation235_spill] sm:$0xff] %v4540_v61  ;;  %v4570_v61 = vld [vmem:[%s3797_s6 + $0x3f8] sm:$0xf0] }
 0x11a   : > { %5562 = vst [vmem:[#allocation236_spill] sm:$0xff] %v4543_v12  ;;  %v433_v12 = vld [vmem:[%s3789_s20 + $0x88] sm:$0xff] }
 0x11b   : > { %5563 = vst [vmem:[#allocation237_spill] sm:$0xff] %v4546_v28  ;;  %v4573_v28 = vld [vmem:[%s3797_s6 + $0x3f4] sm:$0xf0]  ;;  %v508_v51 = vunpack.c.l.b16 %v433_v12 }
 0x11c   : > { %5564 = vst [vmem:[#allocation238_spill] sm:$0xff] %v4549_v14  ;;  %v432_v14 = vld [vmem:[%s3789_s20 + $0x80] sm:$0xff] }
 0x11d   : > { %5565 = vst [vmem:[#allocation239_spill] sm:$0xff] %v4558_v10  ;;  %v506_v44 = vunpack.c.l.b16 %v432_v14  ;;  %v507_v10 = vunpack.c.h.b16 %v432_v14 }
 0x11e   : > { %5566 = vst [vmem:[#allocation240_spill] sm:$0xff] %v4561_v2  ;;  %v509_v2 = vunpack.c.h.b16 %v433_v12 }
 0x11f   : > { %5567 = vst [vmem:[#allocation241_spill] sm:$0xff] %v4564_v63  ;;  %v2503_v63 = vld [vmem:[%s3789_s20 + $0x40] sm:$0xf]  ;;  %v530_v17 = vpack.c.b16 %v506_v44, %v506_v44  ;;  %v531_v25 = vpack.c.b16 %v507_v10, %v507_v10 }
 0x120   : > { %5568 = vst [vmem:[#allocation242_spill] sm:$0xff] %v4567_v9  ;;  %v3137_v9 = vld [vmem:[%s3789_s20 + $0x5c] sm:$0xf0]  ;;  %v533_v37 = vpack.c.b16 %v509_v2, %v509_v2 }
 0x121   : > { %5569 = vst [vmem:[#allocation243_spill] sm:$0xff] %v4570_v61  ;;  %v532_v61 = vpack.c.b16 %v508_v51, %v508_v51  ;;  %v581_v14 = vsel %vm579_vm0, %v530_v17, 0  ;;  %v584_v12 = vsel %vm579_vm0, %v531_v25, 0  ;;  %v2471_v10 = vld [vmem:[%s3789_s20] sm:$0xf]  ;;  %v2504_v51 = vor.u32 %v3137_v9, %v2503_v63  ;;  %v393_v63 = vld [vmem:[#allocation5 + $0x8] sm:$0xff] }
 0x122   : > { %5570 = vst [vmem:[#allocation244_spill] sm:$0xff] %v4573_v28  ;;  %v3133_v28 = vld [vmem:[%s3789_s20 + $0x44] sm:$0xf]  ;;  %v590_v2 = vsel %vm579_vm0, %v533_v37, 0  ;;  %609 = vmatpush.bf16.msra.mxu0 %v581_v14  ;;  %658 = vmatpush.bf16.msra.mxu1 %v584_v12  ;;  %v2512_v25 = vor.u32 %v3138_v18, %v2511_v26  ;;  %v2481_v37 = vld [vmem:[%s3789_s20 + $0x28] sm:$0xf0]  ;;  %v2472_v14 = vor.u32 %v3129_v41, %v2471_v10  ;;  %v510_v12 = vunpack.c.l.b16 %v434_v57 }
 0x123   : > { %v587_v44 = vsel %vm579_vm0, %v532_v61, 0  ;;  %v2508_v33 = vor.u32 %v3133_v28, %v2505_v54  ;;  %v2473_v17 = vld [vmem:[%s3789_s20 + $0x20] sm:$0xf0]  ;;  %756 = vmatpush.bf16.msra.mxu3 %v590_v2  ;;  %v3130_v61 = vld [vmem:[%s3789_s20 + $0x24] sm:$0xf0]  ;;  %v511_v9 = vunpack.c.h.b16 %v434_v57  ;;  %v537_v2 = vpack.c.b16 %v513_v49, %v513_v49  ;;  %v394_v10 = vld [vmem:[#allocation5 + $0x10] sm:$0xff] }
 0x124   : > { %707 = vmatpush.bf16.msra.mxu2 %v587_v44  ;;  %v2476_v28 = vor.u32 %v3125_v4, %v2473_v17  ;;  %v392_v54 = vld [vmem:[#allocation5] sm:$0xff]  ;;  %v536_v44 = vpack.c.b16 %v512_v5, %v512_v5  ;;  %v2480_v16 = vor.u32 %v3130_v61, %v2479_v42  ;;  %v2484_v18 = vor.u32 %v3126_v40, %v2481_v37  ;;  %v3136_v40 = vld [vmem:[%s3789_s20 + $0x5c] sm:$0xf]  ;;  %v3139_v61 = vld [vmem:[%s3789_s20 + $0x6c] sm:$0xf0] }
 0x125   : > { %v534_v26 = vpack.c.b16 %v510_v12, %v510_v12  ;;  %v535_v60 = vpack.c.b16 %v511_v9, %v511_v9  ;;  %v4599_v43 = vpack.c.bf16 %v393_v63, %v392_v54  ;;  %v602_v41 = vsel %vm579_vm0, %v537_v2, 0  ;;  %v2529_v49 = vld [vmem:[%s3789_s20 + $0x78] sm:$0xf0]  ;;  %v3135_v37 = vld [vmem:[%s3789_s20 + $0x54] sm:$0xf]  ;;  %v397_v54 = vld [vmem:[#allocation5 + $0x28] sm:$0xff] }
 0x126   : > { %610 = vmatpush.bf16.msra.mxu0 %v2504_v51  ;;  %659 = vmatpush.bf16.msra.mxu1 %v2508_v33  ;;  %v599_v34 = vsel %vm579_vm0, %v536_v44, 0  ;;  %v3140_v33 = vld [vmem:[%s3789_s20 + $0x74] sm:$0xf0]  ;;  %v2532_v57 = vor.u32 %v3136_v40, %v2529_v49  ;;  %v2521_v12 = vld [vmem:[%s3789_s20 + $0x70] sm:$0xf0] }
 0x127   : > { %757 = vmatpush.bf16.msra.mxu3 %v2516_v6  ;;  %v593_v4 = vsel %vm579_vm0, %v534_v26, 0  ;;  %v596_v5 = vsel %vm579_vm0, %v535_v60, 0  ;;  %v2527_v6 = vld [vmem:[%s3789_s20 + $0x58] sm:$0xf]  ;;  %v2524_v9 = vor.u32 %v3135_v37, %v2521_v12  ;;  %v398_v44 = vld [vmem:[#allocation5 + $0x30] sm:$0xff]  ;;  %v405_v12 = vld [vmem:[#allocation5 + $0x68] sm:$0xff] }
 0x128   : > { %708 = vmatpush.bf16.msra.mxu2 %v2512_v25  ;;  %v2528_v42 = vor.u32 %v3140_v33, %v2527_v6  ;;  %v395_v51 = vld [vmem:[#allocation5 + $0x18] sm:$0xff]  ;;  %v2519_v25 = vld [vmem:[%s3789_s20 + $0x50] sm:$0xf]  ;;  %v3127_v40 = vld [vmem:[%s3789_s20 + $0x14] sm:$0xf] }
 0x129   : > { %v4617_v17 = vpack.c.bf16 %v395_v51, %v394_v10  ;;  %v399_v2 = vld [vmem:[#allocation5 + $0x38] sm:$0xff]  ;;  %v401_v10 = vld [vmem:[#allocation5 + $0x48] sm:$0xff] }
 0x12a   : > { %611 = vmatpush.bf16.msra.mxu0 %v2472_v14  ;;  %660 = vmatpush.bf16.msra.mxu1 %v2476_v28  ;;  %v2520_v14 = vor.u32 %v3139_v61, %v2519_v25  ;;  %v396_v28 = vld [vmem:[#allocation5 + $0x20] sm:$0xff]  ;;  %v3132_v26 = vld [vmem:[%s3789_s20 + $0x34] sm:$0xf0]  ;;  %v3128_v60 = vld [vmem:[%s3789_s20 + $0x1c] sm:$0xf] }
 0x12b   : > { %758 = vmatpush.bf16.msra.mxu3 %v2484_v18  ;;  %v4631_v63 = vpack.c.bf16 %v397_v54, %v396_v28  ;;  %v2495_v18 = vld [vmem:[%s3789_s20 + $0x18] sm:$0xf]  ;;  %v402_v25 = vld [vmem:[#allocation5 + $0x50] sm:$0xff] }
 0x12c   : > { %709 = vmatpush.bf16.msra.mxu2 %v2480_v16  ;;  %v4641_v16 = vpack.c.bf16 %v399_v2, %v398_v44  ;;  %v403_v61 = vld [vmem:[#allocation5 + $0x58] sm:$0xff]  ;;  %v406_v28 = vld [vmem:[#allocation5 + $0x70] sm:$0xff]  ;;  %v4700_v2 = vld [vmem:[%s3800_s9] sm:$0xff] }
 0x12d   : > { %2533 = vmatmul.msk.bf16.vlgmr.msra.gmra.mxu0 %vm554_vm1, %v4599_v43  ;;  %2541 = vmatmul.msk.bf16.vlgmr.msra.gmra.mxu1 %vm554_vm1, %v4599_v43  ;;  %v4669_v37 = vpack.c.bf16 %v403_v61, %v402_v25  ;;  %v407_v54 = vld [vmem:[#allocation5 + $0x78] sm:$0xff] }
 0x12e   : > { %2557 = vmatmul.msk.bf16.vlgmr.msra.gmra.mxu3 %vm554_vm1, %v4599_v43  ;;  %805 = vmatpush.bf16.msrb.mxu0 %v593_v4  ;;  %v2487_v4 = vld [vmem:[%s3789_s20 + $0x10] sm:$0xf]  ;;  %v4689_v44 = vpack.c.bf16 %v407_v54, %v406_v28 }
 0x12f   : > { %952 = vmatpush.bf16.msrb.mxu3 %v602_v41  ;;  %2549 = vmatmul.msk.bf16.vlgmr.msra.gmra.mxu2 %vm554_vm1, %v4599_v43  ;;  %v2497_v41 = vld [vmem:[%s3789_s20 + $0x38] sm:$0xf0] }
 0x130   : > { %903 = vmatpush.bf16.msrb.mxu2 %v599_v34  ;;  %854 = vmatpush.bf16.msrb.mxu1 %v596_v5  ;;  %v2496_v34 = vor.u32 %v3132_v26, %v2495_v18  ;;  %v3131_v5 = vld [vmem:[%s3789_s20 + $0x2c] sm:$0xf0]  ;;  %v2500_v6 = vor.u32 %v3128_v60, %v2497_v41  ;;  %v4703_v18 = vperm.slane %v4700_v2, 0  ;;  %v4706_v26 = vperm.slane %v4700_v2, 1 }
 0x131   : > { %v2488_v33 = vor.u32 %v3131_v5, %v2487_v4  ;;  %v4719_v5 = vperm.slane %v4700_v2, 2 }
 0x132   : > { %806 = vmatpush.bf16.msrb.mxu0 %v2520_v14  ;;  %v404_v14 = vld [vmem:[#allocation5 + $0x60] sm:$0xff] }
 0x133   : > { %953 = vmatpush.bf16.msrb.mxu3 %v2532_v57  ;;  %v400_v57 = vld [vmem:[#allocation5 + $0x40] sm:$0xff] }
 0x134   : > { %904 = vmatpush.bf16.msrb.mxu2 %v2528_v42  ;;  %855 = vmatpush.bf16.msrb.mxu1 %v2524_v9  ;;  %v2489_v42 = vld [vmem:[%s3789_s20 + $0x30] sm:$0xf0]  ;;  %v4659_v51 = vpack.c.bf16 %v401_v10, %v400_v57  ;;  %v4679_v9 = vpack.c.bf16 %v405_v12, %v404_v14 }
 0x135   : > { %v2492_v49 = vor.u32 %v3127_v40, %v2489_v42 }
 0x136   : > { %807 = vmatpush.bf16.msrb.mxu0 %v2488_v33 }
 0x137   : > { %954 = vmatpush.bf16.msrb.mxu3 %v2500_v6  ;;  %v4722_v6 = vperm.slane %v4700_v2, 3 }
 0x138   : > { %905 = vmatpush.bf16.msrb.mxu2 %v2496_v34  ;;  %856 = vmatpush.bf16.msrb.mxu1 %v2492_v49 }
 0x13d   : > { %2534 = vmatmul.msk.bf16.gmra.mxu0 %vm554_vm1, %v4617_v17  ;;  %2542 = vmatmul.msk.bf16.gmra.mxu1 %vm554_vm1, %v4617_v17 }
 0x13e   : > { %2558 = vmatmul.msk.bf16.gmra.mxu3 %vm554_vm1, %v4617_v17 }
 0x13f   : > { %2550 = vmatmul.msk.bf16.gmra.mxu2 %vm554_vm1, %v4617_v17 }
 0x14d   : > { %2535 = vmatmul.msk.bf16.gmra.mxu0 %vm554_vm1, %v4631_v63  ;;  %2543 = vmatmul.msk.bf16.gmra.mxu1 %vm554_vm1, %v4631_v63 }
 0x14e   : > { %2559 = vmatmul.msk.bf16.gmra.mxu3 %vm554_vm1, %v4631_v63 }
 0x14f   : > { %2551 = vmatmul.msk.bf16.gmra.mxu2 %vm554_vm1, %v4631_v63 }
 0x15d   : > { %2536 = vmatmul.msk.bf16.gmra.mxu0 %vm554_vm1, %v4641_v16  ;;  %2544 = vmatmul.msk.bf16.gmra.mxu1 %vm554_vm1, %v4641_v16 }
 0x15e   : > { %2560 = vmatmul.msk.bf16.gmra.mxu3 %vm554_vm1, %v4641_v16 }
 0x15f   : > { %2552 = vmatmul.msk.bf16.gmra.mxu2 %vm554_vm1, %v4641_v16 }
 0x16d   : > { %2537 = vmatmul.msk.bf16.gmra.mxu0 %vm554_vm1, %v4659_v51  ;;  %2545 = vmatmul.msk.bf16.gmra.mxu1 %vm554_vm1, %v4659_v51 }
 0x16e   : > { %2561 = vmatmul.msk.bf16.gmra.mxu3 %vm554_vm1, %v4659_v51 }
 0x16f   : > { %2553 = vmatmul.msk.bf16.gmra.mxu2 %vm554_vm1, %v4659_v51 }
 0x17d   : > { %2538 = vmatmul.msk.bf16.gmra.mxu0 %vm554_vm1, %v4669_v37  ;;  %2546 = vmatmul.msk.bf16.gmra.mxu1 %vm554_vm1, %v4669_v37 }
 0x17e   : > { %2562 = vmatmul.msk.bf16.gmra.mxu3 %vm554_vm1, %v4669_v37 }
 0x17f   : > { %2554 = vmatmul.msk.bf16.gmra.mxu2 %vm554_vm1, %v4669_v37 }
 0x18d   : > { %2539 = vmatmul.msk.bf16.gmra.mxu0 %vm554_vm1, %v4679_v9  ;;  %2547 = vmatmul.msk.bf16.gmra.mxu1 %vm554_vm1, %v4679_v9 }
 0x18e   : > { %2563 = vmatmul.msk.bf16.gmra.mxu3 %vm554_vm1, %v4679_v9 }
 0x18f   : > { %2555 = vmatmul.msk.bf16.gmra.mxu2 %vm554_vm1, %v4679_v9 }
 0x19d   : > { %2540 = vmatmul.msk.bf16.gmra.mxu0 %vm554_vm1, %v4689_v44  ;;  %2548 = vmatmul.msk.bf16.gmra.mxu1 %vm554_vm1, %v4689_v44 }
 0x19e   : > { %2564 = vmatmul.msk.bf16.gmra.mxu3 %vm554_vm1, %v4689_v44 }
 0x19f   : > { %2556 = vmatmul.msk.bf16.gmra.mxu2 %vm554_vm1, %v4689_v44 }
 0x1aa   : > { %v613_v60 = vpop.f32.mrf.mxu0  ;;  %v662_v34 = vpop.f32.mrf.mxu1 }
 0x1ab   : > { %v614_v41 = vadd.f32 %v613_v60, %v4703_v18  ;;  %v663_v4 = vadd.f32 %v662_v34, %v4706_v26 }
 0x1ad   : > { %996 = vst [vmem:[#allocation2] sm:$0xff] %v614_v41  ;;  %2565 = vmatmul.msk.bf16.vlgmr.msrb.gmra.mxu0 %vm554_vm1, %v4599_v43  ;;  %2573 = vmatmul.msk.bf16.vlgmr.msrb.gmra.mxu1 %vm554_vm1, %v4599_v43 }
 0x1ae   : > { %997 = vst [vmem:[#allocation2 + $0x8] sm:$0xff] %v663_v4  ;;  %2589 = vmatmul.msk.bf16.vlgmr.msrb.gmra.mxu3 %vm554_vm1, %v4599_v43 }
 0x1af   : > { %2581 = vmatmul.msk.bf16.vlgmr.msrb.gmra.mxu2 %vm554_vm1, %v4599_v43 }
 0x1b1   : > { %v760_v40 = vpop.f32.mrf.mxu3 }
 0x1b2   : > { %v711_v33 = vpop.f32.mrf.mxu2  ;;  %v761_v49 = vadd.f32 %v760_v40, %v4722_v6  ;;  %v615_v57 = vpop.f32.mrf.mxu0 }
 0x1b3   : > { %v712_v42 = vadd.f32 %v711_v33, %v4719_v5  ;;  %v664_v10 = vpop.f32.mrf.mxu1  ;;  %v616_v25 = vadd.f32 %v615_v57, %v4703_v18 }
 0x1b4   : > { %v665_v61 = vadd.f32 %v664_v10, %v4706_v26  ;;  %999 = vst [vmem:[#allocation2 + $0x18] sm:$0xff] %v761_v49 }
 0x1b5   : > { %998 = vst [vmem:[#allocation2 + $0x10] sm:$0xff] %v712_v42 }
 0x1b6   : > { %1004 = vst [vmem:[#allocation2 + $0x40] sm:$0xff] %v616_v25 }
 0x1b7   : > { %1005 = vst [vmem:[#allocation2 + $0x48] sm:$0xff] %v665_v61 }
 0x1b9   : > { %v762_v14 = vpop.f32.mrf.mxu3 }
 0x1ba   : > { %v713_v43 = vpop.f32.mrf.mxu2  ;;  %v763_v28 = vadd.f32 %v762_v14, %v4722_v6  ;;  %v618_v54 = vpop.f32.mrf.mxu0 }
 0x1bb   : > { %v714_v12 = vadd.f32 %v713_v43, %v4719_v5  ;;  %v667_v60 = vpop.f32.mrf.mxu1  ;;  %v619_v34 = vadd.f32 %v618_v54, %v4703_v18 }
 0x1bc   : > { %v668_v41 = vadd.f32 %v667_v60, %v4706_v26  ;;  %1007 = vst [vmem:[#allocation2 + $0x58] sm:$0xff] %v763_v28 }
 0x1bd   : > { %1006 = vst [vmem:[#allocation2 + $0x50] sm:$0xff] %v714_v12  ;;  %2566 = vmatmul.msk.bf16.gmra.mxu0 %vm554_vm1, %v4617_v17  ;;  %2574 = vmatmul.msk.bf16.gmra.mxu1 %vm554_vm1, %v4617_v17 }
 0x1be   : > { %1012 = vst [vmem:[#allocation2 + $0x80] sm:$0xff] %v619_v34  ;;  %2590 = vmatmul.msk.bf16.gmra.mxu3 %vm554_vm1, %v4617_v17 }
 0x1bf   : > { %2582 = vmatmul.msk.bf16.gmra.mxu2 %vm554_vm1, %v4617_v17  ;;  %1013 = vst [vmem:[#allocation2 + $0x88] sm:$0xff] %v668_v41 }
 0x1c1   : > { %v765_v33 = vpop.f32.mrf.mxu3 }
 0x1c2   : > { %v716_v4 = vpop.f32.mrf.mxu2  ;;  %v766_v42 = vadd.f32 %v765_v33, %v4722_v6  ;;  %v620_v49 = vpop.f32.mrf.mxu0 }
 0x1c3   : > { %v717_v40 = vadd.f32 %v716_v4, %v4719_v5  ;;  %v669_v57 = vpop.f32.mrf.mxu1  ;;  %v621_v10 = vadd.f32 %v620_v49, %v4703_v18 }
 0x1c4   : > { %v670_v25 = vadd.f32 %v669_v57, %v4706_v26  ;;  %1015 = vst [vmem:[#allocation2 + $0x98] sm:$0xff] %v766_v42 }
 0x1c5   : > { %1014 = vst [vmem:[#allocation2 + $0x90] sm:$0xff] %v717_v40 }
 0x1c6   : > { %1020 = vst [vmem:[#allocation2 + $0xc0] sm:$0xff] %v621_v10 }
 0x1c7   : > { %1021 = vst [vmem:[#allocation2 + $0xc8] sm:$0xff] %v670_v25 }
 0x1c9   : > { %v767_v43 = vpop.f32.mrf.mxu3 }
 0x1ca   : > { %v718_v61 = vpop.f32.mrf.mxu2  ;;  %v768_v14 = vadd.f32 %v767_v43, %v4722_v6  ;;  %v623_v12 = vpop.f32.mrf.mxu0 }
 0x1cb   : > { %v719_v17 = vadd.f32 %v718_v61, %v4719_v5  ;;  %v672_v28 = vpop.f32.mrf.mxu1  ;;  %v624_v54 = vadd.f32 %v623_v12, %v4703_v18 }
 0x1cc   : > { %v673_v60 = vadd.f32 %v672_v28, %v4706_v26  ;;  %1023 = vst [vmem:[#allocation2 + $0xd8] sm:$0xff] %v768_v14 }
 0x1cd   : > { %1022 = vst [vmem:[#allocation2 + $0xd0] sm:$0xff] %v719_v17  ;;  %2567 = vmatmul.msk.bf16.gmra.mxu0 %vm554_vm1, %v4631_v63  ;;  %2575 = vmatmul.msk.bf16.gmra.mxu1 %vm554_vm1, %v4631_v63 }
 0x1ce   : > { %1028 = vst [vmem:[#allocation2 + $0x100] sm:$0xff] %v624_v54  ;;  %2591 = vmatmul.msk.bf16.gmra.mxu3 %vm554_vm1, %v4631_v63 }
 0x1cf   : > { %2583 = vmatmul.msk.bf16.gmra.mxu2 %vm554_vm1, %v4631_v63  ;;  %1029 = vst [vmem:[#allocation2 + $0x108] sm:$0xff] %v673_v60 }
 0x1d1   : > { %v770_v41 = vpop.f32.mrf.mxu3 }
 0x1d2   : > { %v721_v34 = vpop.f32.mrf.mxu2  ;;  %v771_v33 = vadd.f32 %v770_v41, %v4722_v6  ;;  %v625_v40 = vpop.f32.mrf.mxu0 }
 0x1d3   : > { %v722_v4 = vadd.f32 %v721_v34, %v4719_v5  ;;  %v674_v42 = vpop.f32.mrf.mxu1  ;;  %v626_v49 = vadd.f32 %v625_v40, %v4703_v18 }
 0x1d4   : > { %v675_v57 = vadd.f32 %v674_v42, %v4706_v26  ;;  %1031 = vst [vmem:[#allocation2 + $0x118] sm:$0xff] %v771_v33 }
 0x1d5   : > { %1030 = vst [vmem:[#allocation2 + $0x110] sm:$0xff] %v722_v4 }
 0x1d6   : > { %1036 = vst [vmem:[#allocation2 + $0x140] sm:$0xff] %v626_v49 }
 0x1d7   : > { %1037 = vst [vmem:[#allocation2 + $0x148] sm:$0xff] %v675_v57 }
 0x1d9   : > { %v772_v25 = vpop.f32.mrf.mxu3 }
 0x1da   : > { %v723_v10 = vpop.f32.mrf.mxu2  ;;  %v773_v61 = vadd.f32 %v772_v25, %v4722_v6  ;;  %v628_v43 = vpop.f32.mrf.mxu0 }
 0x1db   : > { %v724_v63 = vadd.f32 %v723_v10, %v4719_v5  ;;  %v677_v17 = vpop.f32.mrf.mxu1  ;;  %v629_v14 = vadd.f32 %v628_v43, %v4703_v18 }
 0x1dc   : > { %v678_v12 = vadd.f32 %v677_v17, %v4706_v26  ;;  %1039 = vst [vmem:[#allocation2 + $0x158] sm:$0xff] %v773_v61 }
 0x1dd   : > { %1038 = vst [vmem:[#allocation2 + $0x150] sm:$0xff] %v724_v63  ;;  %2568 = vmatmul.msk.bf16.gmra.mxu0 %vm554_vm1, %v4641_v16  ;;  %2576 = vmatmul.msk.bf16.gmra.mxu1 %vm554_vm1, %v4641_v16 }
 0x1de   : > { %1044 = vst [vmem:[#allocation2 + $0x180] sm:$0xff] %v629_v14  ;;  %2592 = vmatmul.msk.bf16.gmra.mxu3 %vm554_vm1, %v4641_v16 }
 0x1df   : > { %2584 = vmatmul.msk.bf16.gmra.mxu2 %vm554_vm1, %v4641_v16  ;;  %1045 = vst [vmem:[#allocation2 + $0x188] sm:$0xff] %v678_v12 }
 0x1e1   : > { %v775_v54 = vpop.f32.mrf.mxu3 }
 0x1e2   : > { %v726_v28 = vpop.f32.mrf.mxu2  ;;  %v776_v34 = vadd.f32 %v775_v54, %v4722_v6  ;;  %v630_v41 = vpop.f32.mrf.mxu0 }
 0x1e3   : > { %v727_v60 = vadd.f32 %v726_v28, %v4719_v5  ;;  %v679_v4 = vpop.f32.mrf.mxu1  ;;  %v631_v33 = vadd.f32 %v630_v41, %v4703_v18 }
 0x1e4   : > { %v680_v40 = vadd.f32 %v679_v4, %v4706_v26  ;;  %1047 = vst [vmem:[#allocation2 + $0x198] sm:$0xff] %v776_v34 }
 0x1e5   : > { %1046 = vst [vmem:[#allocation2 + $0x190] sm:$0xff] %v727_v60 }
 0x1e6   : > { %1052 = vst [vmem:[#allocation2 + $0x1c0] sm:$0xff] %v631_v33 }
 0x1e7   : > { %1053 = vst [vmem:[#allocation2 + $0x1c8] sm:$0xff] %v680_v40 }
 0x1e9   : > { %v777_v49 = vpop.f32.mrf.mxu3 }
 0x1ea   : > { %v728_v42 = vpop.f32.mrf.mxu2  ;;  %v778_v57 = vadd.f32 %v777_v49, %v4722_v6  ;;  %v633_v10 = vpop.f32.mrf.mxu0 }
 0x1eb   : > { %v729_v16 = vadd.f32 %v728_v42, %v4719_v5  ;;  %v682_v25 = vpop.f32.mrf.mxu1  ;;  %v634_v63 = vadd.f32 %v633_v10, %v4703_v18 }
 0x1ec   : > { %v683_v61 = vadd.f32 %v682_v25, %v4706_v26  ;;  %1055 = vst [vmem:[#allocation2 + $0x1d8] sm:$0xff] %v778_v57 }
 0x1ed   : > { %1054 = vst [vmem:[#allocation2 + $0x1d0] sm:$0xff] %v729_v16  ;;  %2569 = vmatmul.msk.bf16.gmra.mxu0 %vm554_vm1, %v4659_v51  ;;  %2577 = vmatmul.msk.bf16.gmra.mxu1 %vm554_vm1, %v4659_v51 }
 0x1ee   : > { %1060 = vst [vmem:[#allocation2 + $0x200] sm:$0xff] %v634_v63  ;;  %2593 = vmatmul.msk.bf16.gmra.mxu3 %vm554_vm1, %v4659_v51 }
 0x1ef   : > { %2585 = vmatmul.msk.bf16.gmra.mxu2 %vm554_vm1, %v4659_v51  ;;  %1061 = vst [vmem:[#allocation2 + $0x208] sm:$0xff] %v683_v61 }
 0x1f1   : > { %v780_v17 = vpop.f32.mrf.mxu3 }
 0x1f2   : > { %v731_v43 = vpop.f32.mrf.mxu2  ;;  %v781_v12 = vadd.f32 %v780_v17, %v4722_v6  ;;  %v635_v28 = vpop.f32.mrf.mxu0 }
 0x1f3   : > { %v732_v14 = vadd.f32 %v731_v43, %v4719_v5  ;;  %v684_v54 = vpop.f32.mrf.mxu1  ;;  %v636_v60 = vadd.f32 %v635_v28, %v4703_v18 }
 0x1f4   : > { %v685_v34 = vadd.f32 %v684_v54, %v4706_v26  ;;  %1063 = vst [vmem:[#allocation2 + $0x218] sm:$0xff] %v781_v12 }
 0x1f5   : > { %1062 = vst [vmem:[#allocation2 + $0x210] sm:$0xff] %v732_v14 }
 0x1f6   : > { %1068 = vst [vmem:[#allocation2 + $0x240] sm:$0xff] %v636_v60 }
 0x1f7   : > { %1069 = vst [vmem:[#allocation2 + $0x248] sm:$0xff] %v685_v34 }
 0x1f9   : > { %v782_v4 = vpop.f32.mrf.mxu3 }
 0x1fa   : > { %v733_v41 = vpop.f32.mrf.mxu2  ;;  %v783_v33 = vadd.f32 %v782_v4, %v4722_v6  ;;  %v638_v40 = vpop.f32.mrf.mxu0 }
 0x1fb   : > { %v734_v51 = vadd.f32 %v733_v41, %v4719_v5  ;;  %v687_v42 = vpop.f32.mrf.mxu1  ;;  %v639_v49 = vadd.f32 %v638_v40, %v4703_v18 }
 0x1fc   : > { %v688_v16 = vadd.f32 %v687_v42, %v4706_v26  ;;  %1071 = vst [vmem:[#allocation2 + $0x258] sm:$0xff] %v783_v33 }
 0x1fd   : > { %1070 = vst [vmem:[#allocation2 + $0x250] sm:$0xff] %v734_v51  ;;  %2570 = vmatmul.msk.bf16.gmra.mxu0 %vm554_vm1, %v4669_v37  ;;  %2578 = vmatmul.msk.bf16.gmra.mxu1 %vm554_vm1, %v4669_v37 }
 0x1fe   : > { %1076 = vst [vmem:[#allocation2 + $0x280] sm:$0xff] %v639_v49  ;;  %2594 = vmatmul.msk.bf16.gmra.mxu3 %vm554_vm1, %v4669_v37 }
 0x1ff   : > { %2586 = vmatmul.msk.bf16.gmra.mxu2 %vm554_vm1, %v4669_v37  ;;  %1077 = vst [vmem:[#allocation2 + $0x288] sm:$0xff] %v688_v16 }
 0x201   : > { %v785_v10 = vpop.f32.mrf.mxu3 }
 0x202   : > { %v736_v57 = vpop.f32.mrf.mxu2  ;;  %v786_v63 = vadd.f32 %v785_v10, %v4722_v6  ;;  %v640_v61 = vpop.f32.mrf.mxu0 }
 0x203   : > { %v737_v25 = vadd.f32 %v736_v57, %v4719_v5  ;;  %v689_v43 = vpop.f32.mrf.mxu1  ;;  %v641_v17 = vadd.f32 %v640_v61, %v4703_v18 }
 0x204   : > { %v690_v14 = vadd.f32 %v689_v43, %v4706_v26  ;;  %1079 = vst [vmem:[#allocation2 + $0x298] sm:$0xff] %v786_v63 }
 0x205   : > { %1078 = vst [vmem:[#allocation2 + $0x290] sm:$0xff] %v737_v25 }
 0x206   : > { %1084 = vst [vmem:[#allocation2 + $0x2c0] sm:$0xff] %v641_v17 }
 0x207   : > { %1085 = vst [vmem:[#allocation2 + $0x2c8] sm:$0xff] %v690_v14 }
 0x209   : > { %v787_v28 = vpop.f32.mrf.mxu3 }
 0x20a   : > { %v738_v12 = vpop.f32.mrf.mxu2  ;;  %v788_v54 = vadd.f32 %v787_v28, %v4722_v6  ;;  %v643_v60 = vpop.f32.mrf.mxu0 }
 0x20b   : > { %v739_v37 = vadd.f32 %v738_v12, %v4719_v5  ;;  %v692_v34 = vpop.f32.mrf.mxu1  ;;  %v644_v41 = vadd.f32 %v643_v60, %v4703_v18 }
 0x20c   : > { %v693_v4 = vadd.f32 %v692_v34, %v4706_v26  ;;  %1087 = vst [vmem:[#allocation2 + $0x2d8] sm:$0xff] %v788_v54 }
 0x20d   : > { %1086 = vst [vmem:[#allocation2 + $0x2d0] sm:$0xff] %v739_v37  ;;  %2571 = vmatmul.msk.bf16.gmra.mxu0 %vm554_vm1, %v4679_v9  ;;  %2579 = vmatmul.msk.bf16.gmra.mxu1 %vm554_vm1, %v4679_v9 }
 0x20e   : > { %1092 = vst [vmem:[#allocation2 + $0x300] sm:$0xff] %v644_v41  ;;  %2595 = vmatmul.msk.bf16.gmra.mxu3 %vm554_vm1, %v4679_v9 }
 0x20f   : > { %2587 = vmatmul.msk.bf16.gmra.mxu2 %vm554_vm1, %v4679_v9  ;;  %1093 = vst [vmem:[#allocation2 + $0x308] sm:$0xff] %v693_v4 }
 0x211   : > { %v790_v33 = vpop.f32.mrf.mxu3 }
 0x212   : > { %v741_v51 = vpop.f32.mrf.mxu2  ;;  %v791_v42 = vadd.f32 %v790_v33, %v4722_v6  ;;  %v645_v49 = vpop.f32.mrf.mxu0  ;;  %v4841_v33 = vperm.slane %v4700_v2, 4 }
 0x213   : > { %v742_v40 = vadd.f32 %v741_v51, %v4719_v5  ;;  %v694_v16 = vpop.f32.mrf.mxu1  ;;  %v646_v57 = vadd.f32 %v645_v49, %v4703_v18 }
 0x214   : > { %v695_v10 = vadd.f32 %v694_v16, %v4706_v26  ;;  %1095 = vst [vmem:[#allocation2 + $0x318] sm:$0xff] %v791_v42 }
 0x215   : > { %1094 = vst [vmem:[#allocation2 + $0x310] sm:$0xff] %v742_v40 }
 0x216   : > { %1100 = vst [vmem:[#allocation2 + $0x340] sm:$0xff] %v646_v57 }
 0x217   : > { %1101 = vst [vmem:[#allocation2 + $0x348] sm:$0xff] %v695_v10 }
 0x219   : > { %v792_v63 = vpop.f32.mrf.mxu3 }
 0x21a   : > { %v743_v25 = vpop.f32.mrf.mxu2  ;;  %v793_v61 = vadd.f32 %v792_v63, %v4722_v6  ;;  %v648_v43 = vpop.f32.mrf.mxu0  ;;  %v4854_v63 = vperm.slane %v4700_v2, 7 }
 0x21b   : > { %v744_v9 = vadd.f32 %v743_v25, %v4719_v5  ;;  %v697_v17 = vpop.f32.mrf.mxu1  ;;  %v649_v14 = vadd.f32 %v648_v43, %v4703_v18  ;;  %v4851_v25 = vperm.slane %v4700_v2, 6 }
 0x21c   : > { %v698_v12 = vadd.f32 %v697_v17, %v4706_v26  ;;  %1103 = vst [vmem:[#allocation2 + $0x358] sm:$0xff] %v793_v61 }
 0x21d   : > { %1102 = vst [vmem:[#allocation2 + $0x350] sm:$0xff] %v744_v9  ;;  %2572 = vmatmul.msk.bf16.gmra.mxu0 %vm554_vm1, %v4689_v44  ;;  %2580 = vmatmul.msk.bf16.gmra.mxu1 %vm554_vm1, %v4689_v44 }
 0x21e   : > { %1108 = vst [vmem:[#allocation2 + $0x380] sm:$0xff] %v649_v14  ;;  %2596 = vmatmul.msk.bf16.gmra.mxu3 %vm554_vm1, %v4689_v44 }
 0x21f   : > { %2588 = vmatmul.msk.bf16.gmra.mxu2 %vm554_vm1, %v4689_v44  ;;  %1109 = vst [vmem:[#allocation2 + $0x388] sm:$0xff] %v698_v12  ;;  %v4844_v44 = vperm.slane %v4700_v2, 5 }
 0x221   : > { %v795_v37 = vpop.f32.mrf.mxu3 }
 0x222   : > { %v746_v28 = vpop.f32.mrf.mxu2  ;;  %v796_v60 = vadd.f32 %v795_v37, %v4722_v6  ;;  %v650_v34 = vpop.f32.mrf.mxu0 }
 0x223   : > { %v747_v54 = vadd.f32 %v746_v28, %v4719_v5  ;;  %v699_v41 = vpop.f32.mrf.mxu1  ;;  %v651_v4 = vadd.f32 %v650_v34, %v4703_v18 }
 0x224   : > { %v700_v51 = vadd.f32 %v699_v41, %v4706_v26  ;;  %1111 = vst [vmem:[#allocation2 + $0x398] sm:$0xff] %v796_v60 }
 0x225   : > { %1110 = vst [vmem:[#allocation2 + $0x390] sm:$0xff] %v747_v54 }
 0x226   : > { %1116 = vst [vmem:[#allocation2 + $0x3c0] sm:$0xff] %v651_v4 }
 0x227   : > { %1117 = vst [vmem:[#allocation2 + $0x3c8] sm:$0xff] %v700_v51 }
 0x229   : > { %v797_v42 = vpop.f32.mrf.mxu3 }
 0x22a   : > { %v748_v40 = vpop.f32.mrf.mxu2  ;;  %v798_v16 = vadd.f32 %v797_v42, %v4722_v6  ;;  %v809_v57 = vpop.f32.mrf.mxu0 }
 0x22b   : > { %v749_v49 = vadd.f32 %v748_v40, %v4719_v5  ;;  %v858_v18 = vpop.f32.mrf.mxu1  ;;  %v810_v26 = vadd.f32 %v809_v57, %v4841_v33 }
 0x22c   : > { %v859_v10 = vadd.f32 %v858_v18, %v4844_v44  ;;  %1119 = vst [vmem:[#allocation2 + $0x3d8] sm:$0xff] %v798_v16 }
 0x22d   : > { %1118 = vst [vmem:[#allocation2 + $0x3d0] sm:$0xff] %v749_v49 }
 0x22e   : > { %1000 = vst [vmem:[#allocation2 + $0x20] sm:$0xff] %v810_v26 }
 0x22f   : > { %1001 = vst [vmem:[#allocation2 + $0x28] sm:$0xff] %v859_v10 }
 0x231   : > { %v956_v5 = vpop.f32.mrf.mxu3 }
 0x232   : > { %v907_v9 = vpop.f32.mrf.mxu2  ;;  %v957_v61 = vadd.f32 %v956_v5, %v4854_v63  ;;  %v811_v43 = vpop.f32.mrf.mxu0 }
 0x233   : > { %v908_v6 = vadd.f32 %v907_v9, %v4851_v25  ;;  %v860_v17 = vpop.f32.mrf.mxu1  ;;  %v812_v14 = vadd.f32 %v811_v43, %v4841_v33 }
 0x234   : > { %v861_v12 = vadd.f32 %v860_v17, %v4844_v44  ;;  %1003 = vst [vmem:[#allocation2 + $0x38] sm:$0xff] %v957_v61 }
 0x235   : > { %1002 = vst [vmem:[#allocation2 + $0x30] sm:$0xff] %v908_v6 }
 0x236   : > { %1008 = vst [vmem:[#allocation2 + $0x60] sm:$0xff] %v812_v14 }
 0x237   : > { %1009 = vst [vmem:[#allocation2 + $0x68] sm:$0xff] %v861_v12 }
 0x239   : > { %v958_v2 = vpop.f32.mrf.mxu3 }
 0x23a   : > { %v909_v28 = vpop.f32.mrf.mxu2  ;;  %v959_v54 = vadd.f32 %v958_v2, %v4854_v63  ;;  %v814_v60 = vpop.f32.mrf.mxu0 }
 0x23b   : > { %v910_v37 = vadd.f32 %v909_v28, %v4851_v25  ;;  %v863_v34 = vpop.f32.mrf.mxu1  ;;  %v815_v41 = vadd.f32 %v814_v60, %v4841_v33 }
 0x23c   : > { %v864_v4 = vadd.f32 %v863_v34, %v4844_v44  ;;  %1011 = vst [vmem:[#allocation2 + $0x78] sm:$0xff] %v959_v54 }
 0x23d   : > { %1010 = vst [vmem:[#allocation2 + $0x70] sm:$0xff] %v910_v37 }
 0x23e   : > { %1016 = vst [vmem:[#allocation2 + $0xa0] sm:$0xff] %v815_v41 }
 0x23f   : > { %1017 = vst [vmem:[#allocation2 + $0xa8] sm:$0xff] %v864_v4 }
 0x241   : > { %v961_v40 = vpop.f32.mrf.mxu3 }
 0x242   : > { %v912_v51 = vpop.f32.mrf.mxu2  ;;  %v962_v49 = vadd.f32 %v961_v40, %v4854_v63  ;;  %v816_v16 = vpop.f32.mrf.mxu0 }
 0x243   : > { %v913_v42 = vadd.f32 %v912_v51, %v4851_v25  ;;  %v865_v57 = vpop.f32.mrf.mxu1  ;;  %v817_v18 = vadd.f32 %v816_v16, %v4841_v33 }
 0x244   : > { %v866_v26 = vadd.f32 %v865_v57, %v4844_v44  ;;  %1019 = vst [vmem:[#allocation2 + $0xb8] sm:$0xff] %v962_v49 }
 0x245   : > { %1018 = vst [vmem:[#allocation2 + $0xb0] sm:$0xff] %v913_v42 }
 0x246   : > { %1024 = vst [vmem:[#allocation2 + $0xe0] sm:$0xff] %v817_v18 }
 0x247   : > { %1025 = vst [vmem:[#allocation2 + $0xe8] sm:$0xff] %v866_v26 }
 0x249   : > { %v963_v9 = vpop.f32.mrf.mxu3 }
 0x24a   : > { %v914_v10 = vpop.f32.mrf.mxu2  ;;  %v964_v6 = vadd.f32 %v963_v9, %v4854_v63  ;;  %v819_v61 = vpop.f32.mrf.mxu0 }
 0x24b   : > { %v915_v5 = vadd.f32 %v914_v10, %v4851_v25  ;;  %v868_v43 = vpop.f32.mrf.mxu1  ;;  %v820_v17 = vadd.f32 %v819_v61, %v4841_v33 }
 0x24c   : > { %v869_v14 = vadd.f32 %v868_v43, %v4844_v44  ;;  %1027 = vst [vmem:[#allocation2 + $0xf8] sm:$0xff] %v964_v6 }
 0x24d   : > { %1026 = vst [vmem:[#allocation2 + $0xf0] sm:$0xff] %v915_v5 }
 0x24e   : > { %1032 = vst [vmem:[#allocation2 + $0x120] sm:$0xff] %v820_v17 }
 0x24f   : > { %1033 = vst [vmem:[#allocation2 + $0x128] sm:$0xff] %v869_v14 }
 0x251   : > { %v966_v28 = vpop.f32.mrf.mxu3 }
 0x252   : > { %v917_v12 = vpop.f32.mrf.mxu2  ;;  %v967_v37 = vadd.f32 %v966_v28, %v4854_v63  ;;  %v821_v54 = vpop.f32.mrf.mxu0 }
 0x253   : > { %v918_v2 = vadd.f32 %v917_v12, %v4851_v25  ;;  %v870_v60 = vpop.f32.mrf.mxu1  ;;  %v822_v34 = vadd.f32 %v821_v54, %v4841_v33 }
 0x254   : > { %v871_v41 = vadd.f32 %v870_v60, %v4844_v44  ;;  %1035 = vst [vmem:[#allocation2 + $0x138] sm:$0xff] %v967_v37 }
 0x255   : > { %1034 = vst [vmem:[#allocation2 + $0x130] sm:$0xff] %v918_v2 }
 0x256   : > { %1040 = vst [vmem:[#allocation2 + $0x160] sm:$0xff] %v822_v34 }
 0x257   : > { %1041 = vst [vmem:[#allocation2 + $0x168] sm:$0xff] %v871_v41 }
 0x259   : > { %v968_v51 = vpop.f32.mrf.mxu3 }
 0x25a   : > { %v919_v4 = vpop.f32.mrf.mxu2  ;;  %v969_v42 = vadd.f32 %v968_v51, %v4854_v63  ;;  %v824_v49 = vpop.f32.mrf.mxu0 }
 0x25b   : > { %v920_v40 = vadd.f32 %v919_v4, %v4851_v25  ;;  %v873_v16 = vpop.f32.mrf.mxu1  ;;  %v825_v57 = vadd.f32 %v824_v49, %v4841_v33 }
 0x25c   : > { %v874_v18 = vadd.f32 %v873_v16, %v4844_v44  ;;  %1043 = vst [vmem:[#allocation2 + $0x178] sm:$0xff] %v969_v42 }
 0x25d   : > { %1042 = vst [vmem:[#allocation2 + $0x170] sm:$0xff] %v920_v40 }
 0x25e   : > { %1048 = vst [vmem:[#allocation2 + $0x1a0] sm:$0xff] %v825_v57 }
 0x25f   : > { %1049 = vst [vmem:[#allocation2 + $0x1a8] sm:$0xff] %v874_v18 }
 0x261   : > { %v971_v10 = vpop.f32.mrf.mxu3 }
 0x262   : > { %v922_v26 = vpop.f32.mrf.mxu2  ;;  %v972_v5 = vadd.f32 %v971_v10, %v4854_v63  ;;  %v826_v6 = vpop.f32.mrf.mxu0 }
 0x263   : > { %v923_v9 = vadd.f32 %v922_v26, %v4851_v25  ;;  %v875_v61 = vpop.f32.mrf.mxu1  ;;  %v827_v43 = vadd.f32 %v826_v6, %v4841_v33 }
 0x264   : > { %v876_v17 = vadd.f32 %v875_v61, %v4844_v44  ;;  %1051 = vst [vmem:[#allocation2 + $0x1b8] sm:$0xff] %v972_v5 }
 0x265   : > { %1050 = vst [vmem:[#allocation2 + $0x1b0] sm:$0xff] %v923_v9 }
 0x266   : > { %1056 = vst [vmem:[#allocation2 + $0x1e0] sm:$0xff] %v827_v43 }
 0x267   : > { %1057 = vst [vmem:[#allocation2 + $0x1e8] sm:$0xff] %v876_v17 }
 0x269   : > { %v973_v12 = vpop.f32.mrf.mxu3 }
 0x26a   : > { %v924_v14 = vpop.f32.mrf.mxu2  ;;  %v974_v2 = vadd.f32 %v973_v12, %v4854_v63  ;;  %v829_v37 = vpop.f32.mrf.mxu0 }
 0x26b   : > { %v925_v28 = vadd.f32 %v924_v14, %v4851_v25  ;;  %v878_v54 = vpop.f32.mrf.mxu1  ;;  %v830_v60 = vadd.f32 %v829_v37, %v4841_v33 }
 0x26c   : > { %v879_v34 = vadd.f32 %v878_v54, %v4844_v44  ;;  %1059 = vst [vmem:[#allocation2 + $0x1f8] sm:$0xff] %v974_v2 }
 0x26d   : > { %1058 = vst [vmem:[#allocation2 + $0x1f0] sm:$0xff] %v925_v28 }
 0x26e   : > { %1064 = vst [vmem:[#allocation2 + $0x220] sm:$0xff] %v830_v60 }
 0x26f   : > { %1065 = vst [vmem:[#allocation2 + $0x228] sm:$0xff] %v879_v34 }
 0x271   : > { %v976_v4 = vpop.f32.mrf.mxu3 }
 0x272   : > { %v927_v41 = vpop.f32.mrf.mxu2  ;;  %v977_v40 = vadd.f32 %v976_v4, %v4854_v63  ;;  %v831_v42 = vpop.f32.mrf.mxu0 }
 0x273   : > { %v928_v51 = vadd.f32 %v927_v41, %v4851_v25  ;;  %v880_v49 = vpop.f32.mrf.mxu1  ;;  %v832_v16 = vadd.f32 %v831_v42, %v4841_v33 }
 0x274   : > { %v881_v57 = vadd.f32 %v880_v49, %v4844_v44  ;;  %1067 = vst [vmem:[#allocation2 + $0x238] sm:$0xff] %v977_v40 }
 0x275   : > { %1066 = vst [vmem:[#allocation2 + $0x230] sm:$0xff] %v928_v51 }
 0x276   : > { %1072 = vst [vmem:[#allocation2 + $0x260] sm:$0xff] %v832_v16 }
 0x277   : > { %1073 = vst [vmem:[#allocation2 + $0x268] sm:$0xff] %v881_v57 }
 0x279   : > { %v978_v26 = vpop.f32.mrf.mxu3 }
 0x27a   : > { %v929_v18 = vpop.f32.mrf.mxu2  ;;  %v979_v9 = vadd.f32 %v978_v26, %v4854_v63  ;;  %v834_v5 = vpop.f32.mrf.mxu0 }
 0x27b   : > { %v930_v10 = vadd.f32 %v929_v18, %v4851_v25  ;;  %v883_v6 = vpop.f32.mrf.mxu1  ;;  %v835_v61 = vadd.f32 %v834_v5, %v4841_v33 }
 0x27c   : > { %v884_v43 = vadd.f32 %v883_v6, %v4844_v44  ;;  %1075 = vst [vmem:[#allocation2 + $0x278] sm:$0xff] %v979_v9 }
 0x27d   : > { %1074 = vst [vmem:[#allocation2 + $0x270] sm:$0xff] %v930_v10 }
 0x27e   : > { %1080 = vst [vmem:[#allocation2 + $0x2a0] sm:$0xff] %v835_v61 }
 0x27f   : > { %1081 = vst [vmem:[#allocation2 + $0x2a8] sm:$0xff] %v884_v43 }
 0x281   : > { %v981_v14 = vpop.f32.mrf.mxu3 }
 0x282   : > { %v932_v17 = vpop.f32.mrf.mxu2  ;;  %v982_v28 = vadd.f32 %v981_v14, %v4854_v63  ;;  %v836_v2 = vpop.f32.mrf.mxu0 }
 0x283   : > { %v933_v12 = vadd.f32 %v932_v17, %v4851_v25  ;;  %v885_v37 = vpop.f32.mrf.mxu1  ;;  %v837_v54 = vadd.f32 %v836_v2, %v4841_v33 }
 0x284   : > { %v886_v60 = vadd.f32 %v885_v37, %v4844_v44  ;;  %1083 = vst [vmem:[#allocation2 + $0x2b8] sm:$0xff] %v982_v28 }
 0x285   : > { %1082 = vst [vmem:[#allocation2 + $0x2b0] sm:$0xff] %v933_v12 }
 0x286   : > { %1088 = vst [vmem:[#allocation2 + $0x2e0] sm:$0xff] %v837_v54 }
 0x287   : > { %1089 = vst [vmem:[#allocation2 + $0x2e8] sm:$0xff] %v886_v60 }
 0x289   : > { %v983_v41 = vpop.f32.mrf.mxu3 }
 0x28a   : > { %v934_v34 = vpop.f32.mrf.mxu2  ;;  %v984_v51 = vadd.f32 %v983_v41, %v4854_v63  ;;  %v839_v40 = vpop.f32.mrf.mxu0 }
 0x28b   : > { %v935_v4 = vadd.f32 %v934_v34, %v4851_v25  ;;  %v888_v42 = vpop.f32.mrf.mxu1  ;;  %v840_v49 = vadd.f32 %v839_v40, %v4841_v33 }
 0x28c   : > { %v889_v16 = vadd.f32 %v888_v42, %v4844_v44  ;;  %1091 = vst [vmem:[#allocation2 + $0x2f8] sm:$0xff] %v984_v51 }
 0x28d   : > { %1090 = vst [vmem:[#allocation2 + $0x2f0] sm:$0xff] %v935_v4 }
 0x28e   : > { %1096 = vst [vmem:[#allocation2 + $0x320] sm:$0xff] %v840_v49 }
 0x28f   : > { %1097 = vst [vmem:[#allocation2 + $0x328] sm:$0xff] %v889_v16 }
 0x291   : > { %v986_v18 = vpop.f32.mrf.mxu3 }
 0x292   : > { %v937_v57 = vpop.f32.mrf.mxu2  ;;  %v987_v10 = vadd.f32 %v986_v18, %v4854_v63  ;;  %v841_v9 = vpop.f32.mrf.mxu0 }
 0x293   : > { %v938_v26 = vadd.f32 %v937_v57, %v4851_v25  ;;  %v890_v5 = vpop.f32.mrf.mxu1  ;;  %v842_v6 = vadd.f32 %v841_v9, %v4841_v33 }
 0x294   : > { %v891_v61 = vadd.f32 %v890_v5, %v4844_v44  ;;  %1099 = vst [vmem:[#allocation2 + $0x338] sm:$0xff] %v987_v10 }
 0x295   : > { %1098 = vst [vmem:[#allocation2 + $0x330] sm:$0xff] %v938_v26 }
 0x296   : > { %1104 = vst [vmem:[#allocation2 + $0x360] sm:$0xff] %v842_v6 }
 0x297   : > { %1105 = vst [vmem:[#allocation2 + $0x368] sm:$0xff] %v891_v61 }
 0x299   : > { %v988_v17 = vpop.f32.mrf.mxu3 }
 0x29a   : > { %v939_v43 = vpop.f32.mrf.mxu2  ;;  %v989_v12 = vadd.f32 %v988_v17, %v4854_v63  ;;  %v844_v28 = vpop.f32.mrf.mxu0 }
 0x29b   : > { %v940_v14 = vadd.f32 %v939_v43, %v4851_v25  ;;  %v893_v2 = vpop.f32.mrf.mxu1  ;;  %v845_v37 = vadd.f32 %v844_v28, %v4841_v33 }
 0x29c   : > { %v894_v54 = vadd.f32 %v893_v2, %v4844_v44  ;;  %1107 = vst [vmem:[#allocation2 + $0x378] sm:$0xff] %v989_v12 }
 0x29d   : > { %1106 = vst [vmem:[#allocation2 + $0x370] sm:$0xff] %v940_v14 }
 0x29e   : > { %1112 = vst [vmem:[#allocation2 + $0x3a0] sm:$0xff] %v845_v37 }
 0x29f   : > { %1113 = vst [vmem:[#allocation2 + $0x3a8] sm:$0xff] %v894_v54 }
 0x2a1   : > { %v991_v34 = vpop.f32.mrf.mxu3 }
 0x2a2   : > { %v942_v60 = vpop.f32.mrf.mxu2  ;;  %v992_v4 = vadd.f32 %v991_v34, %v4854_v63  ;;  %v846_v51 = vpop.f32.mrf.mxu0 }
 0x2a3   : > { %v943_v41 = vadd.f32 %v942_v60, %v4851_v25  ;;  %v895_v40 = vpop.f32.mrf.mxu1  ;;  %v847_v42 = vadd.f32 %v846_v51, %v4841_v33 }
 0x2a4   : > { %v896_v49 = vadd.f32 %v895_v40, %v4844_v44  ;;  %1115 = vst [vmem:[#allocation2 + $0x3b8] sm:$0xff] %v992_v4 }
 0x2a5   : > { %1114 = vst [vmem:[#allocation2 + $0x3b0] sm:$0xff] %v943_v41 }
 0x2a6   : > { %1120 = vst [vmem:[#allocation2 + $0x3e0] sm:$0xff] %v847_v42 }
 0x2a7   : > { %1121 = vst [vmem:[#allocation2 + $0x3e8] sm:$0xff] %v896_v49 }
 0x2a9   : > { %v993_v57 = vpop.f32.mrf.mxu3 }
 0x2aa   : > { %v944_v16 = vpop.f32.mrf.mxu2  ;;  %v994_v26 = vadd.f32 %v993_v57, %v4854_v63 }
 0x2ab   : > { %v945_v18 = vadd.f32 %v944_v16, %v4851_v25 }
 0x2ac   : > { %1123 = vst [vmem:[#allocation2 + $0x3f8] sm:$0xff] %v994_v26 }
 0x2ad   : > { %1122 = vst [vmem:[#allocation2 + $0x3f0] sm:$0xff] %v945_v18 }
 0x2ae LB: >> { %v2826_v33 = vor.u32 %v4171_v11, %v4147_v0  ;;  %v3082_v44 = vor.u32 %v4555_v27, %v4531_v13  ;;  %v2830_v25 = vor.u32 %v4144_v56, %v4168_v3  ;;  %v3086_v63 = vor.u32 %v4528_v1, %v4552_v35  ;;  %v5571_v60 = vld [vmem:[#allocation190_spill] sm:$0xff]  ;;  %v5572_v41 = vld [vmem:[#allocation79_spill] sm:$0xff]  ;;  %v5573_v4 = vld [vmem:[#allocation72_spill] sm:$0xff]  ;;  %p1258_p2 = scmp.eq.s32.totalorder %s3611_s18, 0  ;;  %s1259_s26 = ssub.s32 15, %s3623_s25  ;;  %s3623_s25 = sphi %s4922_s25, %s1257_s25  }
 0x2af   : >> { %v2794_v10 = vor.u32 %v4123_v55, %v4099_v38  ;;  %v3050_v9 = vor.u32 %v4507_v30, %v4483_v8  ;;  %v2798_v5 = vor.u32 %v4096_v46, %v4120_v23  ;;  %v3054_v6 = vor.u32 %v4480_v45, %v4504_v19  ;;  %v5574_v40 = vld [vmem:[#allocation189_spill] sm:$0xff]  ;;  %v5575_v42 = vld [vmem:[#allocation182_spill] sm:$0xff]  ;;  %v5578_v26 = vld [vmem:[#allocation167_spill] sm:$0xff] }
 0x2b0   : >> { %1918 = vmatpush.bf16.msra.mxu0 %v2826_v33  ;;  %1931 = vmatpush.bf16.msra.mxu1 %v3082_v44  ;;  %v2762_v61 = vor.u32 %v4075_v29, %v4051_v24  ;;  %v3018_v43 = vor.u32 %v4459_v48, %v4435_v52  ;;  %v2766_v17 = vor.u32 %v4048_v32, %v4072_v21  ;;  %v5576_v16 = vld [vmem:[#allocation57_spill] sm:$0xff]  ;;  %v5579_v33 = vld [vmem:[#allocation175_spill] sm:$0xff]  ;;  %s5206_s8 = scalar_select %p1258_p2, %s3623_s25, %s1259_s26 }
 0x2b1   : >> { %1944 = vmatpush.bf16.msra.mxu2 %v2830_v25  ;;  %1957 = vmatpush.bf16.msra.mxu3 %v3086_v63  ;;  %v3022_v14 = vor.u32 %v4432_v31, %v4456_v62  ;;  %v2730_v12 = vor.u32 %v4027_v47, %v4003_v15  ;;  %v2986_v28 = vor.u32 %v4411_v59, %v4387_v36  ;;  %v5577_v57 = vld [vmem:[#allocation65_spill] sm:$0xff]  ;;  %v5580_v25 = vld [vmem:[#allocation64_spill] sm:$0xff]  ;;  %s1257_s25 = sadd.s32 1, %s3623_s25  }
 0x2b2   : >> { %v2734_v2 = vor.u32 %v4000_v7, %v4024_v39  ;;  %v2990_v37 = vor.u32 %v4384_v22, %v4408_v53  ;;  %v2698_v54 = vor.u32 %v3979_v58, %v3955_v50  ;;  %v2954_v34 = vor.u32 %v5571_v60, %v4339_v20  ;;  %v5581_v63 = vld [vmem:[#allocation56_spill] sm:$0xff]  ;;  %v5590_v60 = vld [vmem:[#allocation158_spill] sm:$0xff]  ;;  %s3269_s12 = sshll.u32 %s5206_s8, 6  ;;  %s3270_s10 = sshll.u32 %s5206_s8, 4 }
 0x2b3   : >> { %v2702_v51 = vor.u32 %v5573_v4, %v5572_v41  ;;  %v2958_v49 = vor.u32 %v5575_v42, %v5574_v40  ;;  %v2666_v18 = vor.u32 %v5577_v57, %v5576_v16  ;;  %v2922_v44 = vor.u32 %v5579_v33, %v5578_v26  ;;  %v5592_v4 = vld [vmem:[#allocation25_spill] sm:$0xff]  ;;  %v5594_v42 = vld [vmem:[#allocation135_spill] sm:$0xff]  ;;  %v5596_v57 = vld [vmem:[#allocation32_spill] sm:$0xff]  ;;  %s5209_s22 = scalar_lea.vmem [#allocation2], %s3269_s12  ;;  %s2266_s5 = scalar_lea.vmem %s4920_s27, %s3270_s10 [#allocation13] }
 0x2b4   : >> { %1919 = vmatpush.bf16.msra.mxu0 %v2794_v10  ;;  %1932 = vmatpush.bf16.msra.mxu1 %v3050_v9  ;;  %v2670_v10 = vor.u32 %v5581_v63, %v5580_v25  ;;  %v5582_v9 = vld [vmem:[#allocation174_spill] sm:$0xff]  ;;  %p1254_p5 = scmp.ge.s32.totalorder %s1257_s25, 16  }
 0x2b5   : >> { %1945 = vmatpush.bf16.msra.mxu2 %v2798_v5  ;;  %1958 = vmatpush.bf16.msra.mxu3 %v3054_v6  ;;  %v5583_v5 = vld [vmem:[#allocation166_spill] sm:$0xff]  ;;  %s3271_s11 = sshll.u32 (%p1254_p5), %s3611_s18, 4  ;;  %s2289_s23 = sshll.u32 (%p1254_p5), %s4920_s27, 4  ;;  %s2290_s23 = int_to_ptr.vmem [resolvable:$true] %s2289_s23 }
 0x2b6   : >> { %v2926_v6 = vor.u32 %v5583_v5, %v5582_v9  ;;  %v5598_v33 = vld [vmem:[#allocation142_spill] sm:$0xff]  ;;  %v5600_v9 = vld [vmem:[#allocation123_spill] sm:$0xff]  ;;  %v5601_v5 = vld [vmem:[#allocation129_spill] sm:$0xff]  ;;  %s2288_s14 = scalar_lea.hbm (%p1254_p5), %s5327_s4, %s3271_s11  ;;  %s2270_s15 = scalar_lea.sflag (%p1254_p5), [#allocation7], %s3786_s1 }
 0x2b7   : >> { %v1261_v63 = vld [vmem:[#allocation3] sm:$0xff]  ;;  %s2291_s0 = sshll.u32 (%p1254_p5), %s2288_s14, 4  ;;  %s3545_s18 = scalar_lea.hbm (%p1254_p5), %s5327_s4, 512  ;;  %s2292_s0 = int_to_ptr.hbm [resolvable:$true] %s2291_s0 }
 0x2b8   : >> { %1920 = vmatpush.bf16.msra.mxu0 %v2762_v61  ;;  %1933 = vmatpush.bf16.msra.mxu1 %v3018_v43  ;;  %v5584_v61 = vld [vmem:[#allocation41_spill] sm:$0xff]  ;;  %s3539_s17 = sshra.s32 (%p1254_p5), %s2292_s0, 4  ;;  %s3540_s17 = int_to_ptr.hbm [resolvable:$true] %s3539_s17 }
 0x2b9   : >> { %1946 = vmatpush.bf16.msra.mxu2 %v2766_v17  ;;  %1959 = vmatpush.bf16.msra.mxu3 %v3022_v14  ;;  %v5585_v43 = vld [vmem:[#allocation49_spill] sm:$0xff]  ;;  %v5586_v14 = vld [vmem:[#allocation151_spill] sm:$0xff]  ;;  %s3541_s20 = scalar_lea.hbm (%p1254_p5), %s3540_s17, 256  ;;  %p3546_p13 = scmp.lt.s32.totalorder (%p1254_p5), %s3540_s17, %s5327_s4 }
 0x2ba   : >> { %v2634_v17 = vor.u32 %v5585_v43, %v5584_v61  ;;  %v5602_v61 = vld [vmem:[#allocation234_spill] sm:$0xff]  ;;  %v5603_v43 = vld [vmem:[#allocation240_spill] sm:$0xff]  ;;  %p3542_p7 = scmp.ne.s32.totalorder (%p1254_p5), %s3540_s17, %s3541_s20  ;;  %p3547_p0 = scmp.lt.s32.totalorder (%p1254_p5), %s3545_s18, %s3541_s20 }
 0x2bc   : >> { %1921 = vmatpush.bf16.msra.mxu0 %v2730_v12  ;;  %1934 = vmatpush.bf16.msra.mxu1 %v2986_v28  ;;  %v5587_v12 = vld [vmem:[#allocation159_spill] sm:$0xff]  ;;  %p3543_p8 = pnand (%p1254_p5), %p3542_p7, %p3718_p9  ;;  %p3548_p1 = por (%p1254_p5), %p3547_p0, %p3546_p13 }
 0x2bd   : >> { %1947 = vmatpush.bf16.msra.mxu2 %v2734_v2  ;;  %1960 = vmatpush.bf16.msra.mxu3 %v2990_v37  ;;  %v2890_v28 = vor.u32 %v5587_v12, %v5586_v14  ;;  %v5588_v2 = vld [vmem:[#allocation48_spill] sm:$0xff]  ;;  %v5605_v12 = vld [vmem:[#allocation122_spill] sm:$0xff] }
 0x2be   : >> { %v5589_v37 = vld [vmem:[#allocation40_spill] sm:$0xff]  ;;  %p3544_p10 = pneg (%p1254_p5), %p3543_p8 }
 0x2bf   : >> { %v5604_v14 = vld [vmem:[#allocation128_spill] sm:$0xff] }
 0x2c0   : >> { %1922 = vmatpush.bf16.msra.mxu0 %v2698_v54  ;;  %1935 = vmatpush.bf16.msra.mxu1 %v2954_v34  ;;  %v2638_v54 = vor.u32 %v5589_v37, %v5588_v2  ;;  %v5591_v34 = vld [vmem:[#allocation150_spill] sm:$0xff]  ;;  %v5606_v2 = vld [vmem:[#allocation239_spill] sm:$0xff]  ;;  %v5607_v37 = vld [vmem:[#allocation233_spill] sm:$0xff]  ;;  %p3549_p3 = pnand (%p1254_p5), %p3548_p1, %p3544_p10 }
 0x2c1   : >> { %1948 = vmatpush.bf16.msra.mxu2 %v2702_v51  ;;  %1961 = vmatpush.bf16.msra.mxu3 %v2958_v49  ;;  %v2894_v41 = vor.u32 %v5591_v34, %v5590_v60  ;;  %v5593_v51 = vld [vmem:[#allocation33_spill] sm:$0xff]  ;;  %v5595_v49 = vld [vmem:[#allocation143_spill] sm:$0xff]  ;;  %v4999_v60 = vpack.c.bf16 %v1261_v63, %v1261_v63 }
 0x2c2   : >> { %v2602_v40 = vor.u32 %v5593_v51, %v5592_v4  ;;  %v2858_v16 = vor.u32 %v5595_v49, %v5594_v42  ;;  %v5609_v4 = vld [vmem:[#allocation117_spill] sm:$0xff]  ;;  %v5610_v42 = vld [vmem:[#allocation222_spill] sm:$0xff]  ;;  %v5611_v49 = vld [vmem:[#allocation228_spill] sm:$0xff] }
 0x2c4   : >> { %1923 = vmatpush.bf16.msra.mxu0 %v2666_v18  ;;  %1936 = vmatpush.bf16.msra.mxu1 %v2922_v44  ;;  %v5597_v18 = vld [vmem:[#allocation24_spill] sm:$0xff]  ;;  %v5599_v44 = vld [vmem:[#allocation134_spill] sm:$0xff] }
 0x2c5   : >> { %1949 = vmatpush.bf16.msra.mxu2 %v2670_v10  ;;  %1962 = vmatpush.bf16.msra.mxu3 %v2926_v6  ;;  %v2606_v26 = vor.u32 %v5597_v18, %v5596_v57  ;;  %v2862_v25 = vor.u32 %v5599_v44, %v5598_v33  ;;  %v1262_v10 = vld [vmem:[#allocation3 + $0x8] sm:$0xff]  ;;  %v2834_v6 = vor.u32 %v5601_v5, %v5600_v9  ;;  %v5612_v18 = vld [vmem:[#allocation116_spill] sm:$0xff]  ;;  %v5613_v33 = vld [vmem:[#allocation110_spill] sm:$0xff] }
 0x2c6   : >> { %v5001_v34 = vpack.c.bf16 %v1262_v10, %v1262_v10  ;;  %v3058_v57 = vor.u32 %v5611_v49, %v5610_v42  ;;  %v5615_v44 = vld [vmem:[#allocation221_spill] sm:$0xff]  ;;  %v5618_v9 = vld [vmem:[#allocation210_spill] sm:$0xff]  ;;  %v5619_v5 = vld [vmem:[#allocation216_spill] sm:$0xff] }
 0x2c7   : >> { %v5628_v42 = vld [vmem:[#allocation92_spill] sm:$0xff]  ;;  %v5629_v49 = vld [vmem:[#allocation86_spill] sm:$0xff] }
 0x2c8   : >> { %1924 = vmatpush.bf16.msra.mxu0 %v2634_v17  ;;  %1937 = vmatpush.bf16.msra.mxu1 %v2890_v28  ;;  %v3090_v17 = vor.u32 %v5603_v43, %v5602_v61  ;;  %v2838_v28 = vor.u32 %v5605_v12, %v5604_v14  ;;  %v5620_v61 = vld [vmem:[#allocation104_spill] sm:$0xff]  ;;  %v5621_v43 = vld [vmem:[#allocation98_spill] sm:$0xff]  ;;  %v5622_v14 = vld [vmem:[#allocation215_spill] sm:$0xff] }
 0x2c9   : >> { %1950 = vmatpush.bf16.msra.mxu2 %v2638_v54  ;;  %1963 = vmatpush.bf16.msra.mxu3 %v2894_v41  ;;  %v3094_v54 = vor.u32 %v5607_v37, %v5606_v2  ;;  %v5608_v41 = vld [vmem:[#allocation111_spill] sm:$0xff]  ;;  %v5623_v12 = vld [vmem:[#allocation209_spill] sm:$0xff] }
 0x2ca   : >> { %v2802_v51 = vor.u32 %v5609_v4, %v5608_v41  ;;  %v5624_v2 = vld [vmem:[#allocation87_spill] sm:$0xff]  ;;  %v5625_v37 = vld [vmem:[#allocation93_spill] sm:$0xff]  ;;  %v5626_v41 = vld [vmem:[#allocation198_spill] sm:$0xff] }
 0x2cb   : >> { %v5627_v4 = vld [vmem:[#allocation204_spill] sm:$0xff] }
 0x2cc   : >> { %1925 = vmatpush.bf16.msra.mxu0 %v2602_v40  ;;  %1938 = vmatpush.bf16.msra.mxu1 %v2858_v16  ;;  %v2806_v40 = vor.u32 %v5613_v33, %v5612_v18  ;;  %v5614_v16 = vld [vmem:[#allocation227_spill] sm:$0xff]  ;;  %v5631_v33 = vld [vmem:[#allocation197_spill] sm:$0xff] }
 0x2cd   : >> { %1951 = vmatpush.bf16.msra.mxu2 %v2606_v26  ;;  %1964 = vmatpush.bf16.msra.mxu3 %v2862_v25  ;;  %v3062_v63 = vor.u32 %v5615_v44, %v5614_v16  ;;  %v5616_v26 = vld [vmem:[#allocation99_spill] sm:$0xff]  ;;  %v5617_v25 = vld [vmem:[#allocation105_spill] sm:$0xff]  ;;  %v5632_v16 = vld [vmem:[#allocation74_spill] sm:$0xff] }
 0x2ce   : >> { %v2770_v10 = vor.u32 %v5617_v25, %v5616_v26  ;;  %v5630_v18 = vld [vmem:[#allocation203_spill] sm:$0xff]  ;;  %v5633_v44 = vld [vmem:[#allocation81_spill] sm:$0xff]  ;;  %v5634_v26 = vld [vmem:[#allocation184_spill] sm:$0xff] }
 0x2cf   : >> { %1926 = vmatmul.bf16.vlgmr.msra.gmra.mxu0 %v4999_v60  ;;  %1939 = vmatmul.bf16.vlgmr.msra.gmra.mxu1 %v5001_v34  ;;  %v5635_v25 = vld [vmem:[#allocation192_spill] sm:$0xff] }
 0x2d0   : >> { %1970 = vmatpush.bf16.msrb.mxu0 %v2834_v6  ;;  %1983 = vmatpush.bf16.msrb.mxu1 %v3090_v17  ;;  %v3026_v6 = vor.u32 %v5619_v5, %v5618_v9  ;;  %v2774_v17 = vor.u32 %v5621_v43, %v5620_v61  ;;  %v5636_v9 = vld [vmem:[#allocation80_spill] sm:$0xff]  ;;  %v5637_v5 = vld [vmem:[#allocation73_spill] sm:$0xff]  ;;  %v5638_v61 = vld [vmem:[#allocation191_spill] sm:$0xff] }
 0x2d1   : >> { %1996 = vmatpush.bf16.msrb.mxu2 %v2838_v28  ;;  %2009 = vmatpush.bf16.msrb.mxu3 %v3094_v54  ;;  %v3030_v28 = vor.u32 %v5623_v12, %v5622_v14  ;;  %v2738_v54 = vor.u32 %v5625_v37, %v5624_v2  ;;  %v5639_v43 = vld [vmem:[#allocation183_spill] sm:$0xff]  ;;  %v5642_v2 = vld [vmem:[#allocation169_spill] sm:$0xff] }
 0x2d2   : >> { %1952 = vmatmul.bf16.vlgmr.msra.gmra.mxu2 %v4999_v60  ;;  %1965 = vmatmul.bf16.vlgmr.msra.gmra.mxu3 %v5001_v34  ;;  %v5640_v14 = vld [vmem:[#allocation59_spill] sm:$0xff]  ;;  %v5643_v37 = vld [vmem:[#allocation177_spill] sm:$0xff] }
 0x2d3   : >> { %v5641_v12 = vld [vmem:[#allocation67_spill] sm:$0xff] }
 0x2d4   : >> { %1971 = vmatpush.bf16.msrb.mxu0 %v2802_v51  ;;  %1984 = vmatpush.bf16.msrb.mxu1 %v3058_v57  ;;  %v2994_v51 = vor.u32 %v5627_v4, %v5626_v41  ;;  %v2742_v57 = vor.u32 %v5629_v49, %v5628_v42  ;;  %v5644_v41 = vld [vmem:[#allocation66_spill] sm:$0xff]  ;;  %v5646_v42 = vld [vmem:[#allocation176_spill] sm:$0xff] }
 0x2d5   : >> { %1997 = vmatpush.bf16.msrb.mxu2 %v2806_v40  ;;  %2010 = vmatpush.bf16.msrb.mxu3 %v3062_v63  ;;  %v2998_v40 = vor.u32 %v5631_v33, %v5630_v18  ;;  %v2706_v63 = vor.u32 %v5633_v44, %v5632_v16  ;;  %v5645_v4 = vld [vmem:[#allocation58_spill] sm:$0xff]  ;;  %v5647_v49 = vld [vmem:[#allocation168_spill] sm:$0xff]  ;;  %v5648_v18 = vld [vmem:[#allocation43_spill] sm:$0xff] }
 0x2d6   : >> { %v5649_v33 = vld [vmem:[#allocation51_spill] sm:$0xff]  ;;  %v5650_v16 = vld [vmem:[#allocation153_spill] sm:$0xff] }
 0x2d7   : >> { %v5651_v44 = vld [vmem:[#allocation161_spill] sm:$0xff] }
 0x2d8   : >> { %1972 = vmatpush.bf16.msrb.mxu0 %v2770_v10  ;;  %1985 = vmatpush.bf16.msrb.mxu1 %v3026_v6  ;;  %v2962_v10 = vor.u32 %v5635_v25, %v5634_v26  ;;  %v2710_v6 = vor.u32 %v5637_v5, %v5636_v9  ;;  %v5652_v26 = vld [vmem:[#allocation50_spill] sm:$0xff]  ;;  %v5654_v9 = vld [vmem:[#allocation160_spill] sm:$0xff] }
 0x2d9   : >> { %1998 = vmatpush.bf16.msrb.mxu2 %v2774_v17  ;;  %2011 = vmatpush.bf16.msrb.mxu3 %v3030_v28  ;;  %v2966_v17 = vor.u32 %v5639_v43, %v5638_v61  ;;  %v2674_v28 = vor.u32 %v5641_v12, %v5640_v14  ;;  %v5653_v25 = vld [vmem:[#allocation42_spill] sm:$0xff]  ;;  %v5655_v5 = vld [vmem:[#allocation152_spill] sm:$0xff]  ;;  %v5656_v61 = vld [vmem:[#allocation27_spill] sm:$0xff] }
 0x2da   : >> { %v5657_v43 = vld [vmem:[#allocation35_spill] sm:$0xff]  ;;  %v5658_v14 = vld [vmem:[#allocation137_spill] sm:$0xff] }
 0x2db   : >> { %v5659_v12 = vld [vmem:[#allocation145_spill] sm:$0xff] }
 0x2dc   : >> { %1973 = vmatpush.bf16.msrb.mxu0 %v2738_v54  ;;  %1986 = vmatpush.bf16.msrb.mxu1 %v2994_v51  ;;  %v2930_v54 = vor.u32 %v5643_v37, %v5642_v2  ;;  %v2678_v51 = vor.u32 %v5645_v4, %v5644_v41  ;;  %v5660_v2 = vld [vmem:[#allocation34_spill] sm:$0xff]  ;;  %v5662_v41 = vld [vmem:[#allocation144_spill] sm:$0xff] }
 0x2dd   : >> { %1999 = vmatpush.bf16.msrb.mxu2 %v2742_v57  ;;  %2012 = vmatpush.bf16.msrb.mxu3 %v2998_v40  ;;  %v2934_v57 = vor.u32 %v5647_v49, %v5646_v42  ;;  %v2642_v40 = vor.u32 %v5649_v33, %v5648_v18  ;;  %v5661_v37 = vld [vmem:[#allocation26_spill] sm:$0xff]  ;;  %v5663_v4 = vld [vmem:[#allocation136_spill] sm:$0xff]  ;;  %v5664_v42 = vld [vmem:[#allocation125_spill] sm:$0xff] }
 0x2de   : >> { %v5665_v49 = vld [vmem:[#allocation131_spill] sm:$0xff]  ;;  %v5666_v18 = vld [vmem:[#allocation236_spill] sm:$0xff]  ;;  %v5667_v33 = vld [vmem:[#allocation242_spill] sm:$0xff] }
 0x2e0   : >> { %1974 = vmatpush.bf16.msrb.mxu0 %v2706_v63  ;;  %1987 = vmatpush.bf16.msrb.mxu1 %v2962_v10  ;;  %v2898_v63 = vor.u32 %v5651_v44, %v5650_v16  ;;  %v2646_v10 = vor.u32 %v5653_v25, %v5652_v26  ;;  %v5668_v16 = vld [vmem:[#allocation130_spill] sm:$0xff]  ;;  %v5669_v44 = vld [vmem:[#allocation124_spill] sm:$0xff]  ;;  %v5670_v26 = vld [vmem:[#allocation241_spill] sm:$0xff] }
 0x2e1   : >> { %2000 = vmatpush.bf16.msrb.mxu2 %v2710_v6  ;;  %2013 = vmatpush.bf16.msrb.mxu3 %v2966_v17  ;;  %v2902_v6 = vor.u32 %v5655_v5, %v5654_v9  ;;  %v2610_v17 = vor.u32 %v5657_v43, %v5656_v61  ;;  %v5671_v25 = vld [vmem:[#allocation235_spill] sm:$0xff]  ;;  %v5674_v61 = vld [vmem:[#allocation224_spill] sm:$0xff]  ;;  %v5675_v43 = vld [vmem:[#allocation230_spill] sm:$0xff] }
 0x2e2   : >> { %v3102_v9 = vor.u32 %v5671_v25, %v5670_v26  ;;  %v5673_v5 = vld [vmem:[#allocation119_spill] sm:$0xff]  ;;  %v5688_v26 = vld [vmem:[#allocation89_spill] sm:$0xff] }
 0x2e3   : >> { %v5689_v25 = vld [vmem:[#allocation95_spill] sm:$0xff] }
 0x2e4   : >> { %1975 = vmatpush.bf16.msrb.mxu0 %v2674_v28  ;;  %1988 = vmatpush.bf16.msrb.mxu1 %v2930_v54  ;;  %v2866_v28 = vor.u32 %v5659_v12, %v5658_v14  ;;  %v2614_v54 = vor.u32 %v5661_v37, %v5660_v2  ;;  %v3066_v14 = vor.u32 %v5675_v43, %v5674_v61  ;;  %v5676_v12 = vld [vmem:[#allocation118_spill] sm:$0xff]  ;;  %v5677_v2 = vld [vmem:[#allocation112_spill] sm:$0xff] }
 0x2e5   : >> { %2001 = vmatpush.bf16.msrb.mxu2 %v2678_v51  ;;  %2014 = vmatpush.bf16.msrb.mxu3 %v2934_v57  ;;  %v2870_v51 = vor.u32 %v5663_v4, %v5662_v41  ;;  %v2842_v57 = vor.u32 %v5665_v49, %v5664_v42  ;;  %v2814_v37 = vor.u32 %v5677_v2, %v5676_v12  ;;  %v5678_v41 = vld [vmem:[#allocation229_spill] sm:$0xff]  ;;  %v5679_v4 = vld [vmem:[#allocation223_spill] sm:$0xff]  ;;  %v5683_v49 = vld [vmem:[#allocation218_spill] sm:$0xff] }
 0x2e6   : >> { %v3070_v42 = vor.u32 %v5679_v4, %v5678_v41  ;;  %v5692_v61 = vld [vmem:[#allocation94_spill] sm:$0xff]  ;;  %v5693_v43 = vld [vmem:[#allocation88_spill] sm:$0xff]  ;;  %v5694_v12 = vld [vmem:[#allocation205_spill] sm:$0xff] }
 0x2e7   : >> { %v5695_v2 = vld [vmem:[#allocation199_spill] sm:$0xff]  ;;  %v5696_v41 = vld [vmem:[#allocation76_spill] sm:$0xff] }
 0x2e8   : >> { %1976 = vmatpush.bf16.msrb.mxu0 %v2642_v40  ;;  %1989 = vmatpush.bf16.msrb.mxu1 %v2898_v63  ;;  %v3098_v40 = vor.u32 %v5667_v33, %v5666_v18  ;;  %v2846_v63 = vor.u32 %v5669_v44, %v5668_v16  ;;  %v5684_v18 = vld [vmem:[#allocation106_spill] sm:$0xff]  ;;  %v5685_v33 = vld [vmem:[#allocation100_spill] sm:$0xff]  ;;  %v5686_v16 = vld [vmem:[#allocation217_spill] sm:$0xff] }
 0x2e9   : >> { %2002 = vmatpush.bf16.msrb.mxu2 %v2646_v10  ;;  %2015 = vmatpush.bf16.msrb.mxu3 %v2902_v6  ;;  %v5672_v10 = vld [vmem:[#allocation113_spill] sm:$0xff]  ;;  %v5687_v44 = vld [vmem:[#allocation211_spill] sm:$0xff] }
 0x2ea   : >> { %v2810_v6 = vor.u32 %v5673_v5, %v5672_v10  ;;  %v5690_v10 = vld [vmem:[#allocation200_spill] sm:$0xff]  ;;  %v5691_v5 = vld [vmem:[#allocation206_spill] sm:$0xff]  ;;  %v5697_v4 = vld [vmem:[#allocation83_spill] sm:$0xff] }
 0x2ec   : >> { %1977 = vmatpush.bf16.msrb.mxu0 %v2610_v17  ;;  %1990 = vmatpush.bf16.msrb.mxu1 %v2866_v28  ;;  %v5680_v17 = vld [vmem:[#allocation101_spill] sm:$0xff]  ;;  %v5681_v28 = vld [vmem:[#allocation107_spill] sm:$0xff] }
 0x2ed   : >> { %2003 = vmatpush.bf16.msrb.mxu2 %v2614_v54  ;;  %2016 = vmatpush.bf16.msrb.mxu3 %v2870_v51  ;;  %v2778_v54 = vor.u32 %v5681_v28, %v5680_v17  ;;  %v5682_v51 = vld [vmem:[#allocation212_spill] sm:$0xff]  ;;  %v5698_v17 = vld [vmem:[#allocation186_spill] sm:$0xff] }
 0x2ee   : >> { %v5699_v28 = vld [vmem:[#allocation194_spill] sm:$0xff] }
 0x2ef   : >> { %1978 = vmatmul.bf16.vlgmr.msrb.gmra.mxu0 %v4999_v60  ;;  %1991 = vmatmul.bf16.vlgmr.msrb.gmra.mxu1 %v5001_v34 }
 0x2f0   : >> { %2022 = vmatpush.bf16.msra.mxu0 %v2842_v57  ;;  %2035 = vmatpush.bf16.msra.mxu1 %v3098_v40  ;;  %v3034_v57 = vor.u32 %v5683_v49, %v5682_v51  ;;  %v2782_v40 = vor.u32 %v5685_v33, %v5684_v18  ;;  %v5700_v51 = vld [vmem:[#allocation82_spill] sm:$0xff]  ;;  %v5701_v49 = vld [vmem:[#allocation75_spill] sm:$0xff]  ;;  %v5702_v18 = vld [vmem:[#allocation193_spill] sm:$0xff] }
 0x2f1   : >> { %2048 = vmatpush.bf16.msra.mxu2 %v2846_v63  ;;  %2061 = vmatpush.bf16.msra.mxu3 %v3102_v9  ;;  %v3038_v63 = vor.u32 %v5687_v44, %v5686_v16  ;;  %v2746_v9 = vor.u32 %v5689_v25, %v5688_v26  ;;  %v5703_v33 = vld [vmem:[#allocation185_spill] sm:$0xff]  ;;  %v5706_v26 = vld [vmem:[#allocation171_spill] sm:$0xff] }
 0x2f2   : >> { %2004 = vmatmul.bf16.vlgmr.msrb.gmra.mxu2 %v4999_v60  ;;  %2017 = vmatmul.bf16.vlgmr.msrb.gmra.mxu3 %v5001_v34  ;;  %v5704_v16 = vld [vmem:[#allocation61_spill] sm:$0xff]  ;;  %v5707_v25 = vld [vmem:[#allocation179_spill] sm:$0xff] }
 0x2f3   : >> { %v5705_v44 = vld [vmem:[#allocation69_spill] sm:$0xff] }
 0x2f4   : >> { %2023 = vmatpush.bf16.msra.mxu0 %v2810_v6  ;;  %2036 = vmatpush.bf16.msra.mxu1 %v3066_v14  ;;  %v3002_v6 = vor.u32 %v5691_v5, %v5690_v10  ;;  %v2750_v14 = vor.u32 %v5693_v43, %v5692_v61  ;;  %v5708_v10 = vld [vmem:[#allocation68_spill] sm:$0xff]  ;;  %v5710_v61 = vld [vmem:[#allocation178_spill] sm:$0xff] }
 0x2f5   : >> { %2049 = vmatpush.bf16.msra.mxu2 %v2814_v37  ;;  %2062 = vmatpush.bf16.msra.mxu3 %v3070_v42  ;;  %v3006_v37 = vor.u32 %v5695_v2, %v5694_v12  ;;  %v2714_v42 = vor.u32 %v5697_v4, %v5696_v41  ;;  %v5709_v5 = vld [vmem:[#allocation60_spill] sm:$0xff]  ;;  %v5711_v43 = vld [vmem:[#allocation170_spill] sm:$0xff]  ;;  %v5712_v12 = vld [vmem:[#allocation45_spill] sm:$0xff] }
 0x2f6   : >> { %v5713_v2 = vld [vmem:[#allocation53_spill] sm:$0xff]  ;;  %v5714_v41 = vld [vmem:[#allocation155_spill] sm:$0xff] }
 0x2f7   : >> { %v5715_v4 = vld [vmem:[#allocation163_spill] sm:$0xff] }
 0x2f8   : >> { %2024 = vmatpush.bf16.msra.mxu0 %v2778_v54  ;;  %2037 = vmatpush.bf16.msra.mxu1 %v3034_v57  ;;  %v2970_v54 = vor.u32 %v5699_v28, %v5698_v17  ;;  %v2718_v57 = vor.u32 %v5701_v49, %v5700_v51  ;;  %v5716_v17 = vld [vmem:[#allocation52_spill] sm:$0xff]  ;;  %v5718_v51 = vld [vmem:[#allocation162_spill] sm:$0xff] }
 0x2f9   : >> { %2050 = vmatpush.bf16.msra.mxu2 %v2782_v40  ;;  %2063 = vmatpush.bf16.msra.mxu3 %v3038_v63  ;;  %v2974_v40 = vor.u32 %v5703_v33, %v5702_v18  ;;  %v2682_v63 = vor.u32 %v5705_v44, %v5704_v16  ;;  %v5717_v28 = vld [vmem:[#allocation44_spill] sm:$0xff]  ;;  %v5719_v49 = vld [vmem:[#allocation154_spill] sm:$0xff]  ;;  %v5720_v18 = vld [vmem:[#allocation29_spill] sm:$0xff] }
 0x2fa   : >> { %v5721_v33 = vld [vmem:[#allocation37_spill] sm:$0xff]  ;;  %v5722_v16 = vld [vmem:[#allocation139_spill] sm:$0xff] }
 0x2fb   : >> { %v5723_v44 = vld [vmem:[#allocation147_spill] sm:$0xff] }
 0x2fc   : >> { %2025 = vmatpush.bf16.msra.mxu0 %v2746_v9  ;;  %2038 = vmatpush.bf16.msra.mxu1 %v3002_v6  ;;  %v2938_v9 = vor.u32 %v5707_v25, %v5706_v26  ;;  %v2686_v6 = vor.u32 %v5709_v5, %v5708_v10  ;;  %v5724_v26 = vld [vmem:[#allocation36_spill] sm:$0xff]  ;;  %v5726_v10 = vld [vmem:[#allocation146_spill] sm:$0xff] }
 0x2fd   : >> { %2051 = vmatpush.bf16.msra.mxu2 %v2750_v14  ;;  %2064 = vmatpush.bf16.msra.mxu3 %v3006_v37  ;;  %v2942_v14 = vor.u32 %v5711_v43, %v5710_v61  ;;  %v2650_v37 = vor.u32 %v5713_v2, %v5712_v12  ;;  %v5725_v25 = vld [vmem:[#allocation28_spill] sm:$0xff]  ;;  %v5727_v5 = vld [vmem:[#allocation138_spill] sm:$0xff]  ;;  %v5728_v61 = vld [vmem:[#allocation127_spill] sm:$0xff] }
 0x2fe   : >> { %v5729_v43 = vld [vmem:[#allocation133_spill] sm:$0xff]  ;;  %v5730_v12 = vld [vmem:[#allocation238_spill] sm:$0xff]  ;;  %v5731_v2 = vld [vmem:[#allocation244_spill] sm:$0xff] }
 0x300   : >> { %2026 = vmatpush.bf16.msra.mxu0 %v2714_v42  ;;  %2039 = vmatpush.bf16.msra.mxu1 %v2970_v54  ;;  %v2906_v42 = vor.u32 %v5715_v4, %v5714_v41  ;;  %v2654_v54 = vor.u32 %v5717_v28, %v5716_v17  ;;  %v5732_v41 = vld [vmem:[#allocation132_spill] sm:$0xff]  ;;  %v5733_v4 = vld [vmem:[#allocation126_spill] sm:$0xff]  ;;  %v5734_v17 = vld [vmem:[#allocation243_spill] sm:$0xff] }
 0x301   : >> { %2052 = vmatpush.bf16.msra.mxu2 %v2718_v57  ;;  %2065 = vmatpush.bf16.msra.mxu3 %v2974_v40  ;;  %v2910_v57 = vor.u32 %v5719_v49, %v5718_v51  ;;  %v2618_v40 = vor.u32 %v5721_v33, %v5720_v18  ;;  %v5735_v28 = vld [vmem:[#allocation237_spill] sm:$0xff]  ;;  %v5738_v18 = vld [vmem:[#allocation226_spill] sm:$0xff]  ;;  %v5739_v33 = vld [vmem:[#allocation232_spill] sm:$0xff] }
 0x302   : >> { %v3110_v51 = vor.u32 %v5735_v28, %v5734_v17  ;;  %v5737_v49 = vld [vmem:[#allocation121_spill] sm:$0xff]  ;;  %v5752_v17 = vld [vmem:[#allocation91_spill] sm:$0xff] }
 0x303   : >> { %v5753_v28 = vld [vmem:[#allocation97_spill] sm:$0xff] }
 0x304   : >> { %2027 = vmatpush.bf16.msra.mxu0 %v2682_v63  ;;  %2040 = vmatpush.bf16.msra.mxu1 %v2938_v9  ;;  %v2874_v63 = vor.u32 %v5723_v44, %v5722_v16  ;;  %v2622_v9 = vor.u32 %v5725_v25, %v5724_v26  ;;  %v3074_v16 = vor.u32 %v5739_v33, %v5738_v18  ;;  %v5740_v44 = vld [vmem:[#allocation120_spill] sm:$0xff]  ;;  %v5741_v26 = vld [vmem:[#allocation114_spill] sm:$0xff] }
 0x305   : >> { %2053 = vmatpush.bf16.msra.mxu2 %v2686_v6  ;;  %2066 = vmatpush.bf16.msra.mxu3 %v2942_v14  ;;  %v2878_v6 = vor.u32 %v5727_v5, %v5726_v10  ;;  %v2850_v14 = vor.u32 %v5729_v43, %v5728_v61  ;;  %v2822_v25 = vor.u32 %v5741_v26, %v5740_v44  ;;  %v5742_v10 = vld [vmem:[#allocation231_spill] sm:$0xff]  ;;  %v5743_v5 = vld [vmem:[#allocation225_spill] sm:$0xff]  ;;  %v5747_v43 = vld [vmem:[#allocation220_spill] sm:$0xff] }
 0x306   : >> { %v3078_v61 = vor.u32 %v5743_v5, %v5742_v10  ;;  %v5756_v18 = vld [vmem:[#allocation96_spill] sm:$0xff]  ;;  %v5757_v33 = vld [vmem:[#allocation90_spill] sm:$0xff]  ;;  %v5758_v44 = vld [vmem:[#allocation207_spill] sm:$0xff] }
 0x307   : >> { %v5759_v26 = vld [vmem:[#allocation201_spill] sm:$0xff]  ;;  %v5760_v10 = vld [vmem:[#allocation78_spill] sm:$0xff] }
 0x308   : >> { %2028 = vmatpush.bf16.msra.mxu0 %v2650_v37  ;;  %2041 = vmatpush.bf16.msra.mxu1 %v2906_v42  ;;  %v3106_v37 = vor.u32 %v5731_v2, %v5730_v12  ;;  %v2854_v42 = vor.u32 %v5733_v4, %v5732_v41  ;;  %v5748_v12 = vld [vmem:[#allocation108_spill] sm:$0xff]  ;;  %v5749_v2 = vld [vmem:[#allocation102_spill] sm:$0xff]  ;;  %v5750_v41 = vld [vmem:[#allocation219_spill] sm:$0xff] }
 0x309   : >> { %2054 = vmatpush.bf16.msra.mxu2 %v2654_v54  ;;  %2067 = vmatpush.bf16.msra.mxu3 %v2910_v57  ;;  %v5736_v54 = vld [vmem:[#allocation115_spill] sm:$0xff]  ;;  %v5751_v4 = vld [vmem:[#allocation213_spill] sm:$0xff] }
 0x30a   : >> { %v2818_v57 = vor.u32 %v5737_v49, %v5736_v54  ;;  %v5754_v54 = vld [vmem:[#allocation202_spill] sm:$0xff]  ;;  %v5755_v49 = vld [vmem:[#allocation208_spill] sm:$0xff]  ;;  %v5761_v5 = vld [vmem:[#allocation85_spill] sm:$0xff] }
 0x30c   : >> { %2029 = vmatpush.bf16.msra.mxu0 %v2618_v40  ;;  %2042 = vmatpush.bf16.msra.mxu1 %v2874_v63  ;;  %v5744_v40 = vld [vmem:[#allocation103_spill] sm:$0xff]  ;;  %v5745_v63 = vld [vmem:[#allocation109_spill] sm:$0xff] }
 0x30d   : >> { %2055 = vmatpush.bf16.msra.mxu2 %v2622_v9  ;;  %2068 = vmatpush.bf16.msra.mxu3 %v2878_v6  ;;  %v2786_v9 = vor.u32 %v5745_v63, %v5744_v40  ;;  %v5746_v6 = vld [vmem:[#allocation214_spill] sm:$0xff]  ;;  %v5762_v40 = vld [vmem:[#allocation188_spill] sm:$0xff] }
 0x30e   : >> { %v5763_v63 = vld [vmem:[#allocation196_spill] sm:$0xff] }
 0x30f   : >> { %2030 = vmatmul.bf16.vlgmr.msra.gmra.mxu0 %v4999_v60  ;;  %2043 = vmatmul.bf16.vlgmr.msra.gmra.mxu1 %v5001_v34 }
 0x310   : >> { %2074 = vmatpush.bf16.msrb.mxu0 %v2850_v14  ;;  %2087 = vmatpush.bf16.msrb.mxu1 %v3106_v37  ;;  %v3042_v14 = vor.u32 %v5747_v43, %v5746_v6  ;;  %v2790_v37 = vor.u32 %v5749_v2, %v5748_v12  ;;  %v5764_v6 = vld [vmem:[#allocation84_spill] sm:$0xff]  ;;  %v5765_v43 = vld [vmem:[#allocation77_spill] sm:$0xff]  ;;  %v5766_v12 = vld [vmem:[#allocation195_spill] sm:$0xff] }
 0x311   : >> { %2100 = vmatpush.bf16.msrb.mxu2 %v2854_v42  ;;  %2113 = vmatpush.bf16.msrb.mxu3 %v3110_v51  ;;  %v3046_v42 = vor.u32 %v5751_v4, %v5750_v41  ;;  %v2754_v51 = vor.u32 %v5753_v28, %v5752_v17  ;;  %v5767_v2 = vld [vmem:[#allocation187_spill] sm:$0xff]  ;;  %v5770_v17 = vld [vmem:[#allocation173_spill] sm:$0xff] }
 0x312   : >> { %2056 = vmatmul.bf16.vlgmr.msra.gmra.mxu2 %v4999_v60  ;;  %2069 = vmatmul.bf16.vlgmr.msra.gmra.mxu3 %v5001_v34  ;;  %v5768_v41 = vld [vmem:[#allocation63_spill] sm:$0xff]  ;;  %v5771_v28 = vld [vmem:[#allocation181_spill] sm:$0xff] }
 0x313   : >> { %v5769_v4 = vld [vmem:[#allocation71_spill] sm:$0xff] }
 0x314   : >> { %2075 = vmatpush.bf16.msrb.mxu0 %v2818_v57  ;;  %2088 = vmatpush.bf16.msrb.mxu1 %v3074_v16  ;;  %v3010_v57 = vor.u32 %v5755_v49, %v5754_v54  ;;  %v2758_v16 = vor.u32 %v5757_v33, %v5756_v18  ;;  %v5772_v54 = vld [vmem:[#allocation70_spill] sm:$0xff]  ;;  %v5774_v18 = vld [vmem:[#allocation180_spill] sm:$0xff] }
 0x315   : >> { %2101 = vmatpush.bf16.msrb.mxu2 %v2822_v25  ;;  %2114 = vmatpush.bf16.msrb.mxu3 %v3078_v61  ;;  %v3014_v25 = vor.u32 %v5759_v26, %v5758_v44  ;;  %v2722_v61 = vor.u32 %v5761_v5, %v5760_v10  ;;  %v5773_v49 = vld [vmem:[#allocation62_spill] sm:$0xff]  ;;  %v5775_v33 = vld [vmem:[#allocation172_spill] sm:$0xff]  ;;  %v5776_v44 = vld [vmem:[#allocation47_spill] sm:$0xff] }
 0x316   : >> { %v5777_v26 = vld [vmem:[#allocation55_spill] sm:$0xff]  ;;  %v5778_v10 = vld [vmem:[#allocation157_spill] sm:$0xff] }
 0x317   : >> { %v5779_v5 = vld [vmem:[#allocation165_spill] sm:$0xff] }
 0x318   : >> { %2076 = vmatpush.bf16.msrb.mxu0 %v2786_v9  ;;  %2089 = vmatpush.bf16.msrb.mxu1 %v3042_v14  ;;  %v2978_v9 = vor.u32 %v5763_v63, %v5762_v40  ;;  %v2726_v14 = vor.u32 %v5765_v43, %v5764_v6  ;;  %v5780_v40 = vld [vmem:[#allocation54_spill] sm:$0xff]  ;;  %v5782_v6 = vld [vmem:[#allocation164_spill] sm:$0xff] }
 0x319   : >> { %2102 = vmatpush.bf16.msrb.mxu2 %v2790_v37  ;;  %2115 = vmatpush.bf16.msrb.mxu3 %v3046_v42  ;;  %v2982_v37 = vor.u32 %v5767_v2, %v5766_v12  ;;  %v2690_v42 = vor.u32 %v5769_v4, %v5768_v41  ;;  %v5781_v63 = vld [vmem:[#allocation46_spill] sm:$0xff]  ;;  %v5783_v43 = vld [vmem:[#allocation156_spill] sm:$0xff]  ;;  %v5784_v12 = vld [vmem:[#allocation31_spill] sm:$0xff] }
 0x31a   : >> { %v5785_v2 = vld [vmem:[#allocation39_spill] sm:$0xff]  ;;  %v5786_v41 = vld [vmem:[#allocation141_spill] sm:$0xff] }
 0x31b   : >> { %v5787_v4 = vld [vmem:[#allocation149_spill] sm:$0xff] }
 0x31c   : >> { %2077 = vmatpush.bf16.msrb.mxu0 %v2754_v51  ;;  %2090 = vmatpush.bf16.msrb.mxu1 %v3010_v57  ;;  %v2946_v51 = vor.u32 %v5771_v28, %v5770_v17  ;;  %v2694_v57 = vor.u32 %v5773_v49, %v5772_v54  ;;  %v5788_v17 = vld [vmem:[#allocation38_spill] sm:$0xff]  ;;  %v5790_v54 = vld [vmem:[#allocation148_spill] sm:$0xff] }
 0x31d   : >> { %2103 = vmatpush.bf16.msrb.mxu2 %v2758_v16  ;;  %2116 = vmatpush.bf16.msrb.mxu3 %v3014_v25  ;;  %v2950_v16 = vor.u32 %v5775_v33, %v5774_v18  ;;  %v2658_v25 = vor.u32 %v5777_v26, %v5776_v44  ;;  %v5789_v28 = vld [vmem:[#allocation30_spill] sm:$0xff]  ;;  %v5791_v49 = vld [vmem:[#allocation140_spill] sm:$0xff] }
 0x320   : >> { %2078 = vmatpush.bf16.msrb.mxu0 %v2722_v61  ;;  %2091 = vmatpush.bf16.msrb.mxu1 %v2978_v9  ;;  %v2914_v61 = vor.u32 %v5779_v5, %v5778_v10  ;;  %v2662_v9 = vor.u32 %v5781_v63, %v5780_v40  ;;  %v1269_v63 = vld [vmem:[%s5209_s22 + $0x8] sm:$0xff] }
 0x321   : >> { %2104 = vmatpush.bf16.msrb.mxu2 %v2726_v14  ;;  %2117 = vmatpush.bf16.msrb.mxu3 %v2982_v37  ;;  %v2918_v14 = vor.u32 %v5783_v43, %v5782_v6  ;;  %v2626_v37 = vor.u32 %v5785_v2, %v5784_v12 }
 0x324   : >> { %2079 = vmatpush.bf16.msrb.mxu0 %v2690_v42  ;;  %2092 = vmatpush.bf16.msrb.mxu1 %v2946_v51  ;;  %v2882_v42 = vor.u32 %v5787_v4, %v5786_v41  ;;  %v2630_v51 = vor.u32 %v5789_v28, %v5788_v17  ;;  %v1271_v28 = vld [vmem:[%s5209_s22 + $0x18] sm:$0xff] }
 0x325   : >> { %2105 = vmatpush.bf16.msrb.mxu2 %v2694_v57  ;;  %2118 = vmatpush.bf16.msrb.mxu3 %v2950_v16  ;;  %v2886_v57 = vor.u32 %v5791_v49, %v5790_v54 }
 0x328   : >> { %2080 = vmatpush.bf16.msrb.mxu0 %v2658_v25  ;;  %2093 = vmatpush.bf16.msrb.mxu1 %v2914_v61 }
 0x329   : >> { %2106 = vmatpush.bf16.msrb.mxu2 %v2662_v9  ;;  %2119 = vmatpush.bf16.msrb.mxu3 %v2918_v14  ;;  %v1270_v14 = vld [vmem:[%s5209_s22 + $0x10] sm:$0xff] }
 0x32c   : >> { %2081 = vmatpush.bf16.msrb.mxu0 %v2626_v37  ;;  %2094 = vmatpush.bf16.msrb.mxu1 %v2882_v42 }
 0x32d   : >> { %2107 = vmatpush.bf16.msrb.mxu2 %v2630_v51  ;;  %2120 = vmatpush.bf16.msrb.mxu3 %v2886_v57 }
 0x32f   : >> { %2082 = vmatmul.bf16.vlgmr.msrb.gmra.mxu0 %v4999_v60  ;;  %2095 = vmatmul.bf16.vlgmr.msrb.gmra.mxu1 %v5001_v34 }
 0x330   : >> { %2108 = vmatmul.bf16.vlgmr.msrb.gmra.mxu2 %v4999_v60  ;;  %2121 = vmatmul.bf16.vlgmr.msrb.gmra.mxu3 %v5001_v34  ;;  %v1268_v60 = vld [vmem:[%s5209_s22] sm:$0xff] }
 0x34c   : >> { %v1927_v18 = vpop.f32.mrf.mxu0  ;;  %v1940_v33 = vpop.f32.mrf.mxu1 }
 0x34d   : >> { %v1941_v61 = vadd.f32 %v1940_v33, %v1927_v18 }
 0x34f   : >> { %v2126_v34 = vadd.f32 %v1941_v61, %v1268_v60 }
 0x351   : >> { %v3111_v9 = vmul.f32 -1.442695, %v2126_v34 }
 0x353   : >> { %3373 = vpow2.f32 %v3111_v9 }
 0x354   : >> { %v1929_v26 = vpop.f32.mrf.mxu0  ;;  %v1942_v25 = vpop.f32.mrf.mxu1 }
 0x355   : >> { %v1953_v16 = vpop.f32.mrf.mxu2  ;;  %v1966_v44 = vpop.f32.mrf.mxu3 }
 0x356   : >> { %v1967_v40 = vadd.f32 %v1966_v44, %v1953_v16 }
 0x358   : >> { %v2127_v6 = vadd.f32 %v1967_v40, %v1269_v63 }
 0x359   : >> { %v3374_v42 = vpop.eup %3373 }
 0x35a   : >> { %v3112_v37 = vmul.f32 -1.442695, %v2127_v6  ;;  %v5215_v18 = vadd.f32 1.0, %v3374_v42 }
 0x35c   : >> { %3375 = vpow2.f32 %v3112_v37  ;;  %vm2147_vm5 = vweird.f32 %v5215_v18 }
 0x35d   : >> { %v1955_v10 = vpop.f32.mrf.mxu2  ;;  %v1968_v5 = vpop.f32.mrf.mxu3 }
 0x362   : >> { %v3376_v16 = vpop.eup %3375 }
 0x363   : >> { %v5218_v61 = vadd.f32 1.0, %v3376_v16 }
 0x365   : >> { %vm2162_vm13 = vweird.f32 %v5218_v61 }
 0x36c   : >> { %v1979_v43 = vpop.f32.mrf.mxu0  ;;  %v1992_v12 = vpop.f32.mrf.mxu1 }
 0x36d   : >> { %v1993_v2 = vadd.f32 %v1992_v12, %v1979_v43 }
 0x36f   : >> { %v2128_v41 = vadd.f32 %v1993_v2, %v1270_v14 }
 0x371   : >> { %v3113_v4 = vmul.f32 -1.442695, %v2128_v41 }
 0x373   : >> { %3377 = vpow2.f32 %v3113_v4 }
 0x374   : >> { %v1981_v49 = vpop.f32.mrf.mxu0  ;;  %v1994_v57 = vpop.f32.mrf.mxu1  ;;  %3379 = vrcp.f32 %v5215_v18 }
 0x375   : >> { %v2005_v17 = vpop.f32.mrf.mxu2  ;;  %v2018_v51 = vpop.f32.mrf.mxu3 }
 0x376   : >> { %v2019_v54 = vadd.f32 %v2018_v51, %v2005_v17 }
 0x378   : >> { %v2129_v33 = vadd.f32 %v2019_v54, %v1271_v28  ;;  %v1272_v28 = vld [vmem:[%s5209_s22 + $0x20] sm:$0xff] }
 0x379   : >> { %v3378_v26 = vpop.eup %3377 }
 0x37a   : >> { %v3114_v44 = vmul.f32 -1.442695, %v2129_v33  ;;  %v2178_v25 = vadd.f32 1.0, %v3378_v26  ;;  %v5220_v60 = vpop.eup %3379  ;;  %v2153_v26 = vand.u32 2147483648, %v5215_v18 }
 0x37b   : >> { %v2143_v9 = vmul.f32 %v5220_v60, %v5215_v18  ;;  %vm2148_vm6 = vweird.f32 %v5220_v60 }
 0x37c   : >> { %3381 = vpow2.f32 %v3114_v44  ;;  %vm2185_vm2 = vweird.f32 %v2178_v25  ;;  %v2191_v4 = vand.u32 2147483648, %v2178_v25  ;;  %v2189_v57 = vand.u32 2147483647, %v2178_v25  ;;  %vm5252_vm10 = vmor %vm2147_vm5, %vm2148_vm6 }
 0x37d   : >> { %v2007_v10 = vpop.f32.mrf.mxu2  ;;  %v2020_v5 = vpop.f32.mrf.mxu3  ;;  %3383 = vrcp.f32 %v2178_v25  ;;  %v2144_v12 = vsub.f32 1.0, %v2143_v9  ;;  %v2151_v9 = vand.u32 2147483647, %v5215_v18  ;;  %v2154_v18 = vor.u32 1.1754944e-38, %v2153_v26 }
 0x37e   : >> { %3385 = vrcp.f32 %v5218_v61  ;;  %v2192_v5 = vor.u32 1.1754944e-38, %v2191_v4  ;;  %vm2190_vm7 = vcmp.eq.f32.partialorder %v2189_v57, 8.507059e+37  ;;  %v2166_v26 = vand.u32 2147483647, %v5218_v61 }
 0x37f   : >> { %v2145_v54 = vmul.f32 %v5220_v60, %v2144_v12  ;;  %vm2152_vm12 = vcmp.eq.f32.partialorder %v2151_v9, 8.507059e+37 }
 0x380   : >> { %vm2167_vm1 = vcmp.eq.f32.partialorder %v2166_v26, 8.507059e+37 }
 0x382   : >> { %v3382_v34 = vpop.eup %3381 }
 0x383   : >> { %v5223_v40 = vadd.f32 1.0, %v3382_v34  ;;  %v3384_v63 = vpop.eup %3383 }
 0x384   : >> { %v2181_v6 = vmul.f32 %v3384_v63, %v2178_v25  ;;  %v5228_v14 = vpop.eup %3385  ;;  %vm2186_vm3 = vweird.f32 %v3384_v63 }
 0x385   : >> { %3387 = vrcp.f32 %v5223_v40  ;;  %v2158_v41 = vmul.f32 %v5228_v14, %v5218_v61  ;;  %vm5238_vm4 = vmor %vm2185_vm2, %vm2186_vm3  ;;  %vm2200_vm8 = vweird.f32 %v5223_v40  ;;  %vm2163_vm14 = vweird.f32 %v5228_v14 }
 0x386   : >> { %v2182_v43 = vsub.f32 1.0, %v2181_v6  ;;  %v2146_v6 = vadd.f32 %v5220_v60, %v2145_v54  ;;  %v2204_v54 = vand.u32 2147483647, %v5223_v40  ;;  %vm2164_vm0 = vmor %vm2162_vm13, %vm2163_vm14 }
 0x387   : >> { %v2159_v10 = vsub.f32 1.0, %v2158_v41  ;;  %v1263_v41 = vld [vmem:[#allocation4 + $0x8] sm:$0xff] }
 0x388   : >> { %v2183_v2 = vmul.f32 %v3384_v63, %v2182_v43  ;;  %v2150_v57 = vsel %vm5252_vm10, %v5220_v60, %v2146_v6  ;;  %vm2205_vm15 = vcmp.eq.f32.partialorder %v2204_v54, 8.507059e+37 }
 0x38a   : >> { %v2184_v49 = vadd.f32 %v3384_v63, %v2183_v2  ;;  %v2206_v2 = vand.u32 2147483648, %v5223_v40 }
 0x38b   : >> { %v5230_v37 = vpop.eup %3387 }
 0x38c   : >> { %v2196_v42 = vmul.f32 %v5230_v37, %v5223_v40  ;;  %v2031_v17 = vpop.f32.mrf.mxu0  ;;  %v2044_v51 = vpop.f32.mrf.mxu1  ;;  %v2188_v43 = vsel %vm5238_vm4, %v3384_v63, %v2184_v49  ;;  %vm2201_vm9 = vweird.f32 %v5230_v37  ;;  %v2160_v63 = vmul.f32 %v5228_v14, %v2159_v10  ;;  %v1274_v49 = vld [vmem:[%s5209_s22 + $0x30] sm:$0xff] }
 0x38d   : >> { %v2045_v16 = vadd.f32 %v2044_v51, %v2031_v17  ;;  %v2193_v4 = vsel %vm2190_vm7, %v2192_v5, %v2188_v43  ;;  %v1273_v17 = vld [vmem:[%s5209_s22 + $0x28] sm:$0xff]  ;;  %vm5261_vm11 = vmor %vm2200_vm8, %vm2201_vm9  ;;  %v2207_v10 = vor.u32 1.1754944e-38, %v2206_v2  ;;  %v2155_v43 = vsel %vm2152_vm12, %v2154_v18, %v2150_v57 }
 0x38e   : >> { %v2197_v44 = vsub.f32 1.0, %v2196_v42  ;;  %v2250_v40 = vmul.f32 %v2193_v4, %v1263_v41  ;;  %v2161_v12 = vadd.f32 %v5228_v14, %v2160_v63 }
 0x38f   : >> { %v2130_v34 = vadd.f32 %v2045_v16, %v1272_v28 }
 0x390   : >> { %v2198_v25 = vmul.f32 %v5230_v37, %v2197_v44  ;;  %v2165_v4 = vsel %vm2164_vm0, %v5228_v14, %v2161_v12  ;;  %v1275_v14 = vld [vmem:[%s5209_s22 + $0x38] sm:$0xff] }
 0x391   : >> { %3389 = vtanh.f32 %v2130_v34  ;;  %v2168_v34 = vand.u32 2147483648, %v5218_v61 }
 0x392   : >> { %v2199_v51 = vadd.f32 %v5230_v37, %v2198_v25 }
 0x393   : >> { %v2169_v2 = vor.u32 1.1754944e-38, %v2168_v34 }
 0x394   : >> { %v2033_v16 = vpop.f32.mrf.mxu0  ;;  %v2046_v44 = vpop.f32.mrf.mxu1  ;;  %v2203_v60 = vsel %vm5261_vm11, %v5230_v37, %v2199_v51 }
 0x395   : >> { %v2057_v42 = vpop.f32.mrf.mxu2  ;;  %v2070_v28 = vpop.f32.mrf.mxu3  ;;  %v2208_v41 = vsel %vm2205_vm15, %v2207_v10, %v2203_v60  ;;  %v2170_v63 = vsel %vm2167_vm1, %v2169_v2, %v2165_v4 }
 0x396   : >> { %v2071_v33 = vadd.f32 %v2070_v28, %v2057_v42  ;;  %v1264_v42 = vld [vmem:[#allocation4] sm:$0xff] }
 0x397   : >> { %v3390_v25 = vpop.eup %3389 }
 0x398   : >> { %v2131_v5 = vadd.f32 %v2071_v33, %v1273_v17  ;;  %v2252_v9 = vmul.f32 %v3390_v25, %v2155_v43  ;;  %v2251_v17 = vmul.f32 %v2208_v41, %v1264_v42 }
 0x39a   : >> { %3391 = vtanh.f32 %v2131_v5  ;;  %v2254_v6 = vadd.f32 %v2252_v9, %v2250_v40 }
 0x39c   : >> { %2262 = vst [vmem:[#allocation4 + $0x8] sm:$0xff] %v2254_v6 }
 0x39d   : >> { %v2059_v61 = vpop.f32.mrf.mxu2  ;;  %v2072_v18 = vpop.f32.mrf.mxu3 }
 0x3a0   : >> { %v3392_v28 = vpop.eup %3391 }
 0x3a1   : >> { %v2253_v37 = vmul.f32 %v3392_v28, %v2170_v63 }
 0x3a3   : >> { %v2255_v51 = vadd.f32 %v2253_v37, %v2251_v17 }
 0x3a5   : >> { %2263 = vst [vmem:[#allocation4] sm:$0xff] %v2255_v51 }
 0x3ac   : >> { %v2083_v54 = vpop.f32.mrf.mxu0  ;;  %v2096_v57 = vpop.f32.mrf.mxu1 }
 0x3ad   : >> { %v2097_v33 = vadd.f32 %v2096_v57, %v2083_v54 }
 0x3af   : >> { %v2132_v16 = vadd.f32 %v2097_v33, %v1274_v49 }
 0x3b1   : >> { %v3115_v44 = vmul.f32 -1.442695, %v2132_v16 }
 0x3b3   : >> { %3393 = vpow2.f32 %v3115_v44  ;;  %v2109_v10 = vpop.f32.mrf.mxu2  ;;  %v2122_v26 = vpop.f32.mrf.mxu3 }
 0x3b4   : >> { %v2123_v40 = vadd.f32 %v2122_v26, %v2109_v10  ;;  %v2085_v5 = vpop.f32.mrf.mxu0  ;;  %v2098_v34 = vpop.f32.mrf.mxu1 }
 0x3b6   : >> { %v2133_v25 = vadd.f32 %v2123_v40, %v1275_v14 }
 0x3b8   : >> { %v3116_v43 = vmul.f32 -1.442695, %v2133_v25 }
 0x3b9   : >> { %v3394_v12 = vpop.eup %3393 }
 0x3ba   : >> { %v2218_v60 = vadd.f32 1.0, %v3394_v12  ;;  %3395 = vpow2.f32 %v3116_v43 }
 0x3bb   : >> { %v2111_v9 = vpop.f32.mrf.mxu2  ;;  %v2124_v42 = vpop.f32.mrf.mxu3 }
 0x3bc   : >> { %3397 = vrcp.f32 %v2218_v60  ;;  %v2231_v17 = vand.u32 2147483648, %v2218_v60  ;;  %vm2225_vm2 = vweird.f32 %v2218_v60  ;;  %v2229_v63 = vand.u32 2147483647, %v2218_v60 }
 0x3be   : >> { %v2232_v49 = vor.u32 1.1754944e-38, %v2231_v17  ;;  %vm2230_vm5 = vcmp.eq.f32.partialorder %v2229_v63, 8.507059e+37 }
 0x3c0   : >> { %v3396_v2 = vpop.eup %3395 }
 0x3c1   : >> { %v2219_v41 = vadd.f32 1.0, %v3396_v2 }
 0x3c2   : >> { %v3398_v4 = vpop.eup %3397 }
 0x3c3   : >> { %v2221_v61 = vmul.f32 %v3398_v4, %v2218_v60  ;;  %3399 = vrcp.f32 %v2219_v41  ;;  %vm2226_vm3 = vweird.f32 %v3398_v4  ;;  %v2246_v14 = vand.u32 2147483648, %v2219_v41 }
 0x3c4   : >> { %3401 = vtanh.f32 %v2254_v6  ;;  %vm2227_vm4 = vmor %vm2225_vm2, %vm2226_vm3  ;;  %v2244_v40 = vand.u32 2147483647, %v2219_v41  ;;  %vm2240_vm7 = vweird.f32 %v2219_v41 }
 0x3c5   : >> { %v2222_v18 = vsub.f32 1.0, %v2221_v61  ;;  %3403 = vtanh.f32 %v2255_v51  ;;  %v2247_v34 = vor.u32 1.1754944e-38, %v2246_v14 }
 0x3c6   : >> { %vm2245_vm9 = vcmp.eq.f32.partialorder %v2244_v40, 8.507059e+37 }
 0x3c7   : >> { %v2223_v28 = vmul.f32 %v3398_v4, %v2222_v18 }
 0x3c9   : >> { %v3400_v37 = vpop.eup %3399  ;;  %v2224_v54 = vadd.f32 %v3398_v4, %v2223_v28 }
 0x3ca   : >> { %v2236_v57 = vmul.f32 %v3400_v37, %v2219_v41  ;;  %v3402_v16 = vpop.eup %3401  ;;  %vm2241_vm6 = vweird.f32 %v3400_v37 }
 0x3cb   : >> { %v2228_v33 = vsel %vm2227_vm4, %v3398_v4, %v2224_v54  ;;  %vm2242_vm8 = vmor %vm2240_vm7, %vm2241_vm6  ;;  %v3404_v43 = vpop.eup %3403 }
 0x3cc   : >> { %v2233_v44 = vsel %vm2230_vm5, %v2232_v49, %v2228_v33  ;;  %v2237_v10 = vsub.f32 1.0, %v2236_v57 }
 0x3cd   : >> { %v2258_v6 = vmul.f32 %v3402_v16, %v2233_v44 }
 0x3ce   : >> { %v2238_v26 = vmul.f32 %v3400_v37, %v2237_v10 }
 0x3cf   : >> { %2260 = vst [vmem:[#allocation3] sm:$0xff] %v2258_v6 }
 0x3d0   : >> { %2267 = vst [vmem:[%s2266_s5] sm:$0xff] %v2258_v6  ;;  %v2239_v5 = vadd.f32 %v3400_v37, %v2238_v26 }
 0x3d2   : >> { %v2243_v25 = vsel %vm2242_vm8, %v3400_v37, %v2239_v5 }
 0x3d3   : >> { %v2248_v12 = vsel %vm2245_vm9, %v2247_v34, %v2243_v25  ;;  %1256 = sbr.rel (!%p1254_p5) target bundleno = 686 (0x2ae), region = 131 }
 0x3d4   : >> { %v2259_v60 = vmul.f32 %v3404_v43, %v2248_v12 }
 0x3d6   : >> { %2261 = vst [vmem:[#allocation3 + $0x8] sm:$0xff] %v2259_v60 }
 0x3d7   : >> { %2268 = vst [vmem:[%s2266_s5 + $0x8] sm:$0xff] %v2259_v60 }
 0x3d8   : > { %3552 = shalt.err (!%p3549_p3)
}
 0x3d9   : > { %s3631_s1 = smov 256   ;;  %s3632_s9 = smov 512  }
 0x3da   : > { %s3633_s24 = smov 16  }
 0x3db   : > { %3285 = dma.vmem_to_hbm [thread:$0]  (%p3718_p9), %s2290_s23, 4096, %s2292_s0, %s2270_s15, %s3631_s1, %s3632_s9, %s3633_s24  }
 0x3dc PF: > { %s5798_s27 = sld [smem:[#allocation18_spill]]  ;;  %p3301_p4 = pnand %p2456_p12, %p3725_p11 }
 0x3dd   : > { %s5800_s26 = sld [smem:[#allocation20_spill]] }
 0x3de   : > { %p3302_p6 = pneg %p3301_p4 }
 0x3e2   : > { %s2306_s8 = sand.u32 1, %s5798_s27  }
 0x3e3   : > { %s2307_s12 = scalar_lea.sflag [#allocation7], %s2306_s8 }
 0x3e4   : > { %3594 = dma.done.wait (%p3302_p6), %s2307_s12, 4096  }
 0x3e5   : > { %3596 = vsyncadd (%p3302_p6), %s2307_s12, 4294963200  ;;  %s26_s20 = sadd.s32 1, %s5800_s26   ;;  %s5801_s22 = sld [smem:[#allocation19_spill]] }
 0x3e6   : > { %p23_p2 = scmp.ge.s32.totalorder %s26_s20, 4   ;;  %s5802_s17 = sld [smem:[#allocation22_spill]] }
 0x3e7   : > { %s5803_s28 = sld [smem:[#allocation21_spill]]  ;;  %s5804_s15 = smov %s3603_s16 }
 0x3e8   : > { %s5806_s18 = smov %s3615_s19 }
 0x3e9   :  { %25 = sbr.rel (!%p23_p2) target bundleno = 13 (0xd), region = 142 }
 0x3eb   : > { %s5805_s16 = smov %s5801_s22 }
 0x3ed   : > { %s5807_s19 = smov %s5803_s28 }
 0x3ee   :  { %2313 = vsyncpa [#allocation6], 1 }
 0x3ef   :  { %2315 = vsyncpa [#allocation6 + $0x1], 1 }
 0x3f0   :  { %2316 = vsyncpa [#allocation9], 1 }
 0x3f1   :  { %2318 = vsyncpa [#allocation9 + $0x1], 1 }
 0x3f2   :  { %2319 = vsyncpa [#allocation12], 1 }
 0x3f3   :  { %2321 = vsyncpa [#allocation12 + $0x1], 1 }
 0x3f4   :  { %2322 = vsyncpa [#allocation7], 1 }
 0x3f5   :  { %2324 = vsyncpa [#allocation7 + $0x1], 1 }

</bundles_post_ra>
